<compile_context>
chip_gen: v7x
topology: tpu7x:2x2x1
jax: 0.10.0
libtpu: 0.0.40
codegen_flags: <defaults>
</compile_context>

<pallas_src>
import jax
import jax.numpy as jnp
from jax import lax
from jax.experimental import pallas as pl
from jax.experimental.pallas import tpu as pltpu


# ---------------------------------------------------------------------------
# Single fused Pallas kernel: whole network for one sample per grid step.
# ---------------------------------------------------------------------------

def _net_kernel(x_ref, m1_ref, b1_ref, n2_ref, b2_ref, wf1_ref, bf1_ref,
                wf2_ref, bf2_ref, o_ref, s1e_ref, s1o_ref, s2_ref):
    f32 = jnp.float32
    bf16 = jnp.bfloat16

    # ------------------ conv1 + 2x2 maxpool + relu ------------------------
    # x_ref block: (1, 4, 7, 28) f32, row-phase split: [0, p, k, :] == image
    # row 4k+p.  conv1 output row r = 4k+q needs image rows r..r+4, so the
    # tap-i slice is phase (q+i)%4, rows (q+i)//4 .. (q+i)//4+5 (contiguous).
    xs = []
    for t in range(8):                       # t = q + i  in  0..7
        p, s = t % 4, t // 4
        xs.append(x_ref[0, p, pl.ds(s, 6), :].astype(bf16))        # (6, 28)

    def conv1_acc(q, dc):
        # conv1 rows 4k+q (k=0..5), columns 2*pc+dc; lanes = pc*10 + out_ch.
        parts = [jnp.dot(xs[q + i], m1_ref[dc, i], preferred_element_type=f32)
                 for i in range(5)]
        acc = parts[0]
        for term in parts[1:]:
            acc = acc + term
        return acc                                                 # (6, 120)

    # pooled row 2m pairs conv rows {4m, 4m+1}; pooled row 2m+1 -> {4m+2, 4m+3}
    p1e = jnp.maximum(jnp.maximum(conv1_acc(0, 0), conv1_acc(0, 1)),
                      jnp.maximum(conv1_acc(1, 0), conv1_acc(1, 1)))
    p1o = jnp.maximum(jnp.maximum(conv1_acc(2, 0), conv1_acc(2, 1)),
                      jnp.maximum(conv1_acc(3, 0), conv1_acc(3, 1)))
    s1e_ref[...] = jnp.maximum(p1e + b1_ref[...], 0.0)   # pooled rows 0,2,..,10
    s1o_ref[...] = jnp.maximum(p1o + b1_ref[...], 0.0)   # pooled rows 1,3,..,11

    # ------------------ conv2 + 2x2 maxpool + relu ------------------------
    # TODO(synk): nn.Dropout2d treated as identity (eval/inference mode).
    ys = []
    for t in range(6):                       # t = dr + i  in  0..5
        src = s1e_ref if t % 2 == 0 else s1o_ref
        ys.append(src[pl.ds(t // 2, 4), :].astype(bf16))           # (4, 120)

    def conv2_acc(dr, dc):
        # conv2 rows 2*pr2+dr (pr2=0..3), cols 2*pc2+dc; lanes = pc2*20 + o2.
        parts = [jnp.dot(ys[dr + i], n2_ref[dc, i], preferred_element_type=f32)
                 for i in range(5)]
        acc = parts[0]
        for term in parts[1:]:
            acc = acc + term
        return acc                                                 # (4, 80)

    p2 = jnp.maximum(jnp.maximum(conv2_acc(0, 0), conv2_acc(0, 1)),
                     jnp.maximum(conv2_acc(1, 0), conv2_acc(1, 1)))
    s2_ref[...] = jnp.maximum(p2 + b2_ref[...], 0.0)  # (4,80): rows=h, lanes=w*20+ch

    # ------------------ fc1 + relu -> fc2 -> log_softmax -------------------
    # PyTorch's view(-1, 320) flatten is pre-folded into wf1 at trace time.
    h1 = bf1_ref[...]                                              # (1, 50) f32
    for h in range(4):
        row = s2_ref[pl.ds(h, 1), :].astype(bf16)                  # (1, 80)
        h1 = h1 + jnp.dot(row, wf1_ref[h], preferred_element_type=f32)
    h1 = jnp.maximum(h1, 0.0).astype(bf16)                         # (1, 50)

    logits = jnp.dot(h1, wf2_ref[...], preferred_element_type=f32) + bf2_ref[...]
    m = jnp.max(logits, axis=-1, keepdims=True)
    sh = logits - m
    lse = jnp.log(jnp.sum(jnp.exp(sh), axis=-1, keepdims=True))
    o_ref[0] = (sh - lse).astype(o_ref.dtype)


# ---------------------------------------------------------------------------
# Trace-time weight folding (zero per-step runtime cost).
# ---------------------------------------------------------------------------

def prepare_params(p):
    """Fold conv kernels into Toeplitz matmul weights, fold the NCHW flatten
    into fc1, pre-tile biases, and cast matmul operands to bf16."""
    w1 = p["w_conv1"].astype(jnp.float32)    # (10, 1, 5, 5)  OIHW
    w2 = p["w_conv2"].astype(jnp.float32)    # (20, 10, 5, 5) OIHW
    wfc1 = p["w_fc1"].astype(jnp.float32)    # (50, 320)
    wfc2 = p["w_fc2"].astype(jnp.float32)    # (10, 50)

    # conv1 Toeplitz: m1[dc, i, c_in, pc*10 + o] = w1[o, 0, i, c_in - 2pc - dc]
    dc = jnp.arange(2).reshape(2, 1, 1, 1, 1)
    ti = jnp.arange(5).reshape(1, 5, 1, 1, 1)
    cin = jnp.arange(28).reshape(1, 1, 28, 1, 1)
    pc = jnp.arange(12).reshape(1, 1, 1, 12, 1)
    oc = jnp.arange(10).reshape(1, 1, 1, 1, 10)
    j = cin - 2 * pc - dc
    vals = w1[oc, 0, ti, jnp.clip(j, 0, 4)]
    m1 = jnp.where((j >= 0) & (j < 5), vals, 0.0).reshape(2, 5, 28, 120)

    # conv2 Toeplitz: n2[dc, i, c*10+ci, pc*20+o] = w2[o, ci, i, c - 2pc - dc]
    dc = jnp.arange(2).reshape(2, 1, 1, 1, 1, 1)
    ti = jnp.arange(5).reshape(1, 5, 1, 1, 1, 1)
    cc = jnp.arange(12).reshape(1, 1, 12, 1, 1, 1)
    ci = jnp.arange(10).reshape(1, 1, 1, 10, 1, 1)
    pc = jnp.arange(4).reshape(1, 1, 1, 1, 4, 1)
    oc = jnp.arange(20).reshape(1, 1, 1, 1, 1, 20)
    j = cc - 2 * pc - dc
    vals = w2[oc, ci, ti, jnp.clip(j, 0, 4)]
    n2 = jnp.where((j >= 0) & (j < 5), vals, 0.0).reshape(2, 5, 120, 80)

    # fc1 folded over the in-kernel (h, w*20+ch) layout of the pooled conv2
    # output so that it exactly reproduces PyTorch's view(-1, 320) (c, h, w).
    hh = jnp.arange(4).reshape(4, 1, 1, 1)
    ww = jnp.arange(4).reshape(1, 4, 1, 1)
    ch = jnp.arange(20).reshape(1, 1, 20, 1)
    uu = jnp.arange(50).reshape(1, 1, 1, 50)
    wf1 = wfc1[uu, ch * 16 + hh * 4 + ww].reshape(4, 80, 50)

    return {
        "m1": m1.astype(jnp.bfloat16),
        "b1t": jnp.tile(p["b_conv1"].astype(jnp.float32), 12).reshape(1, 120),
        "n2": n2.astype(jnp.bfloat16),
        "b2t": jnp.tile(p["b_conv2"].astype(jnp.float32), 4).reshape(1, 80),
        "wf1": wf1.astype(jnp.bfloat16),
        "bf1": p["b_fc1"].astype(jnp.float32).reshape(1, 50),
        "wf2": wfc2.T.astype(jnp.bfloat16),
        "bf2": p["b_fc2"].astype(jnp.float32).reshape(1, 10),
    }


# ---------------------------------------------------------------------------
# Forward pass: one pallas_call for the whole network.
# ---------------------------------------------------------------------------

@jax.jit
def net_forward(x_nchw, prep):
    n = x_nchw.shape[0]
    x = x_nchw.astype(jnp.float32).reshape(n, 28, 28)
    # Row-phase split (image row 4k+p -> [p, k]) so every in-kernel access is a
    # contiguous ref window; tiny one-time relayout of the raw input only.
    xp = x.reshape(n, 7, 4, 28).transpose(0, 2, 1, 3)              # (n, 4, 7, 28)

    out = pl.pallas_call(
        _net_kernel,
        out_shape=jax.ShapeDtypeStruct((n, 1, 10), jnp.float32),
        grid_spec=pltpu.PrefetchScalarGridSpec(
            num_scalar_prefetch=0,
            grid=(n,),
            in_specs=[
                pl.BlockSpec((1, 4, 7, 28), lambda i: (i, 0, 0, 0)),    # x
                pl.BlockSpec((2, 5, 28, 120), lambda i: (0, 0, 0, 0)),  # conv1 mats
                pl.BlockSpec((1, 120), lambda i: (0, 0)),               # b1 tiled
                pl.BlockSpec((2, 5, 120, 80), lambda i: (0, 0, 0, 0)),  # conv2 mats
                pl.BlockSpec((1, 80), lambda i: (0, 0)),                # b2 tiled
                pl.BlockSpec((4, 80, 50), lambda i: (0, 0, 0)),         # fc1 folded
                pl.BlockSpec((1, 50), lambda i: (0, 0)),                # b_fc1
                pl.BlockSpec((50, 10), lambda i: (0, 0)),               # fc2
                pl.BlockSpec((1, 10), lambda i: (0, 0)),                # b_fc2
            ],
            out_specs=pl.BlockSpec((1, 1, 10), lambda i: (i, 0, 0)),
            scratch_shapes=[
                pltpu.VMEM((6, 120), jnp.float32),  # conv1 pooled rows 0,2,..,10
                pltpu.VMEM((6, 120), jnp.float32),  # conv1 pooled rows 1,3,..,11
                pltpu.VMEM((4, 80), jnp.float32),   # conv2 pooled (h, w*20+ch)
            ],
        ),
        compiler_params=pltpu.CompilerParams(
            dimension_semantics=("parallel",),      # shard batch across cores
            vmem_limit_bytes=32 * 1024 * 1024,
        ),
    )(xp, prep["m1"], prep["b1t"], prep["n2"], prep["b2t"],
      prep["wf1"], prep["bf1"], prep["wf2"], prep["bf2"])
    return out.reshape(n, 10)


# ---------------------------------------------------------------------------
# Parameters (PyTorch layouts) and a pure-JAX f32 reference for validation.
# ---------------------------------------------------------------------------

def init_params(key):
    ks = jax.random.split(key, 8)
    s = 0.1
    return {
        "w_conv1": jax.random.normal(ks[0], (10, 1, 5, 5), jnp.float32) * s,
        "b_conv1": jax.random.normal(ks[1], (10,), jnp.float32) * s,
        "w_conv2": jax.random.normal(ks[2], (20, 10, 5, 5), jnp.float32) * s,
        "b_conv2": jax.random.normal(ks[3], (20,), jnp.float32) * s,
        "w_fc1": jax.random.normal(ks[4], (50, 320), jnp.float32) * s,
        "b_fc1": jax.random.normal(ks[5], (50,), jnp.float32) * s,
        "w_fc2": jax.random.normal(ks[6], (10, 50), jnp.float32) * s,
        "b_fc2": jax.random.normal(ks[7], (10,), jnp.float32) * s,
    }


def reference_forward(x_nchw, p):
    x = x_nchw.astype(jnp.float32)
    dn = ("NCHW", "OIHW", "NCHW")
    y = lax.conv_general_dilated(x, p["w_conv1"], (1, 1), "VALID",
                                 dimension_numbers=dn)
    y = y + p["b_conv1"].reshape(1, 10, 1, 1)
    y = lax.reduce_window(y, -jnp.inf, lax.max, (1, 1, 2, 2), (1, 1, 2, 2), "VALID")
    y = jnp.maximum(y, 0.0)
    y = lax.conv_general_dilated(y, p["w_conv2"], (1, 1), "VALID",
                                 dimension_numbers=dn)
    y = y + p["b_conv2"].reshape(1, 20, 1, 1)
    y = lax.reduce_window(y, -jnp.inf, lax.max, (1, 1, 2, 2), (1, 1, 2, 2), "VALID")
    y = jnp.maximum(y, 0.0)
    y = y.reshape(y.shape[0], 320)
    y = jnp.maximum(y @ p["w_fc1"].T + p["b_fc1"], 0.0)
    y = y @ p["w_fc2"].T + p["b_fc2"]
    return jax.nn.log_softmax(y, axis=-1)


if __name__ == "__main__":
    key = jax.random.PRNGKey(0)
    k_param, k_data = jax.random.split(key)
    params = init_params(k_param)
    prep = prepare_params(params)          # one-time weight folding

    # MNIST-shaped input (28x28x1 required so the flatten is exactly 320).
    x = jax.random.normal(k_data, (2, 1, 28, 28), jnp.float32)

    logp = jax.block_until_ready(net_forward(x, prep))

    assert logp.shape == (2, 10)
    assert jnp.allclose(jnp.exp(logp).sum(axis=1), 1.0, atol=1e-4)

    # Cross-check vs a pure-JAX f32 reference (kernel uses bf16 MXU inputs).
    ref = reference_forward(x, params)
    max_diff = float(jnp.max(jnp.abs(logp - ref)))
    assert max_diff < 0.15, f"mismatch vs reference: max |diff| = {max_diff:.4f}"

    print("KERNEL_OK")
</pallas_src>

<mosaic_0001>
module attributes {stable_mosaic.version = 11 : i64} {
  func.func @_net_kernel(%arg0: i32, %arg1: memref<1x4x7x28xf32, #tpu.memory_space<vmem>>, %arg2: memref<2x5x28x120xbf16, #tpu.memory_space<vmem>>, %arg3: memref<1x120xf32, #tpu.memory_space<vmem>>, %arg4: memref<2x5x120x80xbf16, #tpu.memory_space<vmem>>, %arg5: memref<1x80xf32, #tpu.memory_space<vmem>>, %arg6: memref<4x80x50xbf16, #tpu.memory_space<vmem>>, %arg7: memref<1x50xf32, #tpu.memory_space<vmem>>, %arg8: memref<50x10xbf16, #tpu.memory_space<vmem>>, %arg9: memref<1x10xf32, #tpu.memory_space<vmem>>, %arg10: memref<1x1x10xf32, #tpu.memory_space<vmem>>, %arg11: memref<6x120xf32, #tpu.memory_space<vmem>>, %arg12: memref<6x120xf32, #tpu.memory_space<vmem>>, %arg13: memref<4x80xf32, #tpu.memory_space<vmem>>) attributes {dimension_semantics = [#tpu.dimension_semantics<parallel>], iteration_bounds = array<i64: 2>, scalar_prefetch = 0 : i64, scratch_operands = 3 : i64, tpu.core_type = #tpu.core_type<tc>, window_params = [{transform_indices = @transform_0, window_bounds = array<i64: 1, 4, 7, 28>}, {pipeline_mode = #tpu.pipeline_mode<synchronous>, transform_indices = @transform_1, window_bounds = array<i64: 2, 5, 28, 120>}, {pipeline_mode = #tpu.pipeline_mode<synchronous>, transform_indices = @transform_2, window_bounds = array<i64: 1, 120>}, {pipeline_mode = #tpu.pipeline_mode<synchronous>, transform_indices = @transform_3, window_bounds = array<i64: 2, 5, 120, 80>}, {pipeline_mode = #tpu.pipeline_mode<synchronous>, transform_indices = @transform_4, window_bounds = array<i64: 1, 80>}, {pipeline_mode = #tpu.pipeline_mode<synchronous>, transform_indices = @transform_5, window_bounds = array<i64: 4, 80, 50>}, {pipeline_mode = #tpu.pipeline_mode<synchronous>, transform_indices = @transform_6, window_bounds = array<i64: 1, 50>}, {pipeline_mode = #tpu.pipeline_mode<synchronous>, transform_indices = @transform_7, window_bounds = array<i64: 50, 10>}, {pipeline_mode = #tpu.pipeline_mode<synchronous>, transform_indices = @transform_8, window_bounds = array<i64: 1, 10>}, {transform_indices = @transform_9, window_bounds = array<i64: 1, 1, 10>}]} {
    %c0 = arith.constant 0 : index
    %c0_0 = arith.constant 0 : index
    %c0_1 = arith.constant 0 : index
    %c0_2 = arith.constant 0 : index
    %0 = vector.load %arg1[%c0, %c0_0, %c0_1, %c0_2] : memref<1x4x7x28xf32, #tpu.memory_space<vmem>>, vector<1x1x6x28xf32>
    %1 = vector.shape_cast %0 : vector<1x1x6x28xf32> to vector<6x28xf32>
    %2 = arith.truncf %1 : vector<6x28xf32> to vector<6x28xbf16>
    %c0_3 = arith.constant 0 : index
    %c1 = arith.constant 1 : index
    %c0_4 = arith.constant 0 : index
    %c0_5 = arith.constant 0 : index
    %3 = vector.load %arg1[%c0_3, %c1, %c0_4, %c0_5] : memref<1x4x7x28xf32, #tpu.memory_space<vmem>>, vector<1x1x6x28xf32>
    %4 = vector.shape_cast %3 : vector<1x1x6x28xf32> to vector<6x28xf32>
    %5 = arith.truncf %4 : vector<6x28xf32> to vector<6x28xbf16>
    %c0_6 = arith.constant 0 : index
    %c2 = arith.constant 2 : index
    %c0_7 = arith.constant 0 : index
    %c0_8 = arith.constant 0 : index
    %6 = vector.load %arg1[%c0_6, %c2, %c0_7, %c0_8] : memref<1x4x7x28xf32, #tpu.memory_space<vmem>>, vector<1x1x6x28xf32>
    %7 = vector.shape_cast %6 : vector<1x1x6x28xf32> to vector<6x28xf32>
    %8 = arith.truncf %7 : vector<6x28xf32> to vector<6x28xbf16>
    %c0_9 = arith.constant 0 : index
    %c3 = arith.constant 3 : index
    %c0_10 = arith.constant 0 : index
    %c0_11 = arith.constant 0 : index
    %9 = vector.load %arg1[%c0_9, %c3, %c0_10, %c0_11] : memref<1x4x7x28xf32, #tpu.memory_space<vmem>>, vector<1x1x6x28xf32>
    %10 = vector.shape_cast %9 : vector<1x1x6x28xf32> to vector<6x28xf32>
    %11 = arith.truncf %10 : vector<6x28xf32> to vector<6x28xbf16>
    %c0_12 = arith.constant 0 : index
    %c0_13 = arith.constant 0 : index
    %c1_14 = arith.constant 1 : index
    %c0_15 = arith.constant 0 : index
    %12 = vector.load %arg1[%c0_12, %c0_13, %c1_14, %c0_15] : memref<1x4x7x28xf32, #tpu.memory_space<vmem>>, vector<1x1x6x28xf32>
    %13 = vector.shape_cast %12 : vector<1x1x6x28xf32> to vector<6x28xf32>
    %14 = arith.truncf %13 : vector<6x28xf32> to vector<6x28xbf16>
    %c0_16 = arith.constant 0 : index
    %c1_17 = arith.constant 1 : index
    %c1_18 = arith.constant 1 : index
    %c0_19 = arith.constant 0 : index
    %15 = vector.load %arg1[%c0_16, %c1_17, %c1_18, %c0_19] : memref<1x4x7x28xf32, #tpu.memory_space<vmem>>, vector<1x1x6x28xf32>
    %16 = vector.shape_cast %15 : vector<1x1x6x28xf32> to vector<6x28xf32>
    %17 = arith.truncf %16 : vector<6x28xf32> to vector<6x28xbf16>
    %c0_20 = arith.constant 0 : index
    %c2_21 = arith.constant 2 : index
    %c1_22 = arith.constant 1 : index
    %c0_23 = arith.constant 0 : index
    %18 = vector.load %arg1[%c0_20, %c2_21, %c1_22, %c0_23] : memref<1x4x7x28xf32, #tpu.memory_space<vmem>>, vector<1x1x6x28xf32>
    %19 = vector.shape_cast %18 : vector<1x1x6x28xf32> to vector<6x28xf32>
    %20 = arith.truncf %19 : vector<6x28xf32> to vector<6x28xbf16>
    %c0_24 = arith.constant 0 : index
    %c3_25 = arith.constant 3 : index
    %c1_26 = arith.constant 1 : index
    %c0_27 = arith.constant 0 : index
    %21 = vector.load %arg1[%c0_24, %c3_25, %c1_26, %c0_27] : memref<1x4x7x28xf32, #tpu.memory_space<vmem>>, vector<1x1x6x28xf32>
    %22 = vector.shape_cast %21 : vector<1x1x6x28xf32> to vector<6x28xf32>
    %23 = arith.truncf %22 : vector<6x28xf32> to vector<6x28xbf16>
    %c0_28 = arith.constant 0 : index
    %c0_29 = arith.constant 0 : index
    %c0_30 = arith.constant 0 : index
    %c0_31 = arith.constant 0 : index
    %24 = vector.load %arg2[%c0_28, %c0_29, %c0_30, %c0_31] : memref<2x5x28x120xbf16, #tpu.memory_space<vmem>>, vector<1x1x28x120xbf16>
    %25 = vector.shape_cast %24 : vector<1x1x28x120xbf16> to vector<28x120xbf16>
    %cst = arith.constant dense<0.000000e+00> : vector<6x120xf32>
    %26 = tpu.matmul %2, %25, %cst {dimension_numbers = #tpu.dot_dimension_numbers<[1], [0], [0], [1], [0, 0, 1, 1], [], []>} : vector<6x28xbf16>, vector<28x120xbf16>, vector<6x120xf32> -> vector<6x120xf32>
    %c0_32 = arith.constant 0 : index
    %c1_33 = arith.constant 1 : index
    %c0_34 = arith.constant 0 : index
    %c0_35 = arith.constant 0 : index
    %27 = vector.load %arg2[%c0_32, %c1_33, %c0_34, %c0_35] : memref<2x5x28x120xbf16, #tpu.memory_space<vmem>>, vector<1x1x28x120xbf16>
    %28 = vector.shape_cast %27 : vector<1x1x28x120xbf16> to vector<28x120xbf16>
    %cst_36 = arith.constant dense<0.000000e+00> : vector<6x120xf32>
    %29 = tpu.matmul %5, %28, %cst_36 {dimension_numbers = #tpu.dot_dimension_numbers<[1], [0], [0], [1], [0, 0, 1, 1], [], []>} : vector<6x28xbf16>, vector<28x120xbf16>, vector<6x120xf32> -> vector<6x120xf32>
    %c0_37 = arith.constant 0 : index
    %c2_38 = arith.constant 2 : index
    %c0_39 = arith.constant 0 : index
    %c0_40 = arith.constant 0 : index
    %30 = vector.load %arg2[%c0_37, %c2_38, %c0_39, %c0_40] : memref<2x5x28x120xbf16, #tpu.memory_space<vmem>>, vector<1x1x28x120xbf16>
    %31 = vector.shape_cast %30 : vector<1x1x28x120xbf16> to vector<28x120xbf16>
    %cst_41 = arith.constant dense<0.000000e+00> : vector<6x120xf32>
    %32 = tpu.matmul %8, %31, %cst_41 {dimension_numbers = #tpu.dot_dimension_numbers<[1], [0], [0], [1], [0, 0, 1, 1], [], []>} : vector<6x28xbf16>, vector<28x120xbf16>, vector<6x120xf32> -> vector<6x120xf32>
    %c0_42 = arith.constant 0 : index
    %c3_43 = arith.constant 3 : index
    %c0_44 = arith.constant 0 : index
    %c0_45 = arith.constant 0 : index
    %33 = vector.load %arg2[%c0_42, %c3_43, %c0_44, %c0_45] : memref<2x5x28x120xbf16, #tpu.memory_space<vmem>>, vector<1x1x28x120xbf16>
    %34 = vector.shape_cast %33 : vector<1x1x28x120xbf16> to vector<28x120xbf16>
    %cst_46 = arith.constant dense<0.000000e+00> : vector<6x120xf32>
    %35 = tpu.matmul %11, %34, %cst_46 {dimension_numbers = #tpu.dot_dimension_numbers<[1], [0], [0], [1], [0, 0, 1, 1], [], []>} : vector<6x28xbf16>, vector<28x120xbf16>, vector<6x120xf32> -> vector<6x120xf32>
    %c0_47 = arith.constant 0 : index
    %c4 = arith.constant 4 : index
    %c0_48 = arith.constant 0 : index
    %c0_49 = arith.constant 0 : index
    %36 = vector.load %arg2[%c0_47, %c4, %c0_48, %c0_49] : memref<2x5x28x120xbf16, #tpu.memory_space<vmem>>, vector<1x1x28x120xbf16>
    %37 = vector.shape_cast %36 : vector<1x1x28x120xbf16> to vector<28x120xbf16>
    %cst_50 = arith.constant dense<0.000000e+00> : vector<6x120xf32>
    %38 = tpu.matmul %14, %37, %cst_50 {dimension_numbers = #tpu.dot_dimension_numbers<[1], [0], [0], [1], [0, 0, 1, 1], [], []>} : vector<6x28xbf16>, vector<28x120xbf16>, vector<6x120xf32> -> vector<6x120xf32>
    %39 = arith.addf %26, %29 : vector<6x120xf32>
    %40 = arith.addf %39, %32 : vector<6x120xf32>
    %41 = arith.addf %40, %35 : vector<6x120xf32>
    %42 = arith.addf %41, %38 : vector<6x120xf32>
    %c1_51 = arith.constant 1 : index
    %c0_52 = arith.constant 0 : index
    %c0_53 = arith.constant 0 : index
    %c0_54 = arith.constant 0 : index
    %43 = vector.load %arg2[%c1_51, %c0_52, %c0_53, %c0_54] : memref<2x5x28x120xbf16, #tpu.memory_space<vmem>>, vector<1x1x28x120xbf16>
    %44 = vector.shape_cast %43 : vector<1x1x28x120xbf16> to vector<28x120xbf16>
    %cst_55 = arith.constant dense<0.000000e+00> : vector<6x120xf32>
    %45 = tpu.matmul %2, %44, %cst_55 {dimension_numbers = #tpu.dot_dimension_numbers<[1], [0], [0], [1], [0, 0, 1, 1], [], []>} : vector<6x28xbf16>, vector<28x120xbf16>, vector<6x120xf32> -> vector<6x120xf32>
    %c1_56 = arith.constant 1 : index
    %c1_57 = arith.constant 1 : index
    %c0_58 = arith.constant 0 : index
    %c0_59 = arith.constant 0 : index
    %46 = vector.load %arg2[%c1_56, %c1_57, %c0_58, %c0_59] : memref<2x5x28x120xbf16, #tpu.memory_space<vmem>>, vector<1x1x28x120xbf16>
    %47 = vector.shape_cast %46 : vector<1x1x28x120xbf16> to vector<28x120xbf16>
    %cst_60 = arith.constant dense<0.000000e+00> : vector<6x120xf32>
    %48 = tpu.matmul %5, %47, %cst_60 {dimension_numbers = #tpu.dot_dimension_numbers<[1], [0], [0], [1], [0, 0, 1, 1], [], []>} : vector<6x28xbf16>, vector<28x120xbf16>, vector<6x120xf32> -> vector<6x120xf32>
    %c1_61 = arith.constant 1 : index
    %c2_62 = arith.constant 2 : index
    %c0_63 = arith.constant 0 : index
    %c0_64 = arith.constant 0 : index
    %49 = vector.load %arg2[%c1_61, %c2_62, %c0_63, %c0_64] : memref<2x5x28x120xbf16, #tpu.memory_space<vmem>>, vector<1x1x28x120xbf16>
    %50 = vector.shape_cast %49 : vector<1x1x28x120xbf16> to vector<28x120xbf16>
    %cst_65 = arith.constant dense<0.000000e+00> : vector<6x120xf32>
    %51 = tpu.matmul %8, %50, %cst_65 {dimension_numbers = #tpu.dot_dimension_numbers<[1], [0], [0], [1], [0, 0, 1, 1], [], []>} : vector<6x28xbf16>, vector<28x120xbf16>, vector<6x120xf32> -> vector<6x120xf32>
    %c1_66 = arith.constant 1 : index
    %c3_67 = arith.constant 3 : index
    %c0_68 = arith.constant 0 : index
    %c0_69 = arith.constant 0 : index
    %52 = vector.load %arg2[%c1_66, %c3_67, %c0_68, %c0_69] : memref<2x5x28x120xbf16, #tpu.memory_space<vmem>>, vector<1x1x28x120xbf16>
    %53 = vector.shape_cast %52 : vector<1x1x28x120xbf16> to vector<28x120xbf16>
    %cst_70 = arith.constant dense<0.000000e+00> : vector<6x120xf32>
    %54 = tpu.matmul %11, %53, %cst_70 {dimension_numbers = #tpu.dot_dimension_numbers<[1], [0], [0], [1], [0, 0, 1, 1], [], []>} : vector<6x28xbf16>, vector<28x120xbf16>, vector<6x120xf32> -> vector<6x120xf32>
    %c1_71 = arith.constant 1 : index
    %c4_72 = arith.constant 4 : index
    %c0_73 = arith.constant 0 : index
    %c0_74 = arith.constant 0 : index
    %55 = vector.load %arg2[%c1_71, %c4_72, %c0_73, %c0_74] : memref<2x5x28x120xbf16, #tpu.memory_space<vmem>>, vector<1x1x28x120xbf16>
    %56 = vector.shape_cast %55 : vector<1x1x28x120xbf16> to vector<28x120xbf16>
    %cst_75 = arith.constant dense<0.000000e+00> : vector<6x120xf32>
    %57 = tpu.matmul %14, %56, %cst_75 {dimension_numbers = #tpu.dot_dimension_numbers<[1], [0], [0], [1], [0, 0, 1, 1], [], []>} : vector<6x28xbf16>, vector<28x120xbf16>, vector<6x120xf32> -> vector<6x120xf32>
    %58 = arith.addf %45, %48 : vector<6x120xf32>
    %59 = arith.addf %58, %51 : vector<6x120xf32>
    %60 = arith.addf %59, %54 : vector<6x120xf32>
    %61 = arith.addf %60, %57 : vector<6x120xf32>
    %62 = arith.maximumf %42, %61 : vector<6x120xf32>
    %c0_76 = arith.constant 0 : index
    %c0_77 = arith.constant 0 : index
    %c0_78 = arith.constant 0 : index
    %c0_79 = arith.constant 0 : index
    %63 = vector.load %arg2[%c0_76, %c0_77, %c0_78, %c0_79] : memref<2x5x28x120xbf16, #tpu.memory_space<vmem>>, vector<1x1x28x120xbf16>
    %64 = vector.shape_cast %63 : vector<1x1x28x120xbf16> to vector<28x120xbf16>
    %cst_80 = arith.constant dense<0.000000e+00> : vector<6x120xf32>
    %65 = tpu.matmul %5, %64, %cst_80 {dimension_numbers = #tpu.dot_dimension_numbers<[1], [0], [0], [1], [0, 0, 1, 1], [], []>} : vector<6x28xbf16>, vector<28x120xbf16>, vector<6x120xf32> -> vector<6x120xf32>
    %c0_81 = arith.constant 0 : index
    %c1_82 = arith.constant 1 : index
    %c0_83 = arith.constant 0 : index
    %c0_84 = arith.constant 0 : index
    %66 = vector.load %arg2[%c0_81, %c1_82, %c0_83, %c0_84] : memref<2x5x28x120xbf16, #tpu.memory_space<vmem>>, vector<1x1x28x120xbf16>
    %67 = vector.shape_cast %66 : vector<1x1x28x120xbf16> to vector<28x120xbf16>
    %cst_85 = arith.constant dense<0.000000e+00> : vector<6x120xf32>
    %68 = tpu.matmul %8, %67, %cst_85 {dimension_numbers = #tpu.dot_dimension_numbers<[1], [0], [0], [1], [0, 0, 1, 1], [], []>} : vector<6x28xbf16>, vector<28x120xbf16>, vector<6x120xf32> -> vector<6x120xf32>
    %c0_86 = arith.constant 0 : index
    %c2_87 = arith.constant 2 : index
    %c0_88 = arith.constant 0 : index
    %c0_89 = arith.constant 0 : index
    %69 = vector.load %arg2[%c0_86, %c2_87, %c0_88, %c0_89] : memref<2x5x28x120xbf16, #tpu.memory_space<vmem>>, vector<1x1x28x120xbf16>
    %70 = vector.shape_cast %69 : vector<1x1x28x120xbf16> to vector<28x120xbf16>
    %cst_90 = arith.constant dense<0.000000e+00> : vector<6x120xf32>
    %71 = tpu.matmul %11, %70, %cst_90 {dimension_numbers = #tpu.dot_dimension_numbers<[1], [0], [0], [1], [0, 0, 1, 1], [], []>} : vector<6x28xbf16>, vector<28x120xbf16>, vector<6x120xf32> -> vector<6x120xf32>
    %c0_91 = arith.constant 0 : index
    %c3_92 = arith.constant 3 : index
    %c0_93 = arith.constant 0 : index
    %c0_94 = arith.constant 0 : index
    %72 = vector.load %arg2[%c0_91, %c3_92, %c0_93, %c0_94] : memref<2x5x28x120xbf16, #tpu.memory_space<vmem>>, vector<1x1x28x120xbf16>
    %73 = vector.shape_cast %72 : vector<1x1x28x120xbf16> to vector<28x120xbf16>
    %cst_95 = arith.constant dense<0.000000e+00> : vector<6x120xf32>
    %74 = tpu.matmul %14, %73, %cst_95 {dimension_numbers = #tpu.dot_dimension_numbers<[1], [0], [0], [1], [0, 0, 1, 1], [], []>} : vector<6x28xbf16>, vector<28x120xbf16>, vector<6x120xf32> -> vector<6x120xf32>
    %c0_96 = arith.constant 0 : index
    %c4_97 = arith.constant 4 : index
    %c0_98 = arith.constant 0 : index
    %c0_99 = arith.constant 0 : index
    %75 = vector.load %arg2[%c0_96, %c4_97, %c0_98, %c0_99] : memref<2x5x28x120xbf16, #tpu.memory_space<vmem>>, vector<1x1x28x120xbf16>
    %76 = vector.shape_cast %75 : vector<1x1x28x120xbf16> to vector<28x120xbf16>
    %cst_100 = arith.constant dense<0.000000e+00> : vector<6x120xf32>
    %77 = tpu.matmul %17, %76, %cst_100 {dimension_numbers = #tpu.dot_dimension_numbers<[1], [0], [0], [1], [0, 0, 1, 1], [], []>} : vector<6x28xbf16>, vector<28x120xbf16>, vector<6x120xf32> -> vector<6x120xf32>
    %78 = arith.addf %65, %68 : vector<6x120xf32>
    %79 = arith.addf %78, %71 : vector<6x120xf32>
    %80 = arith.addf %79, %74 : vector<6x120xf32>
    %81 = arith.addf %80, %77 : vector<6x120xf32>
    %c1_101 = arith.constant 1 : index
    %c0_102 = arith.constant 0 : index
    %c0_103 = arith.constant 0 : index
    %c0_104 = arith.constant 0 : index
    %82 = vector.load %arg2[%c1_101, %c0_102, %c0_103, %c0_104] : memref<2x5x28x120xbf16, #tpu.memory_space<vmem>>, vector<1x1x28x120xbf16>
    %83 = vector.shape_cast %82 : vector<1x1x28x120xbf16> to vector<28x120xbf16>
    %cst_105 = arith.constant dense<0.000000e+00> : vector<6x120xf32>
    %84 = tpu.matmul %5, %83, %cst_105 {dimension_numbers = #tpu.dot_dimension_numbers<[1], [0], [0], [1], [0, 0, 1, 1], [], []>} : vector<6x28xbf16>, vector<28x120xbf16>, vector<6x120xf32> -> vector<6x120xf32>
    %c1_106 = arith.constant 1 : index
    %c1_107 = arith.constant 1 : index
    %c0_108 = arith.constant 0 : index
    %c0_109 = arith.constant 0 : index
    %85 = vector.load %arg2[%c1_106, %c1_107, %c0_108, %c0_109] : memref<2x5x28x120xbf16, #tpu.memory_space<vmem>>, vector<1x1x28x120xbf16>
    %86 = vector.shape_cast %85 : vector<1x1x28x120xbf16> to vector<28x120xbf16>
    %cst_110 = arith.constant dense<0.000000e+00> : vector<6x120xf32>
    %87 = tpu.matmul %8, %86, %cst_110 {dimension_numbers = #tpu.dot_dimension_numbers<[1], [0], [0], [1], [0, 0, 1, 1], [], []>} : vector<6x28xbf16>, vector<28x120xbf16>, vector<6x120xf32> -> vector<6x120xf32>
    %c1_111 = arith.constant 1 : index
    %c2_112 = arith.constant 2 : index
    %c0_113 = arith.constant 0 : index
    %c0_114 = arith.constant 0 : index
    %88 = vector.load %arg2[%c1_111, %c2_112, %c0_113, %c0_114] : memref<2x5x28x120xbf16, #tpu.memory_space<vmem>>, vector<1x1x28x120xbf16>
    %89 = vector.shape_cast %88 : vector<1x1x28x120xbf16> to vector<28x120xbf16>
    %cst_115 = arith.constant dense<0.000000e+00> : vector<6x120xf32>
    %90 = tpu.matmul %11, %89, %cst_115 {dimension_numbers = #tpu.dot_dimension_numbers<[1], [0], [0], [1], [0, 0, 1, 1], [], []>} : vector<6x28xbf16>, vector<28x120xbf16>, vector<6x120xf32> -> vector<6x120xf32>
    %c1_116 = arith.constant 1 : index
    %c3_117 = arith.constant 3 : index
    %c0_118 = arith.constant 0 : index
    %c0_119 = arith.constant 0 : index
    %91 = vector.load %arg2[%c1_116, %c3_117, %c0_118, %c0_119] : memref<2x5x28x120xbf16, #tpu.memory_space<vmem>>, vector<1x1x28x120xbf16>
    %92 = vector.shape_cast %91 : vector<1x1x28x120xbf16> to vector<28x120xbf16>
    %cst_120 = arith.constant dense<0.000000e+00> : vector<6x120xf32>
    %93 = tpu.matmul %14, %92, %cst_120 {dimension_numbers = #tpu.dot_dimension_numbers<[1], [0], [0], [1], [0, 0, 1, 1], [], []>} : vector<6x28xbf16>, vector<28x120xbf16>, vector<6x120xf32> -> vector<6x120xf32>
    %c1_121 = arith.constant 1 : index
    %c4_122 = arith.constant 4 : index
    %c0_123 = arith.constant 0 : index
    %c0_124 = arith.constant 0 : index
    %94 = vector.load %arg2[%c1_121, %c4_122, %c0_123, %c0_124] : memref<2x5x28x120xbf16, #tpu.memory_space<vmem>>, vector<1x1x28x120xbf16>
    %95 = vector.shape_cast %94 : vector<1x1x28x120xbf16> to vector<28x120xbf16>
    %cst_125 = arith.constant dense<0.000000e+00> : vector<6x120xf32>
    %96 = tpu.matmul %17, %95, %cst_125 {dimension_numbers = #tpu.dot_dimension_numbers<[1], [0], [0], [1], [0, 0, 1, 1], [], []>} : vector<6x28xbf16>, vector<28x120xbf16>, vector<6x120xf32> -> vector<6x120xf32>
    %97 = arith.addf %84, %87 : vector<6x120xf32>
    %98 = arith.addf %97, %90 : vector<6x120xf32>
    %99 = arith.addf %98, %93 : vector<6x120xf32>
    %100 = arith.addf %99, %96 : vector<6x120xf32>
    %101 = arith.maximumf %81, %100 : vector<6x120xf32>
    %102 = arith.maximumf %62, %101 : vector<6x120xf32>
    %c0_126 = arith.constant 0 : index
    %c0_127 = arith.constant 0 : index
    %c0_128 = arith.constant 0 : index
    %c0_129 = arith.constant 0 : index
    %103 = vector.load %arg2[%c0_126, %c0_127, %c0_128, %c0_129] : memref<2x5x28x120xbf16, #tpu.memory_space<vmem>>, vector<1x1x28x120xbf16>
    %104 = vector.shape_cast %103 : vector<1x1x28x120xbf16> to vector<28x120xbf16>
    %cst_130 = arith.constant dense<0.000000e+00> : vector<6x120xf32>
    %105 = tpu.matmul %8, %104, %cst_130 {dimension_numbers = #tpu.dot_dimension_numbers<[1], [0], [0], [1], [0, 0, 1, 1], [], []>} : vector<6x28xbf16>, vector<28x120xbf16>, vector<6x120xf32> -> vector<6x120xf32>
    %c0_131 = arith.constant 0 : index
    %c1_132 = arith.constant 1 : index
    %c0_133 = arith.constant 0 : index
    %c0_134 = arith.constant 0 : index
    %106 = vector.load %arg2[%c0_131, %c1_132, %c0_133, %c0_134] : memref<2x5x28x120xbf16, #tpu.memory_space<vmem>>, vector<1x1x28x120xbf16>
    %107 = vector.shape_cast %106 : vector<1x1x28x120xbf16> to vector<28x120xbf16>
    %cst_135 = arith.constant dense<0.000000e+00> : vector<6x120xf32>
    %108 = tpu.matmul %11, %107, %cst_135 {dimension_numbers = #tpu.dot_dimension_numbers<[1], [0], [0], [1], [0, 0, 1, 1], [], []>} : vector<6x28xbf16>, vector<28x120xbf16>, vector<6x120xf32> -> vector<6x120xf32>
    %c0_136 = arith.constant 0 : index
    %c2_137 = arith.constant 2 : index
    %c0_138 = arith.constant 0 : index
    %c0_139 = arith.constant 0 : index
    %109 = vector.load %arg2[%c0_136, %c2_137, %c0_138, %c0_139] : memref<2x5x28x120xbf16, #tpu.memory_space<vmem>>, vector<1x1x28x120xbf16>
    %110 = vector.shape_cast %109 : vector<1x1x28x120xbf16> to vector<28x120xbf16>
    %cst_140 = arith.constant dense<0.000000e+00> : vector<6x120xf32>
    %111 = tpu.matmul %14, %110, %cst_140 {dimension_numbers = #tpu.dot_dimension_numbers<[1], [0], [0], [1], [0, 0, 1, 1], [], []>} : vector<6x28xbf16>, vector<28x120xbf16>, vector<6x120xf32> -> vector<6x120xf32>
    %c0_141 = arith.constant 0 : index
    %c3_142 = arith.constant 3 : index
    %c0_143 = arith.constant 0 : index
    %c0_144 = arith.constant 0 : index
    %112 = vector.load %arg2[%c0_141, %c3_142, %c0_143, %c0_144] : memref<2x5x28x120xbf16, #tpu.memory_space<vmem>>, vector<1x1x28x120xbf16>
    %113 = vector.shape_cast %112 : vector<1x1x28x120xbf16> to vector<28x120xbf16>
    %cst_145 = arith.constant dense<0.000000e+00> : vector<6x120xf32>
    %114 = tpu.matmul %17, %113, %cst_145 {dimension_numbers = #tpu.dot_dimension_numbers<[1], [0], [0], [1], [0, 0, 1, 1], [], []>} : vector<6x28xbf16>, vector<28x120xbf16>, vector<6x120xf32> -> vector<6x120xf32>
    %c0_146 = arith.constant 0 : index
    %c4_147 = arith.constant 4 : index
    %c0_148 = arith.constant 0 : index
    %c0_149 = arith.constant 0 : index
    %115 = vector.load %arg2[%c0_146, %c4_147, %c0_148, %c0_149] : memref<2x5x28x120xbf16, #tpu.memory_space<vmem>>, vector<1x1x28x120xbf16>
    %116 = vector.shape_cast %115 : vector<1x1x28x120xbf16> to vector<28x120xbf16>
    %cst_150 = arith.constant dense<0.000000e+00> : vector<6x120xf32>
    %117 = tpu.matmul %20, %116, %cst_150 {dimension_numbers = #tpu.dot_dimension_numbers<[1], [0], [0], [1], [0, 0, 1, 1], [], []>} : vector<6x28xbf16>, vector<28x120xbf16>, vector<6x120xf32> -> vector<6x120xf32>
    %118 = arith.addf %105, %108 : vector<6x120xf32>
    %119 = arith.addf %118, %111 : vector<6x120xf32>
    %120 = arith.addf %119, %114 : vector<6x120xf32>
    %121 = arith.addf %120, %117 : vector<6x120xf32>
    %c1_151 = arith.constant 1 : index
    %c0_152 = arith.constant 0 : index
    %c0_153 = arith.constant 0 : index
    %c0_154 = arith.constant 0 : index
    %122 = vector.load %arg2[%c1_151, %c0_152, %c0_153, %c0_154] : memref<2x5x28x120xbf16, #tpu.memory_space<vmem>>, vector<1x1x28x120xbf16>
    %123 = vector.shape_cast %122 : vector<1x1x28x120xbf16> to vector<28x120xbf16>
    %cst_155 = arith.constant dense<0.000000e+00> : vector<6x120xf32>
    %124 = tpu.matmul %8, %123, %cst_155 {dimension_numbers = #tpu.dot_dimension_numbers<[1], [0], [0], [1], [0, 0, 1, 1], [], []>} : vector<6x28xbf16>, vector<28x120xbf16>, vector<6x120xf32> -> vector<6x120xf32>
    %c1_156 = arith.constant 1 : index
    %c1_157 = arith.constant 1 : index
    %c0_158 = arith.constant 0 : index
    %c0_159 = arith.constant 0 : index
    %125 = vector.load %arg2[%c1_156, %c1_157, %c0_158, %c0_159] : memref<2x5x28x120xbf16, #tpu.memory_space<vmem>>, vector<1x1x28x120xbf16>
    %126 = vector.shape_cast %125 : vector<1x1x28x120xbf16> to vector<28x120xbf16>
    %cst_160 = arith.constant dense<0.000000e+00> : vector<6x120xf32>
    %127 = tpu.matmul %11, %126, %cst_160 {dimension_numbers = #tpu.dot_dimension_numbers<[1], [0], [0], [1], [0, 0, 1, 1], [], []>} : vector<6x28xbf16>, vector<28x120xbf16>, vector<6x120xf32> -> vector<6x120xf32>
    %c1_161 = arith.constant 1 : index
    %c2_162 = arith.constant 2 : index
    %c0_163 = arith.constant 0 : index
    %c0_164 = arith.constant 0 : index
    %128 = vector.load %arg2[%c1_161, %c2_162, %c0_163, %c0_164] : memref<2x5x28x120xbf16, #tpu.memory_space<vmem>>, vector<1x1x28x120xbf16>
    %129 = vector.shape_cast %128 : vector<1x1x28x120xbf16> to vector<28x120xbf16>
    %cst_165 = arith.constant dense<0.000000e+00> : vector<6x120xf32>
    %130 = tpu.matmul %14, %129, %cst_165 {dimension_numbers = #tpu.dot_dimension_numbers<[1], [0], [0], [1], [0, 0, 1, 1], [], []>} : vector<6x28xbf16>, vector<28x120xbf16>, vector<6x120xf32> -> vector<6x120xf32>
    %c1_166 = arith.constant 1 : index
    %c3_167 = arith.constant 3 : index
    %c0_168 = arith.constant 0 : index
    %c0_169 = arith.constant 0 : index
    %131 = vector.load %arg2[%c1_166, %c3_167, %c0_168, %c0_169] : memref<2x5x28x120xbf16, #tpu.memory_space<vmem>>, vector<1x1x28x120xbf16>
    %132 = vector.shape_cast %131 : vector<1x1x28x120xbf16> to vector<28x120xbf16>
    %cst_170 = arith.constant dense<0.000000e+00> : vector<6x120xf32>
    %133 = tpu.matmul %17, %132, %cst_170 {dimension_numbers = #tpu.dot_dimension_numbers<[1], [0], [0], [1], [0, 0, 1, 1], [], []>} : vector<6x28xbf16>, vector<28x120xbf16>, vector<6x120xf32> -> vector<6x120xf32>
    %c1_171 = arith.constant 1 : index
    %c4_172 = arith.constant 4 : index
    %c0_173 = arith.constant 0 : index
    %c0_174 = arith.constant 0 : index
    %134 = vector.load %arg2[%c1_171, %c4_172, %c0_173, %c0_174] : memref<2x5x28x120xbf16, #tpu.memory_space<vmem>>, vector<1x1x28x120xbf16>
    %135 = vector.shape_cast %134 : vector<1x1x28x120xbf16> to vector<28x120xbf16>
    %cst_175 = arith.constant dense<0.000000e+00> : vector<6x120xf32>
    %136 = tpu.matmul %20, %135, %cst_175 {dimension_numbers = #tpu.dot_dimension_numbers<[1], [0], [0], [1], [0, 0, 1, 1], [], []>} : vector<6x28xbf16>, vector<28x120xbf16>, vector<6x120xf32> -> vector<6x120xf32>
    %137 = arith.addf %124, %127 : vector<6x120xf32>
    %138 = arith.addf %137, %130 : vector<6x120xf32>
    %139 = arith.addf %138, %133 : vector<6x120xf32>
    %140 = arith.addf %139, %136 : vector<6x120xf32>
    %141 = arith.maximumf %121, %140 : vector<6x120xf32>
    %c0_176 = arith.constant 0 : index
    %c0_177 = arith.constant 0 : index
    %c0_178 = arith.constant 0 : index
    %c0_179 = arith.constant 0 : index
    %142 = vector.load %arg2[%c0_176, %c0_177, %c0_178, %c0_179] : memref<2x5x28x120xbf16, #tpu.memory_space<vmem>>, vector<1x1x28x120xbf16>
    %143 = vector.shape_cast %142 : vector<1x1x28x120xbf16> to vector<28x120xbf16>
    %cst_180 = arith.constant dense<0.000000e+00> : vector<6x120xf32>
    %144 = tpu.matmul %11, %143, %cst_180 {dimension_numbers = #tpu.dot_dimension_numbers<[1], [0], [0], [1], [0, 0, 1, 1], [], []>} : vector<6x28xbf16>, vector<28x120xbf16>, vector<6x120xf32> -> vector<6x120xf32>
    %c0_181 = arith.constant 0 : index
    %c1_182 = arith.constant 1 : index
    %c0_183 = arith.constant 0 : index
    %c0_184 = arith.constant 0 : index
    %145 = vector.load %arg2[%c0_181, %c1_182, %c0_183, %c0_184] : memref<2x5x28x120xbf16, #tpu.memory_space<vmem>>, vector<1x1x28x120xbf16>
    %146 = vector.shape_cast %145 : vector<1x1x28x120xbf16> to vector<28x120xbf16>
    %cst_185 = arith.constant dense<0.000000e+00> : vector<6x120xf32>
    %147 = tpu.matmul %14, %146, %cst_185 {dimension_numbers = #tpu.dot_dimension_numbers<[1], [0], [0], [1], [0, 0, 1, 1], [], []>} : vector<6x28xbf16>, vector<28x120xbf16>, vector<6x120xf32> -> vector<6x120xf32>
    %c0_186 = arith.constant 0 : index
    %c2_187 = arith.constant 2 : index
    %c0_188 = arith.constant 0 : index
    %c0_189 = arith.constant 0 : index
    %148 = vector.load %arg2[%c0_186, %c2_187, %c0_188, %c0_189] : memref<2x5x28x120xbf16, #tpu.memory_space<vmem>>, vector<1x1x28x120xbf16>
    %149 = vector.shape_cast %148 : vector<1x1x28x120xbf16> to vector<28x120xbf16>
    %cst_190 = arith.constant dense<0.000000e+00> : vector<6x120xf32>
    %150 = tpu.matmul %17, %149, %cst_190 {dimension_numbers = #tpu.dot_dimension_numbers<[1], [0], [0], [1], [0, 0, 1, 1], [], []>} : vector<6x28xbf16>, vector<28x120xbf16>, vector<6x120xf32> -> vector<6x120xf32>
    %c0_191 = arith.constant 0 : index
    %c3_192 = arith.constant 3 : index
    %c0_193 = arith.constant 0 : index
    %c0_194 = arith.constant 0 : index
    %151 = vector.load %arg2[%c0_191, %c3_192, %c0_193, %c0_194] : memref<2x5x28x120xbf16, #tpu.memory_space<vmem>>, vector<1x1x28x120xbf16>
    %152 = vector.shape_cast %151 : vector<1x1x28x120xbf16> to vector<28x120xbf16>
    %cst_195 = arith.constant dense<0.000000e+00> : vector<6x120xf32>
    %153 = tpu.matmul %20, %152, %cst_195 {dimension_numbers = #tpu.dot_dimension_numbers<[1], [0], [0], [1], [0, 0, 1, 1], [], []>} : vector<6x28xbf16>, vector<28x120xbf16>, vector<6x120xf32> -> vector<6x120xf32>
    %c0_196 = arith.constant 0 : index
    %c4_197 = arith.constant 4 : index
    %c0_198 = arith.constant 0 : index
    %c0_199 = arith.constant 0 : index
    %154 = vector.load %arg2[%c0_196, %c4_197, %c0_198, %c0_199] : memref<2x5x28x120xbf16, #tpu.memory_space<vmem>>, vector<1x1x28x120xbf16>
    %155 = vector.shape_cast %154 : vector<1x1x28x120xbf16> to vector<28x120xbf16>
    %cst_200 = arith.constant dense<0.000000e+00> : vector<6x120xf32>
    %156 = tpu.matmul %23, %155, %cst_200 {dimension_numbers = #tpu.dot_dimension_numbers<[1], [0], [0], [1], [0, 0, 1, 1], [], []>} : vector<6x28xbf16>, vector<28x120xbf16>, vector<6x120xf32> -> vector<6x120xf32>
    %157 = arith.addf %144, %147 : vector<6x120xf32>
    %158 = arith.addf %157, %150 : vector<6x120xf32>
    %159 = arith.addf %158, %153 : vector<6x120xf32>
    %160 = arith.addf %159, %156 : vector<6x120xf32>
    %c1_201 = arith.constant 1 : index
    %c0_202 = arith.constant 0 : index
    %c0_203 = arith.constant 0 : index
    %c0_204 = arith.constant 0 : index
    %161 = vector.load %arg2[%c1_201, %c0_202, %c0_203, %c0_204] : memref<2x5x28x120xbf16, #tpu.memory_space<vmem>>, vector<1x1x28x120xbf16>
    %162 = vector.shape_cast %161 : vector<1x1x28x120xbf16> to vector<28x120xbf16>
    %cst_205 = arith.constant dense<0.000000e+00> : vector<6x120xf32>
    %163 = tpu.matmul %11, %162, %cst_205 {dimension_numbers = #tpu.dot_dimension_numbers<[1], [0], [0], [1], [0, 0, 1, 1], [], []>} : vector<6x28xbf16>, vector<28x120xbf16>, vector<6x120xf32> -> vector<6x120xf32>
    %c1_206 = arith.constant 1 : index
    %c1_207 = arith.constant 1 : index
    %c0_208 = arith.constant 0 : index
    %c0_209 = arith.constant 0 : index
    %164 = vector.load %arg2[%c1_206, %c1_207, %c0_208, %c0_209] : memref<2x5x28x120xbf16, #tpu.memory_space<vmem>>, vector<1x1x28x120xbf16>
    %165 = vector.shape_cast %164 : vector<1x1x28x120xbf16> to vector<28x120xbf16>
    %cst_210 = arith.constant dense<0.000000e+00> : vector<6x120xf32>
    %166 = tpu.matmul %14, %165, %cst_210 {dimension_numbers = #tpu.dot_dimension_numbers<[1], [0], [0], [1], [0, 0, 1, 1], [], []>} : vector<6x28xbf16>, vector<28x120xbf16>, vector<6x120xf32> -> vector<6x120xf32>
    %c1_211 = arith.constant 1 : index
    %c2_212 = arith.constant 2 : index
    %c0_213 = arith.constant 0 : index
    %c0_214 = arith.constant 0 : index
    %167 = vector.load %arg2[%c1_211, %c2_212, %c0_213, %c0_214] : memref<2x5x28x120xbf16, #tpu.memory_space<vmem>>, vector<1x1x28x120xbf16>
    %168 = vector.shape_cast %167 : vector<1x1x28x120xbf16> to vector<28x120xbf16>
    %cst_215 = arith.constant dense<0.000000e+00> : vector<6x120xf32>
    %169 = tpu.matmul %17, %168, %cst_215 {dimension_numbers = #tpu.dot_dimension_numbers<[1], [0], [0], [1], [0, 0, 1, 1], [], []>} : vector<6x28xbf16>, vector<28x120xbf16>, vector<6x120xf32> -> vector<6x120xf32>
    %c1_216 = arith.constant 1 : index
    %c3_217 = arith.constant 3 : index
    %c0_218 = arith.constant 0 : index
    %c0_219 = arith.constant 0 : index
    %170 = vector.load %arg2[%c1_216, %c3_217, %c0_218, %c0_219] : memref<2x5x28x120xbf16, #tpu.memory_space<vmem>>, vector<1x1x28x120xbf16>
    %171 = vector.shape_cast %170 : vector<1x1x28x120xbf16> to vector<28x120xbf16>
    %cst_220 = arith.constant dense<0.000000e+00> : vector<6x120xf32>
    %172 = tpu.matmul %20, %171, %cst_220 {dimension_numbers = #tpu.dot_dimension_numbers<[1], [0], [0], [1], [0, 0, 1, 1], [], []>} : vector<6x28xbf16>, vector<28x120xbf16>, vector<6x120xf32> -> vector<6x120xf32>
    %c1_221 = arith.constant 1 : index
    %c4_222 = arith.constant 4 : index
    %c0_223 = arith.constant 0 : index
    %c0_224 = arith.constant 0 : index
    %173 = vector.load %arg2[%c1_221, %c4_222, %c0_223, %c0_224] : memref<2x5x28x120xbf16, #tpu.memory_space<vmem>>, vector<1x1x28x120xbf16>
    %174 = vector.shape_cast %173 : vector<1x1x28x120xbf16> to vector<28x120xbf16>
    %cst_225 = arith.constant dense<0.000000e+00> : vector<6x120xf32>
    %175 = tpu.matmul %23, %174, %cst_225 {dimension_numbers = #tpu.dot_dimension_numbers<[1], [0], [0], [1], [0, 0, 1, 1], [], []>} : vector<6x28xbf16>, vector<28x120xbf16>, vector<6x120xf32> -> vector<6x120xf32>
    %176 = arith.addf %163, %166 : vector<6x120xf32>
    %177 = arith.addf %176, %169 : vector<6x120xf32>
    %178 = arith.addf %177, %172 : vector<6x120xf32>
    %179 = arith.addf %178, %175 : vector<6x120xf32>
    %180 = arith.maximumf %160, %179 : vector<6x120xf32>
    %181 = arith.maximumf %141, %180 : vector<6x120xf32>
    %c0_226 = arith.constant 0 : index
    %c0_227 = arith.constant 0 : index
    %182 = vector.load %arg3[%c0_226, %c0_227] : memref<1x120xf32, #tpu.memory_space<vmem>>, vector<1x120xf32>
    %183 = vector.broadcast %182 : vector<1x120xf32> to vector<6x120xf32>
    %184 = arith.addf %102, %183 : vector<6x120xf32>
    %cst_228 = arith.constant 0.000000e+00 : f32
    %185 = vector.broadcast %cst_228 : f32 to vector<6x120xf32>
    %186 = arith.maximumf %184, %185 : vector<6x120xf32>
    %c0_229 = arith.constant 0 : index
    %c0_230 = arith.constant 0 : index
    %187 = vector.load %arg11[%c0_229, %c0_230] : memref<6x120xf32, #tpu.memory_space<vmem>>, vector<6x120xf32>
    tpu.vector_store %arg11[%c0_229, %c0_230], %186 {strides = array<i32>} : memref<6x120xf32, #tpu.memory_space<vmem>>, vector<6x120xf32>,
    %c0_231 = arith.constant 0 : index
    %c0_232 = arith.constant 0 : index
    %188 = vector.load %arg3[%c0_231, %c0_232] : memref<1x120xf32, #tpu.memory_space<vmem>>, vector<1x120xf32>
    %189 = vector.broadcast %188 : vector<1x120xf32> to vector<6x120xf32>
    %190 = arith.addf %181, %189 : vector<6x120xf32>
    %cst_233 = arith.constant 0.000000e+00 : f32
    %191 = vector.broadcast %cst_233 : f32 to vector<6x120xf32>
    %192 = arith.maximumf %190, %191 : vector<6x120xf32>
    %c0_234 = arith.constant 0 : index
    %c0_235 = arith.constant 0 : index
    %193 = vector.load %arg12[%c0_234, %c0_235] : memref<6x120xf32, #tpu.memory_space<vmem>>, vector<6x120xf32>
    tpu.vector_store %arg12[%c0_234, %c0_235], %192 {strides = array<i32>} : memref<6x120xf32, #tpu.memory_space<vmem>>, vector<6x120xf32>,
    %c0_236 = arith.constant 0 : index
    %c0_237 = arith.constant 0 : index
    %194 = vector.load %arg11[%c0_236, %c0_237] : memref<6x120xf32, #tpu.memory_space<vmem>>, vector<4x120xf32>
    %195 = arith.truncf %194 : vector<4x120xf32> to vector<4x120xbf16>
    %c0_238 = arith.constant 0 : index
    %c0_239 = arith.constant 0 : index
    %196 = vector.load %arg12[%c0_238, %c0_239] : memref<6x120xf32, #tpu.memory_space<vmem>>, vector<4x120xf32>
    %197 = arith.truncf %196 : vector<4x120xf32> to vector<4x120xbf16>
    %c1_240 = arith.constant 1 : index
    %c0_241 = arith.constant 0 : index
    %198 = vector.load %arg11[%c1_240, %c0_241] : memref<6x120xf32, #tpu.memory_space<vmem>>, vector<4x120xf32>
    %199 = arith.truncf %198 : vector<4x120xf32> to vector<4x120xbf16>
    %c1_242 = arith.constant 1 : index
    %c0_243 = arith.constant 0 : index
    %200 = vector.load %arg12[%c1_242, %c0_243] : memref<6x120xf32, #tpu.memory_space<vmem>>, vector<4x120xf32>
    %201 = arith.truncf %200 : vector<4x120xf32> to vector<4x120xbf16>
    %c2_244 = arith.constant 2 : index
    %c0_245 = arith.constant 0 : index
    %202 = vector.load %arg11[%c2_244, %c0_245] : memref<6x120xf32, #tpu.memory_space<vmem>>, vector<4x120xf32>
    %203 = arith.truncf %202 : vector<4x120xf32> to vector<4x120xbf16>
    %c2_246 = arith.constant 2 : index
    %c0_247 = arith.constant 0 : index
    %204 = vector.load %arg12[%c2_246, %c0_247] : memref<6x120xf32, #tpu.memory_space<vmem>>, vector<4x120xf32>
    %205 = arith.truncf %204 : vector<4x120xf32> to vector<4x120xbf16>
    %c0_248 = arith.constant 0 : index
    %c0_249 = arith.constant 0 : index
    %c0_250 = arith.constant 0 : index
    %c0_251 = arith.constant 0 : index
    %206 = vector.load %arg4[%c0_248, %c0_249, %c0_250, %c0_251] : memref<2x5x120x80xbf16, #tpu.memory_space<vmem>>, vector<1x1x120x80xbf16>
    %207 = vector.shape_cast %206 : vector<1x1x120x80xbf16> to vector<120x80xbf16>
    %cst_252 = arith.constant dense<0.000000e+00> : vector<4x80xf32>
    %208 = tpu.matmul %195, %207, %cst_252 {dimension_numbers = #tpu.dot_dimension_numbers<[1], [0], [0], [1], [0, 0, 1, 1], [], []>} : vector<4x120xbf16>, vector<120x80xbf16>, vector<4x80xf32> -> vector<4x80xf32>
    %c0_253 = arith.constant 0 : index
    %c1_254 = arith.constant 1 : index
    %c0_255 = arith.constant 0 : index
    %c0_256 = arith.constant 0 : index
    %209 = vector.load %arg4[%c0_253, %c1_254, %c0_255, %c0_256] : memref<2x5x120x80xbf16, #tpu.memory_space<vmem>>, vector<1x1x120x80xbf16>
    %210 = vector.shape_cast %209 : vector<1x1x120x80xbf16> to vector<120x80xbf16>
    %cst_257 = arith.constant dense<0.000000e+00> : vector<4x80xf32>
    %211 = tpu.matmul %197, %210, %cst_257 {dimension_numbers = #tpu.dot_dimension_numbers<[1], [0], [0], [1], [0, 0, 1, 1], [], []>} : vector<4x120xbf16>, vector<120x80xbf16>, vector<4x80xf32> -> vector<4x80xf32>
    %c0_258 = arith.constant 0 : index
    %c2_259 = arith.constant 2 : index
    %c0_260 = arith.constant 0 : index
    %c0_261 = arith.constant 0 : index
    %212 = vector.load %arg4[%c0_258, %c2_259, %c0_260, %c0_261] : memref<2x5x120x80xbf16, #tpu.memory_space<vmem>>, vector<1x1x120x80xbf16>
    %213 = vector.shape_cast %212 : vector<1x1x120x80xbf16> to vector<120x80xbf16>
    %cst_262 = arith.constant dense<0.000000e+00> : vector<4x80xf32>
    %214 = tpu.matmul %199, %213, %cst_262 {dimension_numbers = #tpu.dot_dimension_numbers<[1], [0], [0], [1], [0, 0, 1, 1], [], []>} : vector<4x120xbf16>, vector<120x80xbf16>, vector<4x80xf32> -> vector<4x80xf32>
    %c0_263 = arith.constant 0 : index
    %c3_264 = arith.constant 3 : index
    %c0_265 = arith.constant 0 : index
    %c0_266 = arith.constant 0 : index
    %215 = vector.load %arg4[%c0_263, %c3_264, %c0_265, %c0_266] : memref<2x5x120x80xbf16, #tpu.memory_space<vmem>>, vector<1x1x120x80xbf16>
    %216 = vector.shape_cast %215 : vector<1x1x120x80xbf16> to vector<120x80xbf16>
    %cst_267 = arith.constant dense<0.000000e+00> : vector<4x80xf32>
    %217 = tpu.matmul %201, %216, %cst_267 {dimension_numbers = #tpu.dot_dimension_numbers<[1], [0], [0], [1], [0, 0, 1, 1], [], []>} : vector<4x120xbf16>, vector<120x80xbf16>, vector<4x80xf32> -> vector<4x80xf32>
    %c0_268 = arith.constant 0 : index
    %c4_269 = arith.constant 4 : index
    %c0_270 = arith.constant 0 : index
    %c0_271 = arith.constant 0 : index
    %218 = vector.load %arg4[%c0_268, %c4_269, %c0_270, %c0_271] : memref<2x5x120x80xbf16, #tpu.memory_space<vmem>>, vector<1x1x120x80xbf16>
    %219 = vector.shape_cast %218 : vector<1x1x120x80xbf16> to vector<120x80xbf16>
    %cst_272 = arith.constant dense<0.000000e+00> : vector<4x80xf32>
    %220 = tpu.matmul %203, %219, %cst_272 {dimension_numbers = #tpu.dot_dimension_numbers<[1], [0], [0], [1], [0, 0, 1, 1], [], []>} : vector<4x120xbf16>, vector<120x80xbf16>, vector<4x80xf32> -> vector<4x80xf32>
    %221 = arith.addf %208, %211 : vector<4x80xf32>
    %222 = arith.addf %221, %214 : vector<4x80xf32>
    %223 = arith.addf %222, %217 : vector<4x80xf32>
    %224 = arith.addf %223, %220 : vector<4x80xf32>
    %c1_273 = arith.constant 1 : index
    %c0_274 = arith.constant 0 : index
    %c0_275 = arith.constant 0 : index
    %c0_276 = arith.constant 0 : index
    %225 = vector.load %arg4[%c1_273, %c0_274, %c0_275, %c0_276] : memref<2x5x120x80xbf16, #tpu.memory_space<vmem>>, vector<1x1x120x80xbf16>
    %226 = vector.shape_cast %225 : vector<1x1x120x80xbf16> to vector<120x80xbf16>
    %cst_277 = arith.constant dense<0.000000e+00> : vector<4x80xf32>
    %227 = tpu.matmul %195, %226, %cst_277 {dimension_numbers = #tpu.dot_dimension_numbers<[1], [0], [0], [1], [0, 0, 1, 1], [], []>} : vector<4x120xbf16>, vector<120x80xbf16>, vector<4x80xf32> -> vector<4x80xf32>
    %c1_278 = arith.constant 1 : index
    %c1_279 = arith.constant 1 : index
    %c0_280 = arith.constant 0 : index
    %c0_281 = arith.constant 0 : index
    %228 = vector.load %arg4[%c1_278, %c1_279, %c0_280, %c0_281] : memref<2x5x120x80xbf16, #tpu.memory_space<vmem>>, vector<1x1x120x80xbf16>
    %229 = vector.shape_cast %228 : vector<1x1x120x80xbf16> to vector<120x80xbf16>
    %cst_282 = arith.constant dense<0.000000e+00> : vector<4x80xf32>
    %230 = tpu.matmul %197, %229, %cst_282 {dimension_numbers = #tpu.dot_dimension_numbers<[1], [0], [0], [1], [0, 0, 1, 1], [], []>} : vector<4x120xbf16>, vector<120x80xbf16>, vector<4x80xf32> -> vector<4x80xf32>
    %c1_283 = arith.constant 1 : index
    %c2_284 = arith.constant 2 : index
    %c0_285 = arith.constant 0 : index
    %c0_286 = arith.constant 0 : index
    %231 = vector.load %arg4[%c1_283, %c2_284, %c0_285, %c0_286] : memref<2x5x120x80xbf16, #tpu.memory_space<vmem>>, vector<1x1x120x80xbf16>
    %232 = vector.shape_cast %231 : vector<1x1x120x80xbf16> to vector<120x80xbf16>
    %cst_287 = arith.constant dense<0.000000e+00> : vector<4x80xf32>
    %233 = tpu.matmul %199, %232, %cst_287 {dimension_numbers = #tpu.dot_dimension_numbers<[1], [0], [0], [1], [0, 0, 1, 1], [], []>} : vector<4x120xbf16>, vector<120x80xbf16>, vector<4x80xf32> -> vector<4x80xf32>
    %c1_288 = arith.constant 1 : index
    %c3_289 = arith.constant 3 : index
    %c0_290 = arith.constant 0 : index
    %c0_291 = arith.constant 0 : index
    %234 = vector.load %arg4[%c1_288, %c3_289, %c0_290, %c0_291] : memref<2x5x120x80xbf16, #tpu.memory_space<vmem>>, vector<1x1x120x80xbf16>
    %235 = vector.shape_cast %234 : vector<1x1x120x80xbf16> to vector<120x80xbf16>
    %cst_292 = arith.constant dense<0.000000e+00> : vector<4x80xf32>
    %236 = tpu.matmul %201, %235, %cst_292 {dimension_numbers = #tpu.dot_dimension_numbers<[1], [0], [0], [1], [0, 0, 1, 1], [], []>} : vector<4x120xbf16>, vector<120x80xbf16>, vector<4x80xf32> -> vector<4x80xf32>
    %c1_293 = arith.constant 1 : index
    %c4_294 = arith.constant 4 : index
    %c0_295 = arith.constant 0 : index
    %c0_296 = arith.constant 0 : index
    %237 = vector.load %arg4[%c1_293, %c4_294, %c0_295, %c0_296] : memref<2x5x120x80xbf16, #tpu.memory_space<vmem>>, vector<1x1x120x80xbf16>
    %238 = vector.shape_cast %237 : vector<1x1x120x80xbf16> to vector<120x80xbf16>
    %cst_297 = arith.constant dense<0.000000e+00> : vector<4x80xf32>
    %239 = tpu.matmul %203, %238, %cst_297 {dimension_numbers = #tpu.dot_dimension_numbers<[1], [0], [0], [1], [0, 0, 1, 1], [], []>} : vector<4x120xbf16>, vector<120x80xbf16>, vector<4x80xf32> -> vector<4x80xf32>
    %240 = arith.addf %227, %230 : vector<4x80xf32>
    %241 = arith.addf %240, %233 : vector<4x80xf32>
    %242 = arith.addf %241, %236 : vector<4x80xf32>
    %243 = arith.addf %242, %239 : vector<4x80xf32>
    %244 = arith.maximumf %224, %243 : vector<4x80xf32>
    %c0_298 = arith.constant 0 : index
    %c0_299 = arith.constant 0 : index
    %c0_300 = arith.constant 0 : index
    %c0_301 = arith.constant 0 : index
    %245 = vector.load %arg4[%c0_298, %c0_299, %c0_300, %c0_301] : memref<2x5x120x80xbf16, #tpu.memory_space<vmem>>, vector<1x1x120x80xbf16>
    %246 = vector.shape_cast %245 : vector<1x1x120x80xbf16> to vector<120x80xbf16>
    %cst_302 = arith.constant dense<0.000000e+00> : vector<4x80xf32>
    %247 = tpu.matmul %197, %246, %cst_302 {dimension_numbers = #tpu.dot_dimension_numbers<[1], [0], [0], [1], [0, 0, 1, 1], [], []>} : vector<4x120xbf16>, vector<120x80xbf16>, vector<4x80xf32> -> vector<4x80xf32>
    %c0_303 = arith.constant 0 : index
    %c1_304 = arith.constant 1 : index
    %c0_305 = arith.constant 0 : index
    %c0_306 = arith.constant 0 : index
    %248 = vector.load %arg4[%c0_303, %c1_304, %c0_305, %c0_306] : memref<2x5x120x80xbf16, #tpu.memory_space<vmem>>, vector<1x1x120x80xbf16>
    %249 = vector.shape_cast %248 : vector<1x1x120x80xbf16> to vector<120x80xbf16>
    %cst_307 = arith.constant dense<0.000000e+00> : vector<4x80xf32>
    %250 = tpu.matmul %199, %249, %cst_307 {dimension_numbers = #tpu.dot_dimension_numbers<[1], [0], [0], [1], [0, 0, 1, 1], [], []>} : vector<4x120xbf16>, vector<120x80xbf16>, vector<4x80xf32> -> vector<4x80xf32>
    %c0_308 = arith.constant 0 : index
    %c2_309 = arith.constant 2 : index
    %c0_310 = arith.constant 0 : index
    %c0_311 = arith.constant 0 : index
    %251 = vector.load %arg4[%c0_308, %c2_309, %c0_310, %c0_311] : memref<2x5x120x80xbf16, #tpu.memory_space<vmem>>, vector<1x1x120x80xbf16>
    %252 = vector.shape_cast %251 : vector<1x1x120x80xbf16> to vector<120x80xbf16>
    %cst_312 = arith.constant dense<0.000000e+00> : vector<4x80xf32>
    %253 = tpu.matmul %201, %252, %cst_312 {dimension_numbers = #tpu.dot_dimension_numbers<[1], [0], [0], [1], [0, 0, 1, 1], [], []>} : vector<4x120xbf16>, vector<120x80xbf16>, vector<4x80xf32> -> vector<4x80xf32>
    %c0_313 = arith.constant 0 : index
    %c3_314 = arith.constant 3 : index
    %c0_315 = arith.constant 0 : index
    %c0_316 = arith.constant 0 : index
    %254 = vector.load %arg4[%c0_313, %c3_314, %c0_315, %c0_316] : memref<2x5x120x80xbf16, #tpu.memory_space<vmem>>, vector<1x1x120x80xbf16>
    %255 = vector.shape_cast %254 : vector<1x1x120x80xbf16> to vector<120x80xbf16>
    %cst_317 = arith.constant dense<0.000000e+00> : vector<4x80xf32>
    %256 = tpu.matmul %203, %255, %cst_317 {dimension_numbers = #tpu.dot_dimension_numbers<[1], [0], [0], [1], [0, 0, 1, 1], [], []>} : vector<4x120xbf16>, vector<120x80xbf16>, vector<4x80xf32> -> vector<4x80xf32>
    %c0_318 = arith.constant 0 : index
    %c4_319 = arith.constant 4 : index
    %c0_320 = arith.constant 0 : index
    %c0_321 = arith.constant 0 : index
    %257 = vector.load %arg4[%c0_318, %c4_319, %c0_320, %c0_321] : memref<2x5x120x80xbf16, #tpu.memory_space<vmem>>, vector<1x1x120x80xbf16>
    %258 = vector.shape_cast %257 : vector<1x1x120x80xbf16> to vector<120x80xbf16>
    %cst_322 = arith.constant dense<0.000000e+00> : vector<4x80xf32>
    %259 = tpu.matmul %205, %258, %cst_322 {dimension_numbers = #tpu.dot_dimension_numbers<[1], [0], [0], [1], [0, 0, 1, 1], [], []>} : vector<4x120xbf16>, vector<120x80xbf16>, vector<4x80xf32> -> vector<4x80xf32>
    %260 = arith.addf %247, %250 : vector<4x80xf32>
    %261 = arith.addf %260, %253 : vector<4x80xf32>
    %262 = arith.addf %261, %256 : vector<4x80xf32>
    %263 = arith.addf %262, %259 : vector<4x80xf32>
    %c1_323 = arith.constant 1 : index
    %c0_324 = arith.constant 0 : index
    %c0_325 = arith.constant 0 : index
    %c0_326 = arith.constant 0 : index
    %264 = vector.load %arg4[%c1_323, %c0_324, %c0_325, %c0_326] : memref<2x5x120x80xbf16, #tpu.memory_space<vmem>>, vector<1x1x120x80xbf16>
    %265 = vector.shape_cast %264 : vector<1x1x120x80xbf16> to vector<120x80xbf16>
    %cst_327 = arith.constant dense<0.000000e+00> : vector<4x80xf32>
    %266 = tpu.matmul %197, %265, %cst_327 {dimension_numbers = #tpu.dot_dimension_numbers<[1], [0], [0], [1], [0, 0, 1, 1], [], []>} : vector<4x120xbf16>, vector<120x80xbf16>, vector<4x80xf32> -> vector<4x80xf32>
    %c1_328 = arith.constant 1 : index
    %c1_329 = arith.constant 1 : index
    %c0_330 = arith.constant 0 : index
    %c0_331 = arith.constant 0 : index
    %267 = vector.load %arg4[%c1_328, %c1_329, %c0_330, %c0_331] : memref<2x5x120x80xbf16, #tpu.memory_space<vmem>>, vector<1x1x120x80xbf16>
    %268 = vector.shape_cast %267 : vector<1x1x120x80xbf16> to vector<120x80xbf16>
    %cst_332 = arith.constant dense<0.000000e+00> : vector<4x80xf32>
    %269 = tpu.matmul %199, %268, %cst_332 {dimension_numbers = #tpu.dot_dimension_numbers<[1], [0], [0], [1], [0, 0, 1, 1], [], []>} : vector<4x120xbf16>, vector<120x80xbf16>, vector<4x80xf32> -> vector<4x80xf32>
    %c1_333 = arith.constant 1 : index
    %c2_334 = arith.constant 2 : index
    %c0_335 = arith.constant 0 : index
    %c0_336 = arith.constant 0 : index
    %270 = vector.load %arg4[%c1_333, %c2_334, %c0_335, %c0_336] : memref<2x5x120x80xbf16, #tpu.memory_space<vmem>>, vector<1x1x120x80xbf16>
    %271 = vector.shape_cast %270 : vector<1x1x120x80xbf16> to vector<120x80xbf16>
    %cst_337 = arith.constant dense<0.000000e+00> : vector<4x80xf32>
    %272 = tpu.matmul %201, %271, %cst_337 {dimension_numbers = #tpu.dot_dimension_numbers<[1], [0], [0], [1], [0, 0, 1, 1], [], []>} : vector<4x120xbf16>, vector<120x80xbf16>, vector<4x80xf32> -> vector<4x80xf32>
    %c1_338 = arith.constant 1 : index
    %c3_339 = arith.constant 3 : index
    %c0_340 = arith.constant 0 : index
    %c0_341 = arith.constant 0 : index
    %273 = vector.load %arg4[%c1_338, %c3_339, %c0_340, %c0_341] : memref<2x5x120x80xbf16, #tpu.memory_space<vmem>>, vector<1x1x120x80xbf16>
    %274 = vector.shape_cast %273 : vector<1x1x120x80xbf16> to vector<120x80xbf16>
    %cst_342 = arith.constant dense<0.000000e+00> : vector<4x80xf32>
    %275 = tpu.matmul %203, %274, %cst_342 {dimension_numbers = #tpu.dot_dimension_numbers<[1], [0], [0], [1], [0, 0, 1, 1], [], []>} : vector<4x120xbf16>, vector<120x80xbf16>, vector<4x80xf32> -> vector<4x80xf32>
    %c1_343 = arith.constant 1 : index
    %c4_344 = arith.constant 4 : index
    %c0_345 = arith.constant 0 : index
    %c0_346 = arith.constant 0 : index
    %276 = vector.load %arg4[%c1_343, %c4_344, %c0_345, %c0_346] : memref<2x5x120x80xbf16, #tpu.memory_space<vmem>>, vector<1x1x120x80xbf16>
    %277 = vector.shape_cast %276 : vector<1x1x120x80xbf16> to vector<120x80xbf16>
    %cst_347 = arith.constant dense<0.000000e+00> : vector<4x80xf32>
    %278 = tpu.matmul %205, %277, %cst_347 {dimension_numbers = #tpu.dot_dimension_numbers<[1], [0], [0], [1], [0, 0, 1, 1], [], []>} : vector<4x120xbf16>, vector<120x80xbf16>, vector<4x80xf32> -> vector<4x80xf32>
    %279 = arith.addf %266, %269 : vector<4x80xf32>
    %280 = arith.addf %279, %272 : vector<4x80xf32>
    %281 = arith.addf %280, %275 : vector<4x80xf32>
    %282 = arith.addf %281, %278 : vector<4x80xf32>
    %283 = arith.maximumf %263, %282 : vector<4x80xf32>
    %284 = arith.maximumf %244, %283 : vector<4x80xf32>
    %c0_348 = arith.constant 0 : index
    %c0_349 = arith.constant 0 : index
    %285 = vector.load %arg5[%c0_348, %c0_349] : memref<1x80xf32, #tpu.memory_space<vmem>>, vector<1x80xf32>
    %286 = vector.broadcast %285 : vector<1x80xf32> to vector<4x80xf32>
    %287 = arith.addf %284, %286 : vector<4x80xf32>
    %cst_350 = arith.constant 0.000000e+00 : f32
    %288 = vector.broadcast %cst_350 : f32 to vector<4x80xf32>
    %289 = arith.maximumf %287, %288 : vector<4x80xf32>
    %c0_351 = arith.constant 0 : index
    %c0_352 = arith.constant 0 : index
    %290 = vector.load %arg13[%c0_351, %c0_352] : memref<4x80xf32, #tpu.memory_space<vmem>>, vector<4x80xf32>
    tpu.vector_store %arg13[%c0_351, %c0_352], %289 {strides = array<i32>} : memref<4x80xf32, #tpu.memory_space<vmem>>, vector<4x80xf32>,
    %c0_353 = arith.constant 0 : index
    %c0_354 = arith.constant 0 : index
    %291 = vector.load %arg7[%c0_353, %c0_354] : memref<1x50xf32, #tpu.memory_space<vmem>>, vector<1x50xf32>
    %c0_355 = arith.constant 0 : index
    %c0_356 = arith.constant 0 : index
    %292 = vector.load %arg13[%c0_355, %c0_356] : memref<4x80xf32, #tpu.memory_space<vmem>>, vector<1x80xf32>
    %293 = arith.truncf %292 : vector<1x80xf32> to vector<1x80xbf16>
    %c0_357 = arith.constant 0 : index
    %c0_358 = arith.constant 0 : index
    %c0_359 = arith.constant 0 : index
    %294 = vector.load %arg6[%c0_357, %c0_358, %c0_359] : memref<4x80x50xbf16, #tpu.memory_space<vmem>>, vector<1x80x50xbf16>
    %295 = vector.shape_cast %294 : vector<1x80x50xbf16> to vector<80x50xbf16>
    %cst_360 = arith.constant dense<0.000000e+00> : vector<1x50xf32>
    %296 = tpu.matmul %293, %295, %cst_360 {dimension_numbers = #tpu.dot_dimension_numbers<[1], [0], [0], [1], [0, 0, 1, 1], [], []>} : vector<1x80xbf16>, vector<80x50xbf16>, vector<1x50xf32> -> vector<1x50xf32>
    %297 = arith.addf %291, %296 : vector<1x50xf32>
    %c1_361 = arith.constant 1 : index
    %c0_362 = arith.constant 0 : index
    %298 = vector.load %arg13[%c1_361, %c0_362] : memref<4x80xf32, #tpu.memory_space<vmem>>, vector<1x80xf32>
    %299 = arith.truncf %298 : vector<1x80xf32> to vector<1x80xbf16>
    %c1_363 = arith.constant 1 : index
    %c0_364 = arith.constant 0 : index
    %c0_365 = arith.constant 0 : index
    %300 = vector.load %arg6[%c1_363, %c0_364, %c0_365] : memref<4x80x50xbf16, #tpu.memory_space<vmem>>, vector<1x80x50xbf16>
    %301 = vector.shape_cast %300 : vector<1x80x50xbf16> to vector<80x50xbf16>
    %cst_366 = arith.constant dense<0.000000e+00> : vector<1x50xf32>
    %302 = tpu.matmul %299, %301, %cst_366 {dimension_numbers = #tpu.dot_dimension_numbers<[1], [0], [0], [1], [0, 0, 1, 1], [], []>} : vector<1x80xbf16>, vector<80x50xbf16>, vector<1x50xf32> -> vector<1x50xf32>
    %303 = arith.addf %297, %302 : vector<1x50xf32>
    %c2_367 = arith.constant 2 : index
    %c0_368 = arith.constant 0 : index
    %304 = vector.load %arg13[%c2_367, %c0_368] : memref<4x80xf32, #tpu.memory_space<vmem>>, vector<1x80xf32>
    %305 = arith.truncf %304 : vector<1x80xf32> to vector<1x80xbf16>
    %c2_369 = arith.constant 2 : index
    %c0_370 = arith.constant 0 : index
    %c0_371 = arith.constant 0 : index
    %306 = vector.load %arg6[%c2_369, %c0_370, %c0_371] : memref<4x80x50xbf16, #tpu.memory_space<vmem>>, vector<1x80x50xbf16>
    %307 = vector.shape_cast %306 : vector<1x80x50xbf16> to vector<80x50xbf16>
    %cst_372 = arith.constant dense<0.000000e+00> : vector<1x50xf32>
    %308 = tpu.matmul %305, %307, %cst_372 {dimension_numbers = #tpu.dot_dimension_numbers<[1], [0], [0], [1], [0, 0, 1, 1], [], []>} : vector<1x80xbf16>, vector<80x50xbf16>, vector<1x50xf32> -> vector<1x50xf32>
    %309 = arith.addf %303, %308 : vector<1x50xf32>
    %c3_373 = arith.constant 3 : index
    %c0_374 = arith.constant 0 : index
    %310 = vector.load %arg13[%c3_373, %c0_374] : memref<4x80xf32, #tpu.memory_space<vmem>>, vector<1x80xf32>
    %311 = arith.truncf %310 : vector<1x80xf32> to vector<1x80xbf16>
    %c3_375 = arith.constant 3 : index
    %c0_376 = arith.constant 0 : index
    %c0_377 = arith.constant 0 : index
    %312 = vector.load %arg6[%c3_375, %c0_376, %c0_377] : memref<4x80x50xbf16, #tpu.memory_space<vmem>>, vector<1x80x50xbf16>
    %313 = vector.shape_cast %312 : vector<1x80x50xbf16> to vector<80x50xbf16>
    %cst_378 = arith.constant dense<0.000000e+00> : vector<1x50xf32>
    %314 = tpu.matmul %311, %313, %cst_378 {dimension_numbers = #tpu.dot_dimension_numbers<[1], [0], [0], [1], [0, 0, 1, 1], [], []>} : vector<1x80xbf16>, vector<80x50xbf16>, vector<1x50xf32> -> vector<1x50xf32>
    %315 = arith.addf %309, %314 : vector<1x50xf32>
    %cst_379 = arith.constant 0.000000e+00 : f32
    %316 = vector.broadcast %cst_379 : f32 to vector<1x50xf32>
    %317 = arith.maximumf %315, %316 : vector<1x50xf32>
    %318 = arith.truncf %317 : vector<1x50xf32> to vector<1x50xbf16>
    %c0_380 = arith.constant 0 : index
    %c0_381 = arith.constant 0 : index
    %319 = vector.load %arg8[%c0_380, %c0_381] : memref<50x10xbf16, #tpu.memory_space<vmem>>, vector<50x10xbf16>
    %cst_382 = arith.constant dense<0.000000e+00> : vector<1x10xf32>
    %320 = tpu.matmul %318, %319, %cst_382 {dimension_numbers = #tpu.dot_dimension_numbers<[1], [0], [0], [1], [0, 0, 1, 1], [], []>} : vector<1x50xbf16>, vector<50x10xbf16>, vector<1x10xf32> -> vector<1x10xf32>
    %c0_383 = arith.constant 0 : index
    %c0_384 = arith.constant 0 : index
    %321 = vector.load %arg9[%c0_383, %c0_384] : memref<1x10xf32, #tpu.memory_space<vmem>>, vector<1x10xf32>
    %322 = arith.addf %320, %321 : vector<1x10xf32>
    %cst_385 = arith.constant dense<0xFF800000> : vector<1xf32>
    %323 = vector.multi_reduction <maximumf>, %322, %cst_385 [1] : vector<1x10xf32> to vector<1xf32>
    %324 = vector.shape_cast %323 : vector<1xf32> to vector<1x1xf32>
    %325 = vector.broadcast %324 : vector<1x1xf32> to vector<1x10xf32>
    %326 = arith.subf %322, %325 : vector<1x10xf32>
    %327 = math.exp %326 : vector<1x10xf32>
    %cst_386 = arith.constant dense<0.000000e+00> : vector<1xf32>
    %328 = vector.multi_reduction <add>, %327, %cst_386 [1] : vector<1x10xf32> to vector<1xf32>
    %329 = vector.shape_cast %328 : vector<1xf32> to vector<1x1xf32>
    %330 = math.log %329 : vector<1x1xf32>
    %331 = vector.broadcast %330 : vector<1x1xf32> to vector<1x10xf32>
    %332 = arith.subf %326, %331 : vector<1x10xf32>
    %c0_387 = arith.constant 0 : index
    %c0_388 = arith.constant 0 : index
    %c0_389 = arith.constant 0 : index
    %333 = vector.load %arg10[%c0_387, %c0_388, %c0_389] : memref<1x1x10xf32, #tpu.memory_space<vmem>>, vector<1x1x10xf32>
    %334 = vector.shape_cast %333 : vector<1x1x10xf32> to vector<1x10xf32>
    %335 = vector.shape_cast %332 : vector<1x10xf32> to vector<1x1x10xf32>
    tpu.vector_store %arg10[%c0_387, %c0_388, %c0_389], %335 {strides = array<i32>} : memref<1x1x10xf32, #tpu.memory_space<vmem>>, vector<1x1x10xf32>,
    return
  }
  func.func @transform_0(%arg0: i32) -> (i32, i32, i32, i32) {
    %c0_i32 = arith.constant 0 : i32
    %c0_i32_0 = arith.constant 0 : i32
    %c0_i32_1 = arith.constant 0 : i32
    %c0_i32_2 = arith.constant 0 : i32
    return %arg0, %c0_i32, %c0_i32_0, %c0_i32_1 : i32, i32, i32, i32
  }
  func.func @transform_1(%arg0: i32) -> (i32, i32, i32, i32) {
    %c0_i32 = arith.constant 0 : i32
    %c0_i32_0 = arith.constant 0 : i32
    %c0_i32_1 = arith.constant 0 : i32
    %c0_i32_2 = arith.constant 0 : i32
    %c0_i32_3 = arith.constant 0 : i32
    return %c0_i32, %c0_i32_0, %c0_i32_1, %c0_i32_2 : i32, i32, i32, i32
  }
  func.func @transform_2(%arg0: i32) -> (i32, i32) {
    %c0_i32 = arith.constant 0 : i32
    %c0_i32_0 = arith.constant 0 : i32
    %c0_i32_1 = arith.constant 0 : i32
    return %c0_i32, %c0_i32_0 : i32, i32
  }
  func.func @transform_3(%arg0: i32) -> (i32, i32, i32, i32) {
    %c0_i32 = arith.constant 0 : i32
    %c0_i32_0 = arith.constant 0 : i32
    %c0_i32_1 = arith.constant 0 : i32
    %c0_i32_2 = arith.constant 0 : i32
    %c0_i32_3 = arith.constant 0 : i32
    return %c0_i32, %c0_i32_0, %c0_i32_1, %c0_i32_2 : i32, i32, i32, i32
  }
  func.func @transform_4(%arg0: i32) -> (i32, i32) {
    %c0_i32 = arith.constant 0 : i32
    %c0_i32_0 = arith.constant 0 : i32
    %c0_i32_1 = arith.constant 0 : i32
    return %c0_i32, %c0_i32_0 : i32, i32
  }
  func.func @transform_5(%arg0: i32) -> (i32, i32, i32) {
    %c0_i32 = arith.constant 0 : i32
    %c0_i32_0 = arith.constant 0 : i32
    %c0_i32_1 = arith.constant 0 : i32
    %c0_i32_2 = arith.constant 0 : i32
    return %c0_i32, %c0_i32_0, %c0_i32_1 : i32, i32, i32
  }
  func.func @transform_6(%arg0: i32) -> (i32, i32) {
    %c0_i32 = arith.constant 0 : i32
    %c0_i32_0 = arith.constant 0 : i32
    %c0_i32_1 = arith.constant 0 : i32
    return %c0_i32, %c0_i32_0 : i32, i32
  }
  func.func @transform_7(%arg0: i32) -> (i32, i32) {
    %c0_i32 = arith.constant 0 : i32
    %c0_i32_0 = arith.constant 0 : i32
    %c0_i32_1 = arith.constant 0 : i32
    return %c0_i32, %c0_i32_0 : i32, i32
  }
  func.func @transform_8(%arg0: i32) -> (i32, i32) {
    %c0_i32 = arith.constant 0 : i32
    %c0_i32_0 = arith.constant 0 : i32
    %c0_i32_1 = arith.constant 0 : i32
    return %c0_i32, %c0_i32_0 : i32, i32
  }
  func.func @transform_9(%arg0: i32) -> (i32, i32, i32) {
    %c0_i32 = arith.constant 0 : i32
    %c0_i32_0 = arith.constant 0 : i32
    %c0_i32_1 = arith.constant 0 : i32
    return %arg0, %c0_i32, %c0_i32_0 : i32, i32, i32
  }
}

</mosaic_0001>

<bundles_post_ra>
// kernel: net_forward.1
= control target key start
LH: loop header
LB: loop body
LE: loop exit
PB: predicated region body
PF: predicated region fallthrough
CT: control target
= control target key end

     0   :  { %14 = vsyncpa [#allocation6], 0  ;;  %s7731_s0 = inlined_call_operand.vmem [shape: f32[2,4,7,28], index: 0, kind: input, shape index: {}]   ;;  %s7732_s1 = inlined_call_operand.vmem [shape: bf16[2,5,28,120], index: 1, kind: input, shape index: {}]   ;;  %s7733_s2 = inlined_call_operand.vmem [shape: f32[1,120], index: 2, kind: input, shape index: {}]   ;;  %s7734_s3 = inlined_call_operand.vmem [shape: bf16[2,5,120,80], index: 3, kind: input, shape index: {}]   ;;  %s7735_s4 = inlined_call_operand.vmem [shape: f32[1,80], index: 4, kind: input, shape index: {}]   ;;  %s7736_s5 = inlined_call_operand.vmem [shape: bf16[4,80,50], index: 5, kind: input, shape index: {}]   ;;  %s7737_s6 = inlined_call_operand.vmem [shape: f32[1,50], index: 6, kind: input, shape index: {}]   ;;  %s7738_s7 = inlined_call_operand.vmem [shape: bf16[50,10], index: 7, kind: input, shape index: {}]   ;;  %s7739_s8 = inlined_call_operand.vmem [shape: f32[1,10], index: 8, kind: input, shape index: {}]   ;;  %s7740_s9 = inlined_call_operand.hbm [shape: f32[2,1,10], index: 9, kind: output, shape index: {}]  }
   0x1   :  { %16 = vsyncpa [#allocation6 + $0x1], 0  ;;  %s6237_s30 = smov 0   ;;  %s6239_s10 = smov 0  }
   0x2   :  { %s6241_s11 = smov 0   ;;  %s6243_s12 = smov 0  }
   0x3 LB: > { %s6258_s13 = sadd.s32 4294967295, %s6182_s12   ;;  %s4223_s14 = sadd.s32 4294967294, %s6182_s12   ;;  %s6182_s12 = sphi %s6243_s12, %s7753_s12   ;;  %s6178_s11 = sphi %s6241_s11, %s7752_s11   ;;  %s6174_s10 = sphi %s6239_s10, %s7751_s10   ;;  %s6170_s30 = sphi %s6237_s30, %s7750_s30  }
   0x4   : > { %s6262_s15 = sadd.s32 1, %s6182_s12   ;;  %s223_s16 = sadd.s32 1, %s6178_s11 }
   0x5   : > { %s220_s17 = ssub.s32 %s6182_s12, %s6262_s15  ;;  %p233_p0 = scmp.ne.s32.totalorder %s6178_s11, %s6174_s10 }
   0x6   : > { %p221_p1 = scmp.eq.s32.totalorder %s220_s17, 0  ;;  %p234_p2 = scmp.eq.s32.totalorder %s6258_s13, 1 }
   0x7   : > { %p239_p3 = scmp.ne.s32.totalorder %s6174_s10, %s6170_s30  ;;  %p240_p4 = scmp.eq.s32.totalorder %s4223_s14, 1 }
   0x8   : > { %s6273_s18 = scalar_select %p221_p1, %s6178_s11, %s223_s16  }
   0x9   : > { %p6275_p5 = por %p234_p2, %p233_p0  ;;  %p6279_p6 = por %p240_p4, %p239_p3 }
   0xa   : > { %p4226_p7 = scmp.ge.s32.totalorder %s6182_s12, 1  ;;  %p290_p8 = scmp.lt.s32.totalorder %s6182_s12, 3 }
   0xc   : > { %p291_p9 = pnand %p4226_p7, %p290_p8 }
   0xe   : > { %294 = sbr.rel (%p291_p9) target bundleno = 1849 (0x739), region = 56 }
  0x15   : > { %v6288_v0 = vld [vmem:[%s7732_s1 + $0x10] sm:$0xff]   ;;  %v6184_v1 = vmov 0.0   ;;  %v6295_v2 = vld [vmem:[%s7732_s1 + $0x60] sm:$0xff]   ;;  %vm374_vm0 = vcmask 1045504   ;;  %v5994_v3 = vld [vmem:[%s7732_s1 + $0x18] sm:$0x3f]  }
  0x16   : > { %4961 = vmatprep.subr.bf16.mxu0 %v6184_v1  ;;  %5001 = vmatprep.subr.bf16.mxu1 %v6184_v1  ;;  %v5995_v4 = vld [vmem:[%s7732_s1 + $0x68] sm:$0x3f]   ;;  %v6308_v5 = vsel %vm374_vm0, %v5994_v3, 0  ;;  %p325_p10 = scmp.lt.s32.totalorder %s6258_s13, 1  ;;  %vm6185_vm1 = vmmov 0   ;;  %v6326_v7 = vld [vmem:[%s7732_s1 + $0x20] sm:$0xff]  }
  0x17   : > { %4962 = vmatpush3.bf16.msra.mxu0 %v6288_v0  ;;  %5002 = vmatpush3.bf16.msra.mxu1 %v6295_v2  ;;  %v6312_v6 = vsel %vm374_vm0, %v5995_v4, 0  ;;  %vm370_vm2 = vcmask 228352   ;;  %v6336_v8 = vld [vmem:[%s7732_s1 + $0x70] sm:$0xff]   ;;  %v5998_v10 = vld [vmem:[%s7732_s1 + $0x28] sm:$0x3f]   ;;  %v6392_v22 = vld [vmem:[%s7732_s1 + $0x80] sm:$0xff]  }
  0x18   : > { %4963 = vmatprep.subr.bf16.mxu0 %v6184_v1  ;;  %5003 = vmatprep.subr.bf16.mxu1 %v6184_v1  ;;  %s326_s29 = scalar_select %p325_p10, %s6258_s13, 1  ;;  %v5999_v11 = vld [vmem:[%s7732_s1 + $0x78] sm:$0x3f]   ;;  %v6356_v13 = vsel %vm374_vm0, %v5998_v10, 0  ;;  %v6003_v17 = vld [vmem:[%s7732_s1 + $0x88] sm:$0x3f]  }
  0x19   : > { %4965 = vmatprep.mubr.msk.bf16.mxu0 %vm6185_vm1, %v6184_v1  ;;  %5005 = vmatprep.mubr.msk.bf16.mxu1 %vm6185_vm1, %v6184_v1  ;;  %v6359_v14 = vsel %vm374_vm0, %v5999_v11, 0  ;;  %v6002_v16 = vld [vmem:[%s7732_s1 + $0x38] sm:$0x3f]   ;;  %v6006_v18 = vld [vmem:[%s7732_s1 + $0x48] sm:$0x3f]   ;;  %v6387_v21 = vld [vmem:[%s7732_s1 + $0x30] sm:$0xff]  }
  0x1a   : > { %s4631_s14 = sshll.u32 %s326_s29, 5  ;;  %v6007_v19 = vld [vmem:[%s7732_s1 + $0x98] sm:$0x3f]   ;;  %v6010_v23 = vld [vmem:[%s7732_s1 + $0x8] sm:$0x3f]   ;;  %v6401_v25 = vsel %vm374_vm0, %v6002_v16, 0 }
  0x1b   : > { %4964 = vmatpush3.bf16.msra.mxu0 %v6308_v5  ;;  %5004 = vmatpush3.bf16.msra.mxu1 %v6312_v6  ;;  %s6331_s23 = scalar_lea.vmem %s7731_s0, %s4631_s14  ;;  %v6011_v24 = vld [vmem:[%s7732_s1 + $0x58] sm:$0x3f]   ;;  %v6404_v26 = vsel %vm374_vm0, %v6003_v17, 0  ;;  %v6407_v27 = vsel %vm374_vm0, %v6006_v18, 0  ;;  %v6410_v28 = vsel %vm374_vm0, %v6007_v19, 0  ;;  %v6419_v29 = vsel %vm374_vm0, %v6010_v23, 0 }
  0x1c   : > { %4969 = vmatprep.subr.bf16.mxu0 %v6184_v1  ;;  %5009 = vmatprep.subr.bf16.mxu1 %v6184_v1  ;;  %v4229_v9 = vld [vmem:[%s6331_s23 + $0x8] sm:$0x3f]  ;;  %v4230_v15 = vld [vmem:[%s6331_s23 + $0x10] sm:$0x3f]  ;;  %v6422_v30 = vsel %vm374_vm0, %v6011_v24, 0  ;;  %v6438_v32 = vld [vmem:[%s7732_s1 + $0x40] sm:$0xff]  }
  0x1d   : > { %v6345_v12 = vpack.c.bf16 %v4229_v9, %v4229_v9  ;;  %v6382_v20 = vpack.c.bf16 %v4230_v15, %v4230_v15  ;;  %v4231_v31 = vld [vmem:[%s6331_s23 + $0x18] sm:$0x3f]  ;;  %v6443_v33 = vld [vmem:[%s7732_s1 + $0x90] sm:$0xff]   ;;  %v342_v35 = vld [vmem:[%s6331_s23 + $0x1] sm:$0x3f]  ;;  %vm2308_vm3 = vcmask 1043456  }
  0x1e   : > { %v6445_v34 = vpack.c.bf16 %v4231_v31, %v4231_v31  ;;  %v6467_v36 = vld [vmem:[%s7732_s1] sm:$0xff]   ;;  %v6472_v37 = vld [vmem:[%s7732_s1 + $0x50] sm:$0xff]   ;;  %v6474_v38 = vpack.c.bf16 %v342_v35, %v342_v35  ;;  %v4232_v41 = vld [vmem:[%s6331_s23 + $0x9] sm:$0x3f]  ;;  %vm2204_vm4 = vcmask 979968   ;;  %vm2304_vm5 = vcmask 982016  }
  0x1f   : > { %4966 = vmatmul.mubr.msk.bf16.vlgmr.msra.gmra.mrb[0].mxu0 %vm370_vm2, %v6345_v12  ;;  %5006 = vmatmul.mubr.msk.bf16.vlgmr.msra.gmra.mrb[0].mxu1 %vm370_vm2, %v6345_v12  ;;  %v331_v39 = vld [vmem:[%s6331_s23] sm:$0x3f]  ;;  %v6556_v42 = vpack.c.bf16 %v4232_v41, %v4232_v41  ;;  %v4233_v43 = vld [vmem:[%s6331_s23 + $0x11] sm:$0x3f]  ;;  %v4234_v45 = vld [vmem:[%s6331_s23 + $0x19] sm:$0x3f] }
  0x20   : > { %4970 = vmatpush3.bf16.msra.mxu0 %v6326_v7  ;;  %5010 = vmatpush3.bf16.msra.mxu1 %v6336_v8  ;;  %v332_v40 = vpack.c.bf16 %v331_v39, %v331_v39  ;;  %v347_v44 = vpack.c.bf16 %v4233_v43, %v4233_v43  ;;  %v349_v46 = vpack.c.bf16 %v4234_v45, %v4234_v45  ;;  %v6733_v47 = vld [vmem:[%s7734_s3 + $0x78] sm:$0xff]   ;;  %v6743_v48 = vld [vmem:[%s7734_s3 + $0x80] sm:$0xff]   ;;  %v6754_v49 = vld [vmem:[%s7734_s3 + $0x88] sm:$0xff]   ;;  %vm3711_vm6 = vcmask 650240   ;;  %s323_s23 = sand.u32 1, %s6174_s10   ;;  %s4628_s17 = sshll.u32 %s6258_s13, 4 }
  0x21   : > { %4971 = vmatprep.subr.bf16.mxu0 %v6184_v1  ;;  %5011 = vmatprep.subr.bf16.mxu1 %v6184_v1  ;;  %v6761_v50 = vld [vmem:[%s7734_s3 + $0x90] sm:$0xff]   ;;  %v6768_v51 = vld [vmem:[%s7734_s3 + $0x98] sm:$0xff]   ;;  %v6775_v52 = vld [vmem:[%s7734_s3 + $0xa0] sm:$0xff]   ;;  %vm3756_vm7 = vcmask 654336   ;;  %vm4097_vm8 = vcmask 1040384   ;;  %vm4093_vm9 = vcmask 408576   ;;  %s7688_s26 = scalar_lea.hbm %s7740_s9, %s4628_s17 }
  0x22   : > { %4973 = vmatprep.mubr.msk.bf16.mxu0 %vm6185_vm1, %v6184_v1  ;;  %5013 = vmatprep.mubr.msk.bf16.mxu1 %vm6185_vm1, %v6184_v1  ;;  %v6782_v53 = vld [vmem:[%s7734_s3 + $0xa8] sm:$0xff]   ;;  %v6019_v54 = vld [vmem:[%s7734_s3 + $0xb0] ss:$0 sps:$4 sm:$0xff]   ;;  %v6798_v56 = vld [vmem:[%s7734_s3 + $0x3c] sm:$0xff]   ;;  %vm4141_vm10 = vcmask 73728   ;;  %s324_s21 = scalar_lea.vmem [#allocation5], %s323_s23 }
  0x23   : > { %v6791_v55 = vsel %vm2308_vm3, %v6019_v54, 0  ;;  %v6804_v57 = vld [vmem:[%s7734_s3 + $0x44] sm:$0xff]   ;;  %v6811_v58 = vld [vmem:[%s7734_s3 + $0x4c] sm:$0xff]   ;;  %v6818_v59 = vld [vmem:[%s7734_s3 + $0x54] sm:$0xff]   ;;  %s4168_s22 = sshll.u32 %s324_s21, 4  ;;  %s4156_s27 = scalar_lea.sflag [#allocation6], %s323_s23  ;;  %s7690_s22 = int_to_ptr.vmem [resolvable:$true] %s4168_s22 }
  0x24   : > { %4972 = vmatpush3.bf16.msra.mxu0 %v6356_v13  ;;  %5012 = vmatpush3.bf16.msra.mxu1 %v6359_v14  ;;  %v6034_v9 = vld [vmem:[%s7734_s3 + $0x74] ss:$0 sps:$4 sm:$0xff]   ;;  %v4331_v16 = vld [vmem:[%s7733_s2] ss:$0 sm:$0xff]  ;;  %s6120_s28 = scalar_lea.vmem %s7690_s22, 16  ;;  %s6186_s13 = smov [#allocation5]  }
  0x25   : > { %4977 = vmatprep.subr.bf16.mxu0 %v6184_v1  ;;  %5017 = vmatprep.subr.bf16.mxu1 %v6184_v1  ;;  %v6848_v10 = vsel %vm2308_vm3, %v6034_v9, 0  ;;  %v6899_v31 = vld [vmem:[%s7734_s3 + $0xdc] sm:$0xff]   ;;  %p6121_p11 = scmp.ne.s32.totalorder %s7690_s22, %s6120_s28  ;;  %s6124_s29 = sshll.u32 %s6186_s13, 4  ;;  %s6125_s29 = int_to_ptr.vmem [resolvable:$false] %s6124_s29 }
  0x26   : > { %s6126_s14 = scalar_lea.vmem %s6125_s29, 32  ;;  %p6127_p0 = scmp.lt.s32.totalorder %s7690_s22, %s6125_s29 }
  0x27   : > { %p6122_p12 = pnand %p6121_p11, %p6275_p5  ;;  %p6128_p1 = scmp.lt.s32.totalorder %s6126_s14, %s6120_s28 }
  0x29   : > { %p6123_p13 = pneg %p6122_p12  ;;  %p6129_p2 = por %p6128_p1, %p6127_p0 }
  0x2b   : > { %4974 = vmatmul.mubr.msk.bf16.vlgmr.msra.gmra.mrb[0].mxu0 %vm370_vm2, %v6382_v20  ;;  %5014 = vmatmul.mubr.msk.bf16.vlgmr.msra.gmra.mrb[0].mxu1 %vm370_vm2, %v6382_v20  ;;  %p6130_p3 = pnand %p6129_p2, %p6123_p13 }
  0x2c   : > { %4978 = vmatpush3.bf16.msra.mxu0 %v6387_v21  ;;  %5018 = vmatpush3.bf16.msra.mxu1 %v6392_v22 }
  0x2d   : > { %4979 = vmatprep.subr.bf16.mxu0 %v6184_v1  ;;  %5019 = vmatprep.subr.bf16.mxu1 %v6184_v1 }
  0x2e   : > { %4981 = vmatprep.mubr.msk.bf16.mxu0 %vm6185_vm1, %v6184_v1  ;;  %5021 = vmatprep.mubr.msk.bf16.mxu1 %vm6185_vm1, %v6184_v1 }
  0x30   : > { %4980 = vmatpush3.bf16.msra.mxu0 %v6401_v25  ;;  %5020 = vmatpush3.bf16.msra.mxu1 %v6404_v26 }
  0x31   : > { %4985 = vmatprep.subr.bf16.mxu0 %v6184_v1  ;;  %5025 = vmatprep.subr.bf16.mxu1 %v6184_v1 }
  0x37   : > { %4982 = vmatmul.mubr.msk.bf16.vlgmr.msra.gmra.mrb[0].mxu0 %vm370_vm2, %v6445_v34  ;;  %5022 = vmatmul.mubr.msk.bf16.vlgmr.msra.gmra.mrb[0].mxu1 %vm370_vm2, %v6445_v34 }
  0x38   : > { %4986 = vmatpush3.bf16.msra.mxu0 %v6438_v32  ;;  %5026 = vmatpush3.bf16.msra.mxu1 %v6443_v33 }
  0x39   : > { %4987 = vmatprep.subr.bf16.mxu0 %v6184_v1  ;;  %5027 = vmatprep.subr.bf16.mxu1 %v6184_v1 }
  0x3a   : > { %4989 = vmatprep.mubr.msk.bf16.mxu0 %vm6185_vm1, %v6184_v1  ;;  %5029 = vmatprep.mubr.msk.bf16.mxu1 %vm6185_vm1, %v6184_v1 }
  0x3c   : > { %4988 = vmatpush3.bf16.msra.mxu0 %v6407_v27  ;;  %5028 = vmatpush3.bf16.msra.mxu1 %v6410_v28 }
  0x3d   : > { %4993 = vmatprep.subr.bf16.mxu0 %v6184_v1  ;;  %5033 = vmatprep.subr.bf16.mxu1 %v6184_v1 }
  0x43   : > { %4990 = vmatmul.mubr.msk.bf16.vlgmr.msra.gmra.mrb[0].mxu0 %vm370_vm2, %v6474_v38  ;;  %5030 = vmatmul.mubr.msk.bf16.vlgmr.msra.gmra.mrb[0].mxu1 %vm370_vm2, %v6474_v38 }
  0x44   : > { %4994 = vmatpush3.bf16.msra.mxu0 %v6467_v36  ;;  %5034 = vmatpush3.bf16.msra.mxu1 %v6472_v37 }
  0x45   : > { %4995 = vmatprep.subr.bf16.mxu0 %v6184_v1  ;;  %5035 = vmatprep.subr.bf16.mxu1 %v6184_v1 }
  0x46   : > { %4997 = vmatprep.mubr.msk.bf16.mxu0 %vm6185_vm1, %v6184_v1  ;;  %5037 = vmatprep.mubr.msk.bf16.mxu1 %vm6185_vm1, %v6184_v1 }
  0x48   : > { %4996 = vmatpush3.bf16.msra.mxu0 %v6419_v29  ;;  %5036 = vmatpush3.bf16.msra.mxu1 %v6422_v30 }
  0x49   : > { %5041 = vmatprep.subr.bf16.mxu0 %v6184_v1  ;;  %5081 = vmatprep.subr.bf16.mxu1 %v6184_v1 }
  0x4f   : > { %4998 = vmatmul.mubr.msk.bf16.vlgmr.msra.gmra.mrb[0].mxu0 %vm370_vm2, %v332_v40  ;;  %5038 = vmatmul.mubr.msk.bf16.vlgmr.msra.gmra.mrb[0].mxu1 %vm370_vm2, %v332_v40 }
  0x50   : > { %5042 = vmatpush3.bf16.msra.mxu0 %v6288_v0  ;;  %5082 = vmatpush3.bf16.msra.mxu1 %v6295_v2 }
  0x51   : > { %5043 = vmatprep.subr.bf16.mxu0 %v6184_v1  ;;  %5083 = vmatprep.subr.bf16.mxu1 %v6184_v1 }
  0x52   : > { %5045 = vmatprep.mubr.msk.bf16.mxu0 %vm6185_vm1, %v6184_v1  ;;  %5085 = vmatprep.mubr.msk.bf16.mxu1 %vm6185_vm1, %v6184_v1 }
  0x54   : > { %5044 = vmatpush3.bf16.msra.mxu0 %v6308_v5  ;;  %5084 = vmatpush3.bf16.msra.mxu1 %v6312_v6 }
  0x55   : > { %5049 = vmatprep.subr.bf16.mxu0 %v6184_v1  ;;  %5089 = vmatprep.subr.bf16.mxu1 %v6184_v1 }
  0x57   : > { %5046 = vmatmul.mubr.msk.bf16.vlgmr.msra.gmra.mrb[4].mxu0 %vm370_vm2, %v6382_v20  ;;  %5086 = vmatmul.mubr.msk.bf16.vlgmr.msra.gmra.mrb[4].mxu1 %vm370_vm2, %v6382_v20 }
  0x58   : > { %5050 = vmatpush3.bf16.msra.mxu0 %v6326_v7  ;;  %5090 = vmatpush3.bf16.msra.mxu1 %v6336_v8 }
  0x59   : > { %5051 = vmatprep.subr.bf16.mxu0 %v6184_v1  ;;  %5091 = vmatprep.subr.bf16.mxu1 %v6184_v1 }
  0x5a   : > { %5053 = vmatprep.mubr.msk.bf16.mxu0 %vm6185_vm1, %v6184_v1  ;;  %5093 = vmatprep.mubr.msk.bf16.mxu1 %vm6185_vm1, %v6184_v1 }
  0x5c   : > { %5052 = vmatpush3.bf16.msra.mxu0 %v6356_v13  ;;  %5092 = vmatpush3.bf16.msra.mxu1 %v6359_v14 }
  0x5d   : > { %5057 = vmatprep.subr.bf16.mxu0 %v6184_v1  ;;  %5097 = vmatprep.subr.bf16.mxu1 %v6184_v1 }
  0x63   : > { %5054 = vmatmul.mubr.msk.bf16.vlgmr.msra.gmra.mrb[4].mxu0 %vm370_vm2, %v6445_v34  ;;  %5094 = vmatmul.mubr.msk.bf16.vlgmr.msra.gmra.mrb[4].mxu1 %vm370_vm2, %v6445_v34 }
  0x64   : > { %5058 = vmatpush3.bf16.msra.mxu0 %v6387_v21  ;;  %5098 = vmatpush3.bf16.msra.mxu1 %v6392_v22 }
  0x65   : > { %5059 = vmatprep.subr.bf16.mxu0 %v6184_v1  ;;  %5099 = vmatprep.subr.bf16.mxu1 %v6184_v1 }
  0x66   : > { %5061 = vmatprep.mubr.msk.bf16.mxu0 %vm6185_vm1, %v6184_v1  ;;  %5101 = vmatprep.mubr.msk.bf16.mxu1 %vm6185_vm1, %v6184_v1 }
  0x68   : > { %5060 = vmatpush3.bf16.msra.mxu0 %v6401_v25  ;;  %5100 = vmatpush3.bf16.msra.mxu1 %v6404_v26 }
  0x69   : > { %5065 = vmatprep.subr.bf16.mxu0 %v6184_v1  ;;  %5105 = vmatprep.subr.bf16.mxu1 %v6184_v1 }
  0x6f   : > { %5062 = vmatmul.mubr.msk.bf16.vlgmr.msra.gmra.mrb[4].mxu0 %vm370_vm2, %v6474_v38  ;;  %5102 = vmatmul.mubr.msk.bf16.vlgmr.msra.gmra.mrb[4].mxu1 %vm370_vm2, %v6474_v38 }
  0x70   : > { %5066 = vmatpush3.bf16.msra.mxu0 %v6438_v32  ;;  %5106 = vmatpush3.bf16.msra.mxu1 %v6443_v33 }
  0x71   : > { %5067 = vmatprep.subr.bf16.mxu0 %v6184_v1  ;;  %5107 = vmatprep.subr.bf16.mxu1 %v6184_v1 }
  0x72   : > { %5069 = vmatprep.mubr.msk.bf16.mxu0 %vm6185_vm1, %v6184_v1  ;;  %5109 = vmatprep.mubr.msk.bf16.mxu1 %vm6185_vm1, %v6184_v1 }
  0x74   : > { %5068 = vmatpush3.bf16.msra.mxu0 %v6407_v27  ;;  %5108 = vmatpush3.bf16.msra.mxu1 %v6410_v28 }
  0x75   : > { %5073 = vmatprep.subr.bf16.mxu0 %v6184_v1  ;;  %5113 = vmatprep.subr.bf16.mxu1 %v6184_v1 }
  0x7b   : > { %5070 = vmatmul.mubr.msk.bf16.vlgmr.msra.gmra.mrb[4].mxu0 %vm370_vm2, %v6556_v42  ;;  %5110 = vmatmul.mubr.msk.bf16.vlgmr.msra.gmra.mrb[4].mxu1 %vm370_vm2, %v6556_v42 }
  0x7c   : > { %5074 = vmatpush3.bf16.msra.mxu0 %v6467_v36  ;;  %5114 = vmatpush3.bf16.msra.mxu1 %v6472_v37 }
  0x7d   : > { %5075 = vmatprep.subr.bf16.mxu0 %v6184_v1  ;;  %5115 = vmatprep.subr.bf16.mxu1 %v6184_v1 }
  0x7e   : > { %5077 = vmatprep.mubr.msk.bf16.mxu0 %vm6185_vm1, %v6184_v1  ;;  %5117 = vmatprep.mubr.msk.bf16.mxu1 %vm6185_vm1, %v6184_v1 }
  0x80   : > { %5076 = vmatpush3.bf16.msra.mxu0 %v6419_v29  ;;  %5116 = vmatpush3.bf16.msra.mxu1 %v6422_v30 }
  0x81   : > { %5121 = vmatprep.subr.bf16.mxu0 %v6184_v1  ;;  %5161 = vmatprep.subr.bf16.mxu1 %v6184_v1 }
  0x87   : > { %5078 = vmatmul.mubr.msk.bf16.vlgmr.msra.gmra.mrb[4].mxu0 %vm370_vm2, %v6345_v12  ;;  %5118 = vmatmul.mubr.msk.bf16.vlgmr.msra.gmra.mrb[4].mxu1 %vm370_vm2, %v6345_v12 }
  0x88   : > { %5122 = vmatpush3.bf16.msra.mxu0 %v6288_v0  ;;  %5162 = vmatpush3.bf16.msra.mxu1 %v6295_v2 }
  0x89   : > { %5123 = vmatprep.subr.bf16.mxu0 %v6184_v1  ;;  %5163 = vmatprep.subr.bf16.mxu1 %v6184_v1 }
  0x8a   : > { %5125 = vmatprep.mubr.msk.bf16.mxu0 %vm6185_vm1, %v6184_v1  ;;  %5165 = vmatprep.mubr.msk.bf16.mxu1 %vm6185_vm1, %v6184_v1 }
  0x8c   : > { %5124 = vmatpush3.bf16.msra.mxu0 %v6308_v5  ;;  %5164 = vmatpush3.bf16.msra.mxu1 %v6312_v6 }
  0x8d   : > { %5129 = vmatprep.subr.bf16.mxu0 %v6184_v1  ;;  %5169 = vmatprep.subr.bf16.mxu1 %v6184_v1 }
  0x8f   : > { %5126 = vmatmul.mubr.msk.bf16.vlgmr.msra.gmra.mrb[8].mxu0 %vm370_vm2, %v6445_v34  ;;  %5166 = vmatmul.mubr.msk.bf16.vlgmr.msra.gmra.mrb[8].mxu1 %vm370_vm2, %v6445_v34 }
  0x90   : > { %5130 = vmatpush3.bf16.msra.mxu0 %v6326_v7  ;;  %5170 = vmatpush3.bf16.msra.mxu1 %v6336_v8 }
  0x91   : > { %5131 = vmatprep.subr.bf16.mxu0 %v6184_v1  ;;  %5171 = vmatprep.subr.bf16.mxu1 %v6184_v1 }
  0x92   : > { %5133 = vmatprep.mubr.msk.bf16.mxu0 %vm6185_vm1, %v6184_v1  ;;  %5173 = vmatprep.mubr.msk.bf16.mxu1 %vm6185_vm1, %v6184_v1 }
  0x94   : > { %5132 = vmatpush3.bf16.msra.mxu0 %v6356_v13  ;;  %5172 = vmatpush3.bf16.msra.mxu1 %v6359_v14 }
  0x95   : > { %5137 = vmatprep.subr.bf16.mxu0 %v6184_v1  ;;  %5177 = vmatprep.subr.bf16.mxu1 %v6184_v1 }
  0x9b   : > { %5134 = vmatmul.mubr.msk.bf16.vlgmr.msra.gmra.mrb[8].mxu0 %vm370_vm2, %v6474_v38  ;;  %5174 = vmatmul.mubr.msk.bf16.vlgmr.msra.gmra.mrb[8].mxu1 %vm370_vm2, %v6474_v38 }
  0x9c   : > { %5138 = vmatpush3.bf16.msra.mxu0 %v6387_v21  ;;  %5178 = vmatpush3.bf16.msra.mxu1 %v6392_v22 }
  0x9d   : > { %5139 = vmatprep.subr.bf16.mxu0 %v6184_v1  ;;  %5179 = vmatprep.subr.bf16.mxu1 %v6184_v1 }
  0x9e   : > { %5141 = vmatprep.mubr.msk.bf16.mxu0 %vm6185_vm1, %v6184_v1  ;;  %5181 = vmatprep.mubr.msk.bf16.mxu1 %vm6185_vm1, %v6184_v1 }
  0xa0   : > { %5140 = vmatpush3.bf16.msra.mxu0 %v6401_v25  ;;  %5180 = vmatpush3.bf16.msra.mxu1 %v6404_v26 }
  0xa1   : > { %5145 = vmatprep.subr.bf16.mxu0 %v6184_v1  ;;  %5185 = vmatprep.subr.bf16.mxu1 %v6184_v1 }
  0xa7   : > { %5142 = vmatmul.mubr.msk.bf16.vlgmr.msra.gmra.mrb[8].mxu0 %vm370_vm2, %v6556_v42  ;;  %5182 = vmatmul.mubr.msk.bf16.vlgmr.msra.gmra.mrb[8].mxu1 %vm370_vm2, %v6556_v42 }
  0xa8   : > { %5146 = vmatpush3.bf16.msra.mxu0 %v6438_v32  ;;  %5186 = vmatpush3.bf16.msra.mxu1 %v6443_v33 }
  0xa9   : > { %5147 = vmatprep.subr.bf16.mxu0 %v6184_v1  ;;  %5187 = vmatprep.subr.bf16.mxu1 %v6184_v1 }
  0xaa   : > { %5149 = vmatprep.mubr.msk.bf16.mxu0 %vm6185_vm1, %v6184_v1  ;;  %5189 = vmatprep.mubr.msk.bf16.mxu1 %vm6185_vm1, %v6184_v1 }
  0xac   : > { %5148 = vmatpush3.bf16.msra.mxu0 %v6407_v27  ;;  %5188 = vmatpush3.bf16.msra.mxu1 %v6410_v28 }
  0xad   : > { %5153 = vmatprep.subr.bf16.mxu0 %v6184_v1  ;;  %5193 = vmatprep.subr.bf16.mxu1 %v6184_v1 }
  0xb3   : > { %5150 = vmatmul.mubr.msk.bf16.vlgmr.msra.gmra.mrb[8].mxu0 %vm370_vm2, %v347_v44  ;;  %5190 = vmatmul.mubr.msk.bf16.vlgmr.msra.gmra.mrb[8].mxu1 %vm370_vm2, %v347_v44 }
  0xb4   : > { %5154 = vmatpush3.bf16.msra.mxu0 %v6467_v36  ;;  %5194 = vmatpush3.bf16.msra.mxu1 %v6472_v37 }
  0xb5   : > { %5155 = vmatprep.subr.bf16.mxu0 %v6184_v1  ;;  %5195 = vmatprep.subr.bf16.mxu1 %v6184_v1 }
  0xb6   : > { %5157 = vmatprep.mubr.msk.bf16.mxu0 %vm6185_vm1, %v6184_v1  ;;  %5197 = vmatprep.mubr.msk.bf16.mxu1 %vm6185_vm1, %v6184_v1 }
  0xb8   : > { %5156 = vmatpush3.bf16.msra.mxu0 %v6419_v29  ;;  %5196 = vmatpush3.bf16.msra.mxu1 %v6422_v30 }
  0xb9   : > { %5201 = vmatprep.subr.bf16.mxu0 %v6184_v1  ;;  %5241 = vmatprep.subr.bf16.mxu1 %v6184_v1 }
  0xbf   : > { %5158 = vmatmul.mubr.msk.bf16.vlgmr.msra.gmra.mrb[8].mxu0 %vm370_vm2, %v6382_v20  ;;  %5198 = vmatmul.mubr.msk.bf16.vlgmr.msra.gmra.mrb[8].mxu1 %vm370_vm2, %v6382_v20 }
  0xc0   : > { %5202 = vmatpush3.bf16.msra.mxu0 %v6288_v0  ;;  %5242 = vmatpush3.bf16.msra.mxu1 %v6295_v2 }
  0xc1   : > { %5203 = vmatprep.subr.bf16.mxu0 %v6184_v1  ;;  %5243 = vmatprep.subr.bf16.mxu1 %v6184_v1 }
  0xc2   : > { %5205 = vmatprep.mubr.msk.bf16.mxu0 %vm6185_vm1, %v6184_v1  ;;  %5245 = vmatprep.mubr.msk.bf16.mxu1 %vm6185_vm1, %v6184_v1 }
  0xc4   : > { %5204 = vmatpush3.bf16.msra.mxu0 %v6308_v5  ;;  %5244 = vmatpush3.bf16.msra.mxu1 %v6312_v6  ;;  %v6826_v6 = vld [vmem:[%s7734_s3 + $0x5c] sm:$0xff]  }
  0xc5   : > { %5209 = vmatprep.subr.bf16.mxu0 %v6184_v1  ;;  %5249 = vmatprep.subr.bf16.mxu1 %v6184_v1 }
  0xc7   : > { %5206 = vmatmul.mubr.msk.bf16.vlgmr.msra.gmra.mrb[12].mxu0 %vm370_vm2, %v6474_v38  ;;  %5246 = vmatmul.mubr.msk.bf16.vlgmr.msra.gmra.mrb[12].mxu1 %vm370_vm2, %v6474_v38 }
  0xc8   : > { %5210 = vmatpush3.bf16.msra.mxu0 %v6326_v7  ;;  %5250 = vmatpush3.bf16.msra.mxu1 %v6336_v8  ;;  %v6833_v7 = vld [vmem:[%s7734_s3 + $0x64] sm:$0xff]   ;;  %v6840_v8 = vld [vmem:[%s7734_s3 + $0x6c] sm:$0xff]  }
  0xc9   : > { %5211 = vmatprep.subr.bf16.mxu0 %v6184_v1  ;;  %5251 = vmatprep.subr.bf16.mxu1 %v6184_v1 }
  0xca   : > { %5213 = vmatprep.mubr.msk.bf16.mxu0 %vm6185_vm1, %v6184_v1  ;;  %5253 = vmatprep.mubr.msk.bf16.mxu1 %vm6185_vm1, %v6184_v1 }
  0xcc   : > { %5212 = vmatpush3.bf16.msra.mxu0 %v6356_v13  ;;  %5252 = vmatpush3.bf16.msra.mxu1 %v6359_v14 }
  0xcd   : > { %5217 = vmatprep.subr.bf16.mxu0 %v6184_v1  ;;  %5257 = vmatprep.subr.bf16.mxu1 %v6184_v1 }
  0xd3   : > { %5214 = vmatmul.mubr.msk.bf16.vlgmr.msra.gmra.mrb[12].mxu0 %vm370_vm2, %v6556_v42  ;;  %5254 = vmatmul.mubr.msk.bf16.vlgmr.msra.gmra.mrb[12].mxu1 %vm370_vm2, %v6556_v42 }
  0xd4   : > { %5218 = vmatpush3.bf16.msra.mxu0 %v6387_v21  ;;  %5258 = vmatpush3.bf16.msra.mxu1 %v6392_v22 }
  0xd5   : > { %5219 = vmatprep.subr.bf16.mxu0 %v6184_v1  ;;  %5259 = vmatprep.subr.bf16.mxu1 %v6184_v1 }
  0xd6   : > { %5221 = vmatprep.mubr.msk.bf16.mxu0 %vm6185_vm1, %v6184_v1  ;;  %5261 = vmatprep.mubr.msk.bf16.mxu1 %vm6185_vm1, %v6184_v1 }
  0xd8   : > { %5220 = vmatpush3.bf16.msra.mxu0 %v6401_v25  ;;  %5260 = vmatpush3.bf16.msra.mxu1 %v6404_v26  ;;  %v6859_v25 = vld [vmem:[%s7734_s3 + $0xb4] sm:$0xff]  }
  0xd9   : > { %5225 = vmatprep.subr.bf16.mxu0 %v6184_v1  ;;  %5265 = vmatprep.subr.bf16.mxu1 %v6184_v1 }
  0xdf   : > { %5222 = vmatmul.mubr.msk.bf16.vlgmr.msra.gmra.mrb[12].mxu0 %vm370_vm2, %v347_v44  ;;  %5262 = vmatmul.mubr.msk.bf16.vlgmr.msra.gmra.mrb[12].mxu1 %vm370_vm2, %v347_v44 }
  0xe0   : > { %5226 = vmatpush3.bf16.msra.mxu0 %v6438_v32  ;;  %5266 = vmatpush3.bf16.msra.mxu1 %v6443_v33  ;;  %v6906_v32 = vld [vmem:[%s7734_s3 + $0xe4] sm:$0xff]   ;;  %v6035_v33 = vld [vmem:[%s7734_s3 + $0xec] ss:$0 sps:$4 sm:$0xff]  }
  0xe1   : > { %5227 = vmatprep.subr.bf16.mxu0 %v6184_v1  ;;  %5267 = vmatprep.subr.bf16.mxu1 %v6184_v1 }
  0xe2   : > { %5229 = vmatprep.mubr.msk.bf16.mxu0 %vm6185_vm1, %v6184_v1  ;;  %5269 = vmatprep.mubr.msk.bf16.mxu1 %vm6185_vm1, %v6184_v1 }
  0xe4   : > { %5228 = vmatpush3.bf16.msra.mxu0 %v6407_v27  ;;  %5268 = vmatpush3.bf16.msra.mxu1 %v6410_v28  ;;  %v6869_v27 = vld [vmem:[%s7734_s3 + $0xbc] sm:$0xff]   ;;  %v6878_v28 = vld [vmem:[%s7734_s3 + $0xc4] sm:$0xff]  }
  0xe5   : > { %5233 = vmatprep.subr.bf16.mxu0 %v6184_v1  ;;  %5273 = vmatprep.subr.bf16.mxu1 %v6184_v1 }
  0xeb   : > { %5230 = vmatmul.mubr.msk.bf16.vlgmr.msra.gmra.mrb[12].mxu0 %vm370_vm2, %v349_v46  ;;  %5270 = vmatmul.mubr.msk.bf16.vlgmr.msra.gmra.mrb[12].mxu1 %vm370_vm2, %v349_v46 }
  0xec   : > { %5234 = vmatpush3.bf16.msra.mxu0 %v6467_v36  ;;  %5274 = vmatpush3.bf16.msra.mxu1 %v6472_v37 }
  0xed   : > { %5235 = vmatprep.subr.bf16.mxu0 %v6184_v1  ;;  %5275 = vmatprep.subr.bf16.mxu1 %v6184_v1 }
  0xee   : > { %5237 = vmatprep.mubr.msk.bf16.mxu0 %vm6185_vm1, %v6184_v1  ;;  %5277 = vmatprep.mubr.msk.bf16.mxu1 %vm6185_vm1, %v6184_v1 }
  0xf0   : > { %5236 = vmatpush3.bf16.msra.mxu0 %v6419_v29  ;;  %5276 = vmatpush3.bf16.msra.mxu1 %v6422_v30  ;;  %v6885_v29 = vld [vmem:[%s7734_s3 + $0xcc] sm:$0xff]   ;;  %v6892_v30 = vld [vmem:[%s7734_s3 + $0xd4] sm:$0xff]  }
  0xf1   : > { %5301 = vmatprep.subr.bf16.mxu0 %v6184_v1  ;;  %5281 = vmatprep.subr.bf16.mxu1 %v6184_v1 }
  0xf7   : > { %5238 = vmatmul.mubr.msk.bf16.vlgmr.msra.gmra.mrb[12].mxu0 %vm370_vm2, %v6445_v34  ;;  %5278 = vmatmul.mubr.msk.bf16.vlgmr.msra.gmra.mrb[12].mxu1 %vm370_vm2, %v6445_v34  ;;  %v6915_v34 = vsel %vm2308_vm3, %v6035_v33, 0  ;;  %v7017_v33 = vld [vmem:[%s7734_s3 + $0x120] sm:$0xff]  }
  0xf8   : > { %5302 = vmatpush3.bf16.msra.mxu0 %v6733_v47  ;;  %5317 = vmatprep.mubr.msk.bf16.mxu0 %vm6185_vm1, %v6184_v1 }
  0xf9   : > { %5303 = vmatprep.subr.bf16.mxu0 %v6184_v1  ;;  %5297 = vmatprep.mubr.msk.bf16.mxu1 %vm6185_vm1, %v6184_v1 }
  0xfa   : > { %5282 = vmatpush3.bf16.msra.mxu1 %v6798_v56 }
  0xfb   : > { %5283 = vmatprep.subr.bf16.mxu1 %v6184_v1 }
  0xfc   : > { %5304 = vmatpush3.bf16.msra.mxu0 %v6743_v48 }
  0xfd   : > { %5305 = vmatprep.subr.bf16.mxu0 %v6184_v1 }
  0xfe   : > { %5284 = vmatpush3.bf16.msra.mxu1 %v6804_v57 }
  0xff   : > { %5285 = vmatprep.subr.bf16.mxu1 %v6184_v1 }
 0x100   : > { %5306 = vmatpush3.bf16.msra.mxu0 %v6754_v49 }
 0x101   : > { %5307 = vmatprep.subr.bf16.mxu0 %v6184_v1 }
 0x102   : > { %5286 = vmatpush3.bf16.msra.mxu1 %v6811_v58 }
 0x103   : > { %5287 = vmatprep.subr.bf16.mxu1 %v6184_v1 }
 0x104   : > { %5308 = vmatpush3.bf16.msra.mxu0 %v6761_v50 }
 0x105   : > { %5309 = vmatprep.subr.bf16.mxu0 %v6184_v1 }
 0x106   : > { %5288 = vmatpush3.bf16.msra.mxu1 %v6818_v59 }
 0x107   : > { %5289 = vmatprep.subr.bf16.mxu1 %v6184_v1 }
 0x108   : > { %5310 = vmatpush3.bf16.msra.mxu0 %v6768_v51 }
 0x109   : > { %5311 = vmatprep.subr.bf16.mxu0 %v6184_v1 }
 0x10a   : > { %5290 = vmatpush3.bf16.msra.mxu1 %v6826_v6 }
 0x10b   : > { %5291 = vmatprep.subr.bf16.mxu1 %v6184_v1 }
 0x10c   : > { %5312 = vmatpush3.bf16.msra.mxu0 %v6775_v52 }
 0x10d   : > { %5313 = vmatprep.subr.bf16.mxu0 %v6184_v1 }
 0x10e   : > { %5292 = vmatpush3.bf16.msra.mxu1 %v6833_v7 }
 0x10f   : > { %5293 = vmatprep.subr.bf16.mxu1 %v6184_v1 }
 0x110   : > { %5314 = vmatpush3.bf16.msra.mxu0 %v6782_v53 }
 0x111   : > { %5315 = vmatprep.subr.bf16.mxu0 %v6184_v1 }
 0x112   : > { %5294 = vmatpush3.bf16.msra.mxu1 %v6840_v8 }
 0x113   : > { %5295 = vmatprep.subr.bf16.mxu1 %v6184_v1 }
 0x114   : > { %5316 = vmatpush3.bf16.msra.mxu0 %v6791_v55 }
 0x115   : > { %5321 = vmatprep.subr.bf16.mxu0 %v6184_v1 }
 0x116   : > { %5296 = vmatpush3.bf16.msra.mxu1 %v6848_v10 }
 0x117   : > { %5381 = vmatprep.subr.bf16.mxu1 %v6184_v1 }
 0x122   : > { %v655_v60 = vpop.f32.mrb[0].mxu0  ;;  %v953_v61 = vpop.f32.mrb[0].mxu1 }
 0x123   : > { %v962_v62 = vmax.f32 %v655_v60, %v953_v61  ;;  %v4999_v63 = vpop.f32.mrb[1].mxu0  ;;  %v5039_v0 = vpop.f32.mrb[1].mxu1 }
 0x124   : > { %v658_v2 = vpop.f32.mrb[2].mxu0  ;;  %v956_v3 = vpop.f32.mrb[2].mxu1 }
 0x125   : > { %v5000_v4 = vpop.f32.mrb[3].mxu0  ;;  %v5040_v5 = vpop.f32.mrb[3].mxu1 }
 0x126   : > { %v6923_v5 = vld [vmem:[%s7734_s3 + $0xf0] sm:$0xff]  }
 0x15a   : > { %v1160_v11 = vpop.f32.mrb[4].mxu0  ;;  %v1363_v12 = vpop.f32.mrb[4].mxu1 }
 0x15b   : > { %v1372_v13 = vmax.f32 %v1160_v11, %v1363_v12  ;;  %v5079_v14 = vpop.f32.mrb[5].mxu0  ;;  %v5119_v15 = vpop.f32.mrb[5].mxu1  ;;  %v6928_v12 = vld [vmem:[%s7734_s3 + $0x168] sm:$0xff]  }
 0x15c   : > { %v1163_v17 = vpop.f32.mrb[6].mxu0  ;;  %v1366_v18 = vpop.f32.mrb[6].mxu1  ;;  %v6943_v15 = vld [vmem:[%s7734_s3 + $0xf8] sm:$0xff]  }
 0x15d   : > { %v1373_v19 = vmax.f32 %v962_v62, %v1372_v13  ;;  %v5080_v20 = vpop.f32.mrb[7].mxu0  ;;  %v5120_v21 = vpop.f32.mrb[7].mxu1  ;;  %v6961_v17 = vld [vmem:[%s7734_s3 + $0x100] sm:$0xff]   ;;  %v6966_v18 = vld [vmem:[%s7734_s3 + $0x178] sm:$0xff]  }
 0x15e   : > { %v6980_v20 = vld [vmem:[%s7734_s3 + $0x180] sm:$0xff]   ;;  %v6989_v21 = vld [vmem:[%s7734_s3 + $0x110] sm:$0xff]  }
 0x15f   : > { %v2202_v22 = vadd.f32 %v4331_v16, %v1373_v19  ;;  %v6975_v19 = vld [vmem:[%s7734_s3 + $0x108] sm:$0xff]  }
 0x161   : > { %v2203_v23 = vmax.f32 %v2202_v22, 0.0  ;;  %v6994_v22 = vld [vmem:[%s7734_s3 + $0x188] sm:$0xff]  }
 0x163   : > { %2205 = vst.msk [vmem:[#allocation2] sm:$0x3f] %vm2204_vm4, %v2203_v23  ;;  %v7003_v23 = vld [vmem:[%s7734_s3 + $0x118] sm:$0xff]  }
 0x16a   : > { %v2220_v24 = vld [vmem:[#allocation2 + $0x1] sm:$0xf] }
 0x16b   : > { %v6861_v26 = vpack.c.bf16 %v2220_v24, %v2220_v24  ;;  %v7008_v24 = vld [vmem:[%s7734_s3 + $0x190] sm:$0xff]  }
 0x16d   : > { %5318 = vmatmul.mubr.msk.bf16.vlgmr.msra.gmra.mrb[16].mxu0 %vm2304_vm5, %v6861_v26 }
 0x16e   : > { %5322 = vmatpush3.bf16.msra.mxu0 %v6859_v25  ;;  %5337 = vmatprep.mubr.msk.bf16.mxu0 %vm6185_vm1, %v6184_v1 }
 0x16f   : > { %5323 = vmatprep.subr.bf16.mxu0 %v6184_v1 }
 0x172   : > { %5324 = vmatpush3.bf16.msra.mxu0 %v6869_v27 }
 0x173   : > { %5325 = vmatprep.subr.bf16.mxu0 %v6184_v1 }
 0x176   : > { %5326 = vmatpush3.bf16.msra.mxu0 %v6878_v28 }
 0x177   : > { %5327 = vmatprep.subr.bf16.mxu0 %v6184_v1 }
 0x17a   : > { %5328 = vmatpush3.bf16.msra.mxu0 %v6885_v29 }
 0x17b   : > { %5329 = vmatprep.subr.bf16.mxu0 %v6184_v1 }
 0x17e   : > { %5330 = vmatpush3.bf16.msra.mxu0 %v6892_v30 }
 0x17f   : > { %5331 = vmatprep.subr.bf16.mxu0 %v6184_v1 }
 0x182   : > { %5332 = vmatpush3.bf16.msra.mxu0 %v6899_v31 }
 0x183   : > { %5333 = vmatprep.subr.bf16.mxu0 %v6184_v1 }
 0x186   : > { %5334 = vmatpush3.bf16.msra.mxu0 %v6906_v32 }
 0x187   : > { %5335 = vmatprep.subr.bf16.mxu0 %v6184_v1 }
 0x18a   : > { %5336 = vmatpush3.bf16.msra.mxu0 %v6915_v34 }
 0x18b   : > { %5341 = vmatprep.subr.bf16.mxu0 %v6184_v1 }
 0x192   : > { %v1571_v35 = vpop.f32.mrb[8].mxu0  ;;  %v1774_v36 = vpop.f32.mrb[8].mxu1 }
 0x193   : > { %v1783_v37 = vmax.f32 %v1571_v35, %v1774_v36  ;;  %v5159_v38 = vpop.f32.mrb[9].mxu0  ;;  %v5199_v39 = vpop.f32.mrb[9].mxu1  ;;  %v7022_v35 = vld [vmem:[%s7734_s3 + $0x198] sm:$0xff]   ;;  %v6050_v36 = vld [vmem:[%s7734_s3 + $0x128] ss:$0 sps:$4 sm:$0xff]  }
 0x194   : > { %v1574_v40 = vpop.f32.mrb[10].mxu0  ;;  %v1777_v41 = vpop.f32.mrb[10].mxu1  ;;  %v7037_v38 = vsel %vm2308_vm3, %v6050_v36, 0 }
 0x195   : > { %v5160_v42 = vpop.f32.mrb[11].mxu0  ;;  %v5200_v43 = vpop.f32.mrb[11].mxu1  ;;  %v2224_v40 = vld [vmem:[#allocation2 + $0x2] sm:$0xf] }
 0x196   : > { %v7047_v41 = vld [vmem:[%s7734_s3] sm:$0xff]   ;;  %v7054_v43 = vpack.c.bf16 %v2224_v40, %v2224_v40 }
 0x197   : > { %v7052_v42 = vld [vmem:[%s7734_s3 + $0x1a4] sm:$0xff]   ;;  %v2216_v40 = vld [vmem:[#allocation2] sm:$0xf] }
 0x1ca   : > { %v1981_v44 = vpop.f32.mrb[12].mxu0  ;;  %v2184_v45 = vpop.f32.mrb[12].mxu1 }
 0x1cb   : > { %v2193_v46 = vmax.f32 %v1981_v44, %v2184_v45  ;;  %v5239_v54 = vpop.f32.mrb[13].mxu0  ;;  %v5279_v60 = vpop.f32.mrb[13].mxu1  ;;  %v7067_v44 = vld [vmem:[%s7734_s3 + $0x8] sm:$0xff]  }
 0x1cc   : > { %v1984_v61 = vpop.f32.mrb[14].mxu0  ;;  %v2187_v62 = vpop.f32.mrb[14].mxu1  ;;  %v7072_v45 = vld [vmem:[%s7734_s3 + $0x1ac] sm:$0xff]   ;;  %v7090_v54 = vld [vmem:[%s7734_s3 + $0x1b4] sm:$0xff]  }
 0x1cd   : > { %v2194_v63 = vmax.f32 %v1783_v37, %v2193_v46  ;;  %v5240_v0 = vpop.f32.mrb[15].mxu0  ;;  %v5280_v2 = vpop.f32.mrb[15].mxu1  ;;  %v6051_v37 = vld [vmem:[%s7734_s3 + $0x1a0] ss:$0 sps:$4 sm:$0xff]   ;;  %v7085_v46 = vld [vmem:[%s7734_s3 + $0x10] sm:$0xff]   ;;  %v7099_v60 = vld [vmem:[%s7734_s3 + $0x18] sm:$0xff]  }
 0x1ce   : > { %v7040_v39 = vsel %vm2308_vm3, %v6051_v37, 0  ;;  %v7104_v61 = vld [vmem:[%s7734_s3 + $0x1bc] sm:$0xff]   ;;  %v7127_v0 = vld [vmem:[%s7734_s3 + $0x28] sm:$0xff]  }
 0x1cf   : > { %v2213_v3 = vadd.f32 %v4331_v16, %v2194_v63  ;;  %v6948_v16 = vld [vmem:[%s7734_s3 + $0x170] sm:$0xff]   ;;  %v7113_v62 = vld [vmem:[%s7734_s3 + $0x20] sm:$0xff]  }
 0x1d0   : > { %v7118_v63 = vld [vmem:[%s7734_s3 + $0x1c4] sm:$0xff]   ;;  %v7132_v2 = vld [vmem:[%s7734_s3 + $0x1cc] sm:$0xff]  }
 0x1d1   : > { %v2214_v4 = vmax.f32 %v2213_v3, 0.0  ;;  %v7141_v3 = vld [vmem:[%s7734_s3 + $0x30] sm:$0xff]  }
 0x1d3   : > { %2215 = vst.msk [vmem:[#allocation3] sm:$0x3f] %vm2204_vm4, %v2214_v4  ;;  %v7146_v4 = vld [vmem:[%s7734_s3 + $0x1d4] sm:$0xff]  }
 0x1d4   : > { %7747 = vst [vmem:[#allocation9_spill] sm:$0xff] %v7146_v4 }
 0x1da   : > { %v2218_v9 = vld [vmem:[#allocation3] sm:$0xf] }
 0x1db   : > { %v2222_v11 = vld [vmem:[#allocation3 + $0x1] sm:$0xf]  ;;  %v6930_v13 = vpack.c.bf16 %v2218_v9, %v2218_v9  ;;  %v6066_v9 = vld [vmem:[%s7734_s3 + $0x38] ss:$0 sps:$4 sm:$0xff]  }
 0x1dc   : > { %v6932_v14 = vpack.c.bf16 %v2222_v11, %v2222_v11  ;;  %v6067_v11 = vld [vmem:[%s7734_s3 + $0x1dc] ss:$0 sps:$4 sm:$0xff]   ;;  %v7161_v36 = vsel %vm2308_vm3, %v6066_v9, 0  ;;  %v7186_v9 = vld [vmem:[%s7734_s3 + $0x1e8] sm:$0xff]  }
 0x1dd   : > { %7746 = vst [vmem:[#allocation8_spill] sm:$0xff] %v6930_v13  ;;  %5298 = vmatmul.mubr.msk.bf16.vlgmr.msra.gmra.mrb[16].mxu1 %vm2304_vm5, %v6930_v13  ;;  %v7164_v37 = vsel %vm2308_vm3, %v6067_v11, 0  ;;  %v7208_v11 = vld [vmem:[%s7734_s3 + $0x1f8] sm:$0xff]  }
 0x1de   : > { %5338 = vmatmul.mubr.msk.bf16.vlgmr.msra.gmra.mrb[16].mxu0 %vm2304_vm5, %v6932_v14  ;;  %5382 = vmatpush3.bf16.msra.mxu1 %v6928_v12 }
 0x1df   : > { %5342 = vmatpush3.bf16.msra.mxu0 %v6923_v5  ;;  %5383 = vmatprep.subr.bf16.mxu1 %v6184_v1 }
 0x1e0   : > { %5343 = vmatprep.subr.bf16.mxu0 %v6184_v1  ;;  %5357 = vmatprep.mubr.msk.bf16.mxu0 %vm6185_vm1, %v6184_v1 }
 0x1e1   : > { %5397 = vmatprep.mubr.msk.bf16.mxu1 %vm6185_vm1, %v6184_v1 }
 0x1e2   : > { %5384 = vmatpush3.bf16.msra.mxu1 %v6948_v16 }
 0x1e3   : > { %5344 = vmatpush3.bf16.msra.mxu0 %v6943_v15  ;;  %5385 = vmatprep.subr.bf16.mxu1 %v6184_v1 }
 0x1e4   : > { %5345 = vmatprep.subr.bf16.mxu0 %v6184_v1 }
 0x1e6   : > { %5386 = vmatpush3.bf16.msra.mxu1 %v6966_v18 }
 0x1e7   : > { %5346 = vmatpush3.bf16.msra.mxu0 %v6961_v17  ;;  %5387 = vmatprep.subr.bf16.mxu1 %v6184_v1 }
 0x1e8   : > { %5347 = vmatprep.subr.bf16.mxu0 %v6184_v1 }
 0x1ea   : > { %5388 = vmatpush3.bf16.msra.mxu1 %v6980_v20 }
 0x1eb   : > { %5348 = vmatpush3.bf16.msra.mxu0 %v6975_v19  ;;  %5389 = vmatprep.subr.bf16.mxu1 %v6184_v1 }
 0x1ec   : > { %5349 = vmatprep.subr.bf16.mxu0 %v6184_v1 }
 0x1ee   : > { %5390 = vmatpush3.bf16.msra.mxu1 %v6994_v22 }
 0x1ef   : > { %5350 = vmatpush3.bf16.msra.mxu0 %v6989_v21  ;;  %5391 = vmatprep.subr.bf16.mxu1 %v6184_v1 }
 0x1f0   : > { %5351 = vmatprep.subr.bf16.mxu0 %v6184_v1 }
 0x1f2   : > { %5392 = vmatpush3.bf16.msra.mxu1 %v7008_v24 }
 0x1f3   : > { %5352 = vmatpush3.bf16.msra.mxu0 %v7003_v23  ;;  %5393 = vmatprep.subr.bf16.mxu1 %v6184_v1 }
 0x1f4   : > { %5353 = vmatprep.subr.bf16.mxu0 %v6184_v1 }
 0x1f6   : > { %5394 = vmatpush3.bf16.msra.mxu1 %v7022_v35 }
 0x1f7   : > { %5354 = vmatpush3.bf16.msra.mxu0 %v7017_v33  ;;  %5395 = vmatprep.subr.bf16.mxu1 %v6184_v1 }
 0x1f8   : > { %5355 = vmatprep.subr.bf16.mxu0 %v6184_v1 }
 0x1fa   : > { %5396 = vmatpush3.bf16.msra.mxu1 %v7040_v39 }
 0x1fb   : > { %5356 = vmatpush3.bf16.msra.mxu0 %v7037_v38  ;;  %5401 = vmatprep.subr.bf16.mxu1 %v6184_v1 }
 0x1fc   : > { %5361 = vmatprep.subr.bf16.mxu0 %v6184_v1 }
 0x1fd   : > { %5398 = vmatmul.mubr.msk.bf16.vlgmr.msra.gmra.mrb[20].mxu1 %vm2304_vm5, %v6930_v13  ;;  %v7171_v13 = vld [vmem:[%s7734_s3 + $0x1e0] sm:$0xff]  }
 0x1fe   : > { %5358 = vmatmul.mubr.msk.bf16.vlgmr.msra.gmra.mrb[16].mxu0 %vm2304_vm5, %v7054_v43  ;;  %5402 = vmatpush3.bf16.msra.mxu1 %v7052_v42 }
 0x1ff   : > { %5362 = vmatpush3.bf16.msra.mxu0 %v7047_v41  ;;  %5403 = vmatprep.subr.bf16.mxu1 %v6184_v1 }
 0x200   : > { %5363 = vmatprep.subr.bf16.mxu0 %v6184_v1  ;;  %5377 = vmatprep.mubr.msk.bf16.mxu0 %vm6185_vm1, %v6184_v1 }
 0x201   : > { %5417 = vmatprep.mubr.msk.bf16.mxu1 %vm6185_vm1, %v6184_v1 }
 0x202   : > { %5404 = vmatpush3.bf16.msra.mxu1 %v7072_v45 }
 0x203   : > { %5364 = vmatpush3.bf16.msra.mxu0 %v7067_v44  ;;  %5405 = vmatprep.subr.bf16.mxu1 %v6184_v1 }
 0x204   : > { %5365 = vmatprep.subr.bf16.mxu0 %v6184_v1 }
 0x206   : > { %5406 = vmatpush3.bf16.msra.mxu1 %v7090_v54 }
 0x207   : > { %5366 = vmatpush3.bf16.msra.mxu0 %v7085_v46  ;;  %5407 = vmatprep.subr.bf16.mxu1 %v6184_v1 }
 0x208   : > { %5367 = vmatprep.subr.bf16.mxu0 %v6184_v1 }
 0x20a   : > { %5408 = vmatpush3.bf16.msra.mxu1 %v7104_v61 }
 0x20b   : > { %5368 = vmatpush3.bf16.msra.mxu0 %v7099_v60  ;;  %5409 = vmatprep.subr.bf16.mxu1 %v6184_v1 }
 0x20c   : > { %5369 = vmatprep.subr.bf16.mxu0 %v6184_v1 }
 0x20e   : > { %5410 = vmatpush3.bf16.msra.mxu1 %v7118_v63 }
 0x20f   : > { %5370 = vmatpush3.bf16.msra.mxu0 %v7113_v62  ;;  %5411 = vmatprep.subr.bf16.mxu1 %v6184_v1 }
 0x210   : > { %5371 = vmatprep.subr.bf16.mxu0 %v6184_v1 }
 0x212   : > { %5412 = vmatpush3.bf16.msra.mxu1 %v7132_v2 }
 0x213   : > { %5372 = vmatpush3.bf16.msra.mxu0 %v7127_v0  ;;  %5413 = vmatprep.subr.bf16.mxu1 %v6184_v1 }
 0x214   : > { %5373 = vmatprep.subr.bf16.mxu0 %v6184_v1 }
 0x216   : > { %5414 = vmatpush3.bf16.msra.mxu1 %v7146_v4  ;;  %v7173_v4 = vpack.c.bf16 %v2216_v40, %v2216_v40  ;;  %v7254_v40 = vld [vmem:[%s7734_s3 + $0x21c] sm:$0xff]  }
 0x217   : > { %5374 = vmatpush3.bf16.msra.mxu0 %v7141_v3  ;;  %5415 = vmatprep.subr.bf16.mxu1 %v6184_v1 }
 0x218   : > { %5375 = vmatprep.subr.bf16.mxu0 %v6184_v1 }
 0x21a   : > { %5416 = vmatpush3.bf16.msra.mxu1 %v7164_v37 }
 0x21b   : > { %5376 = vmatpush3.bf16.msra.mxu0 %v7161_v36  ;;  %5421 = vmatprep.subr.bf16.mxu1 %v6184_v1 }
 0x21c   : > { %5481 = vmatprep.subr.bf16.mxu0 %v6184_v1 }
 0x21d   : > { %5418 = vmatmul.mubr.msk.bf16.vlgmr.msra.gmra.mrb[20].mxu1 %vm2304_vm5, %v6861_v26 }
 0x21e   : > { %5378 = vmatmul.mubr.msk.bf16.vlgmr.msra.gmra.mrb[16].mxu0 %vm2304_vm5, %v7173_v4  ;;  %5422 = vmatpush3.bf16.msra.mxu1 %v7171_v13 }
 0x21f   : > { %5482 = vmatpush3.bf16.msra.mxu0 %v6798_v56  ;;  %5423 = vmatprep.subr.bf16.mxu1 %v6184_v1  ;;  %v7199_v56 = vld [vmem:[%s7734_s3 + $0x1f0] sm:$0xff]  }
 0x220   : > { %5483 = vmatprep.subr.bf16.mxu0 %v6184_v1  ;;  %5437 = vmatprep.mubr.msk.bf16.mxu1 %vm6185_vm1, %v6184_v1 }
 0x221   : > { %5497 = vmatprep.mubr.msk.bf16.mxu0 %vm6185_vm1, %v6184_v1 }
 0x222   : > { %5424 = vmatpush3.bf16.msra.mxu1 %v7186_v9 }
 0x223   : > { %5484 = vmatpush3.bf16.msra.mxu0 %v6804_v57  ;;  %5425 = vmatprep.subr.bf16.mxu1 %v6184_v1  ;;  %v7217_v57 = vld [vmem:[%s7734_s3 + $0x200] sm:$0xff]  }
 0x224   : > { %5485 = vmatprep.subr.bf16.mxu0 %v6184_v1 }
 0x226   : > { %5426 = vmatpush3.bf16.msra.mxu1 %v7199_v56 }
 0x227   : > { %5486 = vmatpush3.bf16.msra.mxu0 %v6811_v58  ;;  %5427 = vmatprep.subr.bf16.mxu1 %v6184_v1  ;;  %v7226_v58 = vld [vmem:[%s7734_s3 + $0x208] sm:$0xff]  }
 0x228   : > { %5487 = vmatprep.subr.bf16.mxu0 %v6184_v1 }
 0x22a   : > { %5428 = vmatpush3.bf16.msra.mxu1 %v7208_v11 }
 0x22b   : > { %5488 = vmatpush3.bf16.msra.mxu0 %v6818_v59  ;;  %5429 = vmatprep.subr.bf16.mxu1 %v6184_v1  ;;  %v7235_v59 = vld [vmem:[%s7734_s3 + $0x210] sm:$0xff]  }
 0x22c   : > { %5489 = vmatprep.subr.bf16.mxu0 %v6184_v1 }
 0x22e   : > { %5430 = vmatpush3.bf16.msra.mxu1 %v7217_v57 }
 0x22f   : > { %5490 = vmatpush3.bf16.msra.mxu0 %v6826_v6  ;;  %5431 = vmatprep.subr.bf16.mxu1 %v6184_v1  ;;  %v6075_v6 = vld [vmem:[%s7734_s3 + $0x218] ss:$0 sps:$4 sm:$0xff]  }
 0x230   : > { %5491 = vmatprep.subr.bf16.mxu0 %v6184_v1 }
 0x232   : > { %5432 = vmatpush3.bf16.msra.mxu1 %v7226_v58 }
 0x233   : > { %5492 = vmatpush3.bf16.msra.mxu0 %v6833_v7  ;;  %5433 = vmatprep.subr.bf16.mxu1 %v6184_v1  ;;  %v7247_v7 = vsel %vm2308_vm3, %v6075_v6, 0  ;;  %v7335_v6 = vld [vmem:[%s7734_s3 + $0x12c] sm:$0xff]  }
 0x234   : > { %5493 = vmatprep.subr.bf16.mxu0 %v6184_v1 }
 0x236   : > { %5434 = vmatpush3.bf16.msra.mxu1 %v7235_v59 }
 0x237   : > { %5494 = vmatpush3.bf16.msra.mxu0 %v6840_v8  ;;  %5435 = vmatprep.subr.bf16.mxu1 %v6184_v1  ;;  %v7267_v8 = vld [vmem:[%s7734_s3 + $0x224] sm:$0xff]  }
 0x238   : > { %5495 = vmatprep.subr.bf16.mxu0 %v6184_v1 }
 0x23a   : > { %5436 = vmatpush3.bf16.msra.mxu1 %v7247_v7 }
 0x23b   : > { %5496 = vmatpush3.bf16.msra.mxu0 %v6848_v10  ;;  %5441 = vmatprep.subr.bf16.mxu1 %v6184_v1  ;;  %v7289_v10 = vld [vmem:[%s7734_s3 + $0x234] sm:$0xff]  }
 0x23c   : > { %5501 = vmatprep.subr.bf16.mxu0 %v6184_v1 }
 0x23d   : > { %5438 = vmatmul.mubr.msk.bf16.vlgmr.msra.gmra.mrb[20].mxu1 %vm2304_vm5, %v6932_v14 }
 0x23e   : > { %5498 = vmatmul.mubr.msk.bf16.vlgmr.msra.gmra.mrb[20].mxu0 %vm2304_vm5, %v6861_v26  ;;  %5442 = vmatpush3.bf16.msra.mxu1 %v7254_v40 }
 0x23f   : > { %5502 = vmatpush3.bf16.msra.mxu0 %v6733_v47  ;;  %5443 = vmatprep.subr.bf16.mxu1 %v6184_v1  ;;  %v7280_v47 = vld [vmem:[%s7734_s3 + $0x22c] sm:$0xff]  }
 0x240   : > { %5503 = vmatprep.subr.bf16.mxu0 %v6184_v1  ;;  %5457 = vmatprep.mubr.msk.bf16.mxu1 %vm6185_vm1, %v6184_v1 }
 0x241   : > { %5517 = vmatprep.mubr.msk.bf16.mxu0 %vm6185_vm1, %v6184_v1 }
 0x242   : > { %5444 = vmatpush3.bf16.msra.mxu1 %v7267_v8 }
 0x243   : > { %5504 = vmatpush3.bf16.msra.mxu0 %v6743_v48  ;;  %5445 = vmatprep.subr.bf16.mxu1 %v6184_v1  ;;  %v7298_v48 = vld [vmem:[%s7734_s3 + $0x23c] sm:$0xff]  }
 0x244   : > { %5505 = vmatprep.subr.bf16.mxu0 %v6184_v1 }
 0x246   : > { %5446 = vmatpush3.bf16.msra.mxu1 %v7280_v47 }
 0x247   : > { %5506 = vmatpush3.bf16.msra.mxu0 %v6754_v49  ;;  %5447 = vmatprep.subr.bf16.mxu1 %v6184_v1  ;;  %v7307_v49 = vld [vmem:[%s7734_s3 + $0x244] sm:$0xff]  }
 0x248   : > { %5507 = vmatprep.subr.bf16.mxu0 %v6184_v1 }
 0x24a   : > { %5448 = vmatpush3.bf16.msra.mxu1 %v7289_v10 }
 0x24b   : > { %5508 = vmatpush3.bf16.msra.mxu0 %v6761_v50  ;;  %5449 = vmatprep.subr.bf16.mxu1 %v6184_v1  ;;  %v7316_v50 = vld [vmem:[%s7734_s3 + $0x24c] sm:$0xff]  }
 0x24c   : > { %5509 = vmatprep.subr.bf16.mxu0 %v6184_v1 }
 0x24e   : > { %5450 = vmatpush3.bf16.msra.mxu1 %v7298_v48 }
 0x24f   : > { %5510 = vmatpush3.bf16.msra.mxu0 %v6768_v51  ;;  %5451 = vmatprep.subr.bf16.mxu1 %v6184_v1  ;;  %v6083_v51 = vld [vmem:[%s7734_s3 + $0x254] ss:$0 sps:$4 sm:$0xff]  }
 0x250   : > { %5511 = vmatprep.subr.bf16.mxu0 %v6184_v1 }
 0x252   : > { %5452 = vmatpush3.bf16.msra.mxu1 %v7307_v49 }
 0x253   : > { %5512 = vmatpush3.bf16.msra.mxu0 %v6775_v52  ;;  %5453 = vmatprep.subr.bf16.mxu1 %v6184_v1  ;;  %v7328_v52 = vsel %vm2308_vm3, %v6083_v51, 0 }
 0x254   : > { %5513 = vmatprep.subr.bf16.mxu0 %v6184_v1 }
 0x256   : > { %5454 = vmatpush3.bf16.msra.mxu1 %v7316_v50 }
 0x257   : > { %5514 = vmatpush3.bf16.msra.mxu0 %v6782_v53  ;;  %5455 = vmatprep.subr.bf16.mxu1 %v6184_v1  ;;  %v7348_v53 = vld [vmem:[%s7734_s3 + $0x134] sm:$0xff]  }
 0x258   : > { %5515 = vmatprep.subr.bf16.mxu0 %v6184_v1 }
 0x25a   : > { %5456 = vmatpush3.bf16.msra.mxu1 %v7328_v52 }
 0x25b   : > { %5516 = vmatpush3.bf16.msra.mxu0 %v6791_v55  ;;  %5461 = vmatprep.subr.bf16.mxu1 %v6184_v1  ;;  %v7361_v55 = vld [vmem:[%s7734_s3 + $0x13c] sm:$0xff]  }
 0x25c   : > { %5521 = vmatprep.subr.bf16.mxu0 %v6184_v1 }
 0x25d   : > { %5458 = vmatmul.mubr.msk.bf16.vlgmr.msra.gmra.mrb[20].mxu1 %vm2304_vm5, %v7054_v43 }
 0x25e   : > { %5518 = vmatmul.mubr.msk.bf16.vlgmr.msra.gmra.mrb[20].mxu0 %vm2304_vm5, %v6932_v14  ;;  %5462 = vmatpush3.bf16.msra.mxu1 %v7335_v6 }
 0x25f   : > { %5522 = vmatpush3.bf16.msra.mxu0 %v6859_v25  ;;  %5463 = vmatprep.subr.bf16.mxu1 %v6184_v1  ;;  %v7370_v25 = vld [vmem:[%s7734_s3 + $0x144] sm:$0xff]  }
 0x260   : > { %5523 = vmatprep.subr.bf16.mxu0 %v6184_v1  ;;  %5477 = vmatprep.mubr.msk.bf16.mxu1 %vm6185_vm1, %v6184_v1 }
 0x261   : > { %5537 = vmatprep.mubr.msk.bf16.mxu0 %vm6185_vm1, %v6184_v1 }
 0x262   : > { %5464 = vmatpush3.bf16.msra.mxu1 %v7348_v53 }
 0x263   : > { %5524 = vmatpush3.bf16.msra.mxu0 %v6869_v27  ;;  %5465 = vmatprep.subr.bf16.mxu1 %v6184_v1  ;;  %v7379_v27 = vld [vmem:[%s7734_s3 + $0x14c] sm:$0xff]  }
 0x264   : > { %5525 = vmatprep.subr.bf16.mxu0 %v6184_v1 }
 0x266   : > { %5466 = vmatpush3.bf16.msra.mxu1 %v7361_v55 }
 0x267   : > { %5526 = vmatpush3.bf16.msra.mxu0 %v6878_v28  ;;  %5467 = vmatprep.subr.bf16.mxu1 %v6184_v1  ;;  %v7388_v28 = vld [vmem:[%s7734_s3 + $0x154] sm:$0xff]  }
 0x268   : > { %5527 = vmatprep.subr.bf16.mxu0 %v6184_v1 }
 0x26a   : > { %5468 = vmatpush3.bf16.msra.mxu1 %v7370_v25 }
 0x26b   : > { %5528 = vmatpush3.bf16.msra.mxu0 %v6885_v29  ;;  %5469 = vmatprep.subr.bf16.mxu1 %v6184_v1  ;;  %v7397_v29 = vld [vmem:[%s7734_s3 + $0x15c] sm:$0xff]  }
 0x26c   : > { %5529 = vmatprep.subr.bf16.mxu0 %v6184_v1 }
 0x26e   : > { %5470 = vmatpush3.bf16.msra.mxu1 %v7379_v27 }
 0x26f   : > { %5530 = vmatpush3.bf16.msra.mxu0 %v6892_v30  ;;  %5471 = vmatprep.subr.bf16.mxu1 %v6184_v1  ;;  %v6091_v30 = vld [vmem:[%s7734_s3 + $0x164] ss:$0 sps:$4 sm:$0xff]  }
 0x270   : > { %5531 = vmatprep.subr.bf16.mxu0 %v6184_v1 }
 0x272   : > { %5472 = vmatpush3.bf16.msra.mxu1 %v7388_v28 }
 0x273   : > { %5532 = vmatpush3.bf16.msra.mxu0 %v6899_v31  ;;  %5473 = vmatprep.subr.bf16.mxu1 %v6184_v1  ;;  %v7409_v31 = vsel %vm2308_vm3, %v6091_v30, 0  ;;  %v6114_v30 = vld [vmem:[%s7738_s7 + $0x10] sm:$0xff]  }
 0x274   : > { %5533 = vmatprep.subr.bf16.mxu0 %v6184_v1 }
 0x276   : > { %5474 = vmatpush3.bf16.msra.mxu1 %v7397_v29 }
 0x277   : > { %5534 = vmatpush3.bf16.msra.mxu0 %v6906_v32  ;;  %5475 = vmatprep.subr.bf16.mxu1 %v6184_v1  ;;  %v2226_v32 = vld [vmem:[#allocation3 + $0x2] sm:$0xf] }
 0x278   : > { %5535 = vmatprep.subr.bf16.mxu0 %v6184_v1 }
 0x27a   : > { %5476 = vmatpush3.bf16.msra.mxu1 %v7409_v31 }
 0x27b   : > { %5536 = vmatpush3.bf16.msra.mxu0 %v6915_v34  ;;  %5581 = vmatprep.subr.bf16.mxu1 %v6184_v1  ;;  %v7453_v34 = vpack.c.bf16 %v2226_v32, %v2226_v32 }
 0x27c   : > { %5541 = vmatprep.subr.bf16.mxu0 %v6184_v1 }
 0x27d   : > { %5478 = vmatmul.mubr.msk.bf16.vlgmr.msra.gmra.mrb[20].mxu1 %vm2304_vm5, %v7173_v4 }
 0x27e   : > { %5538 = vmatmul.mubr.msk.bf16.vlgmr.msra.gmra.mrb[20].mxu0 %vm2304_vm5, %v7054_v43  ;;  %5582 = vmatpush3.bf16.msra.mxu1 %v6928_v12 }
 0x27f   : > { %5542 = vmatpush3.bf16.msra.mxu0 %v6923_v5  ;;  %5583 = vmatprep.subr.bf16.mxu1 %v6184_v1 }
 0x280   : > { %5543 = vmatprep.subr.bf16.mxu0 %v6184_v1  ;;  %5557 = vmatprep.mubr.msk.bf16.mxu0 %vm6185_vm1, %v6184_v1 }
 0x281   : > { %5597 = vmatprep.mubr.msk.bf16.mxu1 %vm6185_vm1, %v6184_v1 }
 0x282   : > { %5584 = vmatpush3.bf16.msra.mxu1 %v6948_v16  ;;  %v7748_v16 = vld [vmem:[#allocation9_spill] sm:$0xff] }
 0x283   : > { %5544 = vmatpush3.bf16.msra.mxu0 %v6943_v15  ;;  %5585 = vmatprep.subr.bf16.mxu1 %v6184_v1 }
 0x284   : > { %5545 = vmatprep.subr.bf16.mxu0 %v6184_v1 }
 0x286   : > { %5586 = vmatpush3.bf16.msra.mxu1 %v6966_v18 }
 0x287   : > { %5546 = vmatpush3.bf16.msra.mxu0 %v6961_v17  ;;  %5587 = vmatprep.subr.bf16.mxu1 %v6184_v1  ;;  %v7749_v17 = vld [vmem:[#allocation8_spill] sm:$0xff] }
 0x288   : > { %5547 = vmatprep.subr.bf16.mxu0 %v6184_v1 }
 0x28a   : > { %5588 = vmatpush3.bf16.msra.mxu1 %v6980_v20 }
 0x28b   : > { %5548 = vmatpush3.bf16.msra.mxu0 %v6975_v19  ;;  %5589 = vmatprep.subr.bf16.mxu1 %v6184_v1 }
 0x28c   : > { %5549 = vmatprep.subr.bf16.mxu0 %v6184_v1 }
 0x28e   : > { %5590 = vmatpush3.bf16.msra.mxu1 %v6994_v22 }
 0x28f   : > { %5550 = vmatpush3.bf16.msra.mxu0 %v6989_v21  ;;  %5591 = vmatprep.subr.bf16.mxu1 %v6184_v1  ;;  %v6092_v21 = vld [vmem:[%s7736_s5] sm:$0xff]  }
 0x290   : > { %5551 = vmatprep.subr.bf16.mxu0 %v6184_v1 }
 0x292   : > { %5592 = vmatpush3.bf16.msra.mxu1 %v7008_v24 }
 0x293   : > { %5552 = vmatpush3.bf16.msra.mxu0 %v7003_v23  ;;  %5593 = vmatprep.subr.bf16.mxu1 %v6184_v1 }
 0x294   : > { %5553 = vmatprep.subr.bf16.mxu0 %v6184_v1 }
 0x296   : > { %5594 = vmatpush3.bf16.msra.mxu1 %v7022_v35 }
 0x297   : > { %5554 = vmatpush3.bf16.msra.mxu0 %v7017_v33  ;;  %5595 = vmatprep.subr.bf16.mxu1 %v6184_v1 }
 0x298   : > { %5555 = vmatprep.subr.bf16.mxu0 %v6184_v1 }
 0x29a   : > { %5596 = vmatpush3.bf16.msra.mxu1 %v7040_v39  ;;  %v6094_v39 = vld [vmem:[%s7736_s5 + $0x10] sm:$0xff]  }
 0x29b   : > { %5556 = vmatpush3.bf16.msra.mxu0 %v7037_v38  ;;  %5601 = vmatprep.subr.bf16.mxu1 %v6184_v1  ;;  %v6093_v38 = vld [vmem:[%s7736_s5 + $0x8] sm:$0xff]  }
 0x29c   : > { %5561 = vmatprep.subr.bf16.mxu0 %v6184_v1 }
 0x29d   : > { %5598 = vmatmul.mubr.msk.bf16.vlgmr.msra.gmra.mrb[24].mxu1 %vm2304_vm5, %v6861_v26 }
 0x29e   : > { %5558 = vmatmul.mubr.msk.bf16.vlgmr.msra.gmra.mrb[20].mxu0 %vm2304_vm5, %v7453_v34  ;;  %5602 = vmatpush3.bf16.msra.mxu1 %v7052_v42  ;;  %v6096_v42 = vld [vmem:[%s7736_s5 + $0x20] sm:$0xff]  }
 0x29f   : > { %5562 = vmatpush3.bf16.msra.mxu0 %v7047_v41  ;;  %5603 = vmatprep.subr.bf16.mxu1 %v6184_v1  ;;  %v6095_v41 = vld [vmem:[%s7736_s5 + $0x18] sm:$0xff]  }
 0x2a0   : > { %5563 = vmatprep.subr.bf16.mxu0 %v6184_v1  ;;  %5577 = vmatprep.mubr.msk.bf16.mxu0 %vm6185_vm1, %v6184_v1 }
 0x2a1   : > { %5617 = vmatprep.mubr.msk.bf16.mxu1 %vm6185_vm1, %v6184_v1 }
 0x2a2   : > { %5604 = vmatpush3.bf16.msra.mxu1 %v7072_v45 }
 0x2a3   : > { %5564 = vmatpush3.bf16.msra.mxu0 %v7067_v44  ;;  %5605 = vmatprep.subr.bf16.mxu1 %v6184_v1 }
 0x2a4   : > { %5565 = vmatprep.subr.bf16.mxu0 %v6184_v1 }
 0x2a6   : > { %5606 = vmatpush3.bf16.msra.mxu1 %v7090_v54  ;;  %v6112_v54 = vld [vmem:[%s7738_s7] sm:$0xff]  }
 0x2a7   : > { %5566 = vmatpush3.bf16.msra.mxu0 %v7085_v46  ;;  %5607 = vmatprep.subr.bf16.mxu1 %v6184_v1 }
 0x2a8   : > { %5567 = vmatprep.subr.bf16.mxu0 %v6184_v1 }
 0x2aa   : > { %5608 = vmatpush3.bf16.msra.mxu1 %v7104_v61 }
 0x2ab   : > { %5568 = vmatpush3.bf16.msra.mxu0 %v7099_v60  ;;  %5609 = vmatprep.subr.bf16.mxu1 %v6184_v1  ;;  %v6113_v60 = vld [vmem:[%s7738_s7 + $0x8] sm:$0xff]  }
 0x2ac   : > { %5569 = vmatprep.subr.bf16.mxu0 %v6184_v1 }
 0x2ae   : > { %5610 = vmatpush3.bf16.msra.mxu1 %v7118_v63 }
 0x2af   : > { %5570 = vmatpush3.bf16.msra.mxu0 %v7113_v62  ;;  %5611 = vmatprep.subr.bf16.mxu1 %v6184_v1 }
 0x2b0   : > { %5571 = vmatprep.subr.bf16.mxu0 %v6184_v1  ;;  %v2346_v26 = vpop.f32.mrb[16].mxu1 }
 0x2b1   : > { %v5299_v5 = vpop.f32.mrb[17].mxu1 }
 0x2b2   : > { %5612 = vmatpush3.bf16.msra.mxu1 %v7132_v2  ;;  %v2349_v12 = vpop.f32.mrb[18].mxu1 }
 0x2b3   : > { %5572 = vmatpush3.bf16.msra.mxu0 %v7127_v0  ;;  %v5300_v15 = vpop.f32.mrb[19].mxu1  ;;  %5613 = vmatprep.subr.bf16.mxu1 %v6184_v1  ;;  %v4568_v0 = vld [vmem:[%s7735_s4] ss:$0 sm:$0xff] }
 0x2b4   : > { %5573 = vmatprep.subr.bf16.mxu0 %v6184_v1 }
 0x2b6   : > { %5614 = vmatpush3.bf16.msra.mxu1 %v7748_v16 }
 0x2b7   : > { %5574 = vmatpush3.bf16.msra.mxu0 %v7141_v3  ;;  %5615 = vmatprep.subr.bf16.mxu1 %v6184_v1 }
 0x2b8   : > { %5575 = vmatprep.subr.bf16.mxu0 %v6184_v1 }
 0x2ba   : > { %5616 = vmatpush3.bf16.msra.mxu1 %v7164_v37 }
 0x2bb   : > { %5576 = vmatpush3.bf16.msra.mxu0 %v7161_v36  ;;  %5621 = vmatprep.subr.bf16.mxu1 %v6184_v1 }
 0x2bc   : > { %5681 = vmatprep.subr.bf16.mxu0 %v6184_v1 }
 0x2bd   : > { %5618 = vmatmul.mubr.msk.bf16.vlgmr.msra.gmra.mrb[24].mxu1 %vm2304_vm5, %v6932_v14 }
 0x2be   : > { %5578 = vmatmul.mubr.msk.bf16.vlgmr.msra.gmra.mrb[20].mxu0 %vm2304_vm5, %v7749_v17  ;;  %5622 = vmatpush3.bf16.msra.mxu1 %v7171_v13 }
 0x2bf   : > { %5637 = vmatprep.mubr.msk.bf16.mxu1 %vm6185_vm1, %v6184_v1  ;;  %5623 = vmatprep.subr.bf16.mxu1 %v6184_v1 }
 0x2c0   : > { %5691 = vmatprep.mubr.msk.bf16.mxu0 %vm6185_vm1, %v6184_v1  ;;  %5682 = vmatpush3.bf16.msra.mxu0 %v6092_v21 }
 0x2c1   : > { %5683 = vmatprep.subr.bf16.mxu0 %v6184_v1 }
 0x2c2   : > { %5624 = vmatpush3.bf16.msra.mxu1 %v7186_v9 }
 0x2c3   : > { %5625 = vmatprep.subr.bf16.mxu1 %v6184_v1 }
 0x2c4   : > { %5684 = vmatpush3.bf16.msra.mxu0 %v6093_v38 }
 0x2c5   : > { %5685 = vmatprep.subr.bf16.mxu0 %v6184_v1 }
 0x2c6   : > { %5626 = vmatpush3.bf16.msra.mxu1 %v7199_v56  ;;  %v6097_v56 = vld [vmem:[%s7736_s5 + $0x28] sm:$0xff]  }
 0x2c7   : > { %5627 = vmatprep.subr.bf16.mxu1 %v6184_v1 }
 0x2c8   : > { %5686 = vmatpush3.bf16.msra.mxu0 %v6094_v39 }
 0x2c9   : > { %5687 = vmatprep.subr.bf16.mxu0 %v6184_v1 }
 0x2ca   : > { %5628 = vmatpush3.bf16.msra.mxu1 %v7208_v11 }
 0x2cb   : > { %5629 = vmatprep.subr.bf16.mxu1 %v6184_v1 }
 0x2cc   : > { %5688 = vmatpush3.bf16.msra.mxu0 %v6095_v41 }
 0x2cd   : > { %5689 = vmatprep.subr.bf16.mxu0 %v6184_v1 }
 0x2ce   : > { %5630 = vmatpush3.bf16.msra.mxu1 %v7217_v57  ;;  %v6098_v57 = vld [vmem:[%s7736_s5 + $0x30] sm:$0xff]  }
 0x2cf   : > { %5631 = vmatprep.subr.bf16.mxu1 %v6184_v1 }
 0x2d0   : > { %5690 = vmatpush3.bf16.msra.mxu0 %v6096_v42 }
 0x2d1   : > { %5695 = vmatprep.subr.bf16.mxu0 %v6184_v1 }
 0x2d2   : > { %5632 = vmatpush3.bf16.msra.mxu1 %v7226_v58  ;;  %v6099_v58 = vld [vmem:[%s7736_s5 + $0x38] sm:$0xff]  }
 0x2d3   : > { %5633 = vmatprep.subr.bf16.mxu1 %v6184_v1 }
 0x2d6   : > { %5634 = vmatpush3.bf16.msra.mxu1 %v7235_v59  ;;  %v6100_v59 = vld [vmem:[%s7736_s5 + $0x40] sm:$0xff]  }
 0x2d7   : > { %5635 = vmatprep.subr.bf16.mxu1 %v6184_v1 }
 0x2da   : > { %5636 = vmatpush3.bf16.msra.mxu1 %v7247_v7  ;;  %v6101_v7 = vld [vmem:[%s7736_s5 + $0x48] sm:$0xff]  }
 0x2db   : > { %5641 = vmatprep.subr.bf16.mxu1 %v6184_v1 }
 0x2dd   : > { %5638 = vmatmul.mubr.msk.bf16.vlgmr.msra.gmra.mrb[24].mxu1 %vm2304_vm5, %v7054_v43 }
 0x2de   : > { %5642 = vmatpush3.bf16.msra.mxu1 %v7254_v40  ;;  %5657 = vmatprep.mubr.msk.bf16.mxu1 %vm6185_vm1, %v6184_v1 }
 0x2df   : > { %5643 = vmatprep.subr.bf16.mxu1 %v6184_v1 }
 0x2e2   : > { %5644 = vmatpush3.bf16.msra.mxu1 %v7267_v8  ;;  %v6102_v8 = vld [vmem:[%s7736_s5 + $0x50] sm:$0xff]  }
 0x2e3   : > { %5645 = vmatprep.subr.bf16.mxu1 %v6184_v1 }
 0x2e6   : > { %5646 = vmatpush3.bf16.msra.mxu1 %v7280_v47 }
 0x2e7   : > { %5647 = vmatprep.subr.bf16.mxu1 %v6184_v1 }
 0x2ea   : > { %5648 = vmatpush3.bf16.msra.mxu1 %v7289_v10  ;;  %v6103_v10 = vld [vmem:[%s7736_s5 + $0x58] sm:$0xff]  }
 0x2eb   : > { %5649 = vmatprep.subr.bf16.mxu1 %v6184_v1 }
 0x2ee   : > { %5650 = vmatpush3.bf16.msra.mxu1 %v7298_v48  ;;  %v6104_v48 = vld [vmem:[%s7736_s5 + $0x60] sm:$0xff]  }
 0x2ef   : > { %5651 = vmatprep.subr.bf16.mxu1 %v6184_v1 }
 0x2f1   : > { %v2758_v13 = vpop.f32.mrb[16].mxu0 }
 0x2f2   : > { %v7535_v14 = vadd.f32 %v2758_v13, %v2346_v26  ;;  %v5379_v18 = vpop.f32.mrb[17].mxu0  ;;  %5652 = vmatpush3.bf16.msra.mxu1 %v7307_v49  ;;  %v6105_v49 = vld [vmem:[%s7736_s5 + $0x68] sm:$0xff]  }
 0x2f3   : > { %v2761_v19 = vpop.f32.mrb[18].mxu0  ;;  %5653 = vmatprep.subr.bf16.mxu1 %v6184_v1 }
 0x2f4   : > { %v5380_v20 = vpop.f32.mrb[19].mxu0 }
 0x2f6   : > { %5654 = vmatpush3.bf16.msra.mxu1 %v7316_v50  ;;  %v6106_v50 = vld [vmem:[%s7736_s5 + $0x70] sm:$0xff]  }
 0x2f7   : > { %5655 = vmatprep.subr.bf16.mxu1 %v6184_v1 }
 0x2fa   : > { %5656 = vmatpush3.bf16.msra.mxu1 %v7328_v52  ;;  %v6107_v52 = vld [vmem:[%s7736_s5 + $0x78] sm:$0xff]  }
 0x2fb   : > { %5661 = vmatprep.subr.bf16.mxu1 %v6184_v1 }
 0x2fd   : > { %5658 = vmatmul.mubr.msk.bf16.vlgmr.msra.gmra.mrb[24].mxu1 %vm2304_vm5, %v7453_v34  ;;  %v3713_v34 = vld [vmem:[%s7737_s6] sm:$0x1] }
 0x2fe   : > { %5662 = vmatpush3.bf16.msra.mxu1 %v7335_v6  ;;  %5677 = vmatprep.mubr.msk.bf16.mxu1 %vm6185_vm1, %v6184_v1 }
 0x2ff   : > { %5663 = vmatprep.subr.bf16.mxu1 %v6184_v1 }
 0x302   : > { %5664 = vmatpush3.bf16.msra.mxu1 %v7348_v53  ;;  %v6108_v53 = vld [vmem:[%s7736_s5 + $0x80] sm:$0xff]  }
 0x303   : > { %5665 = vmatprep.subr.bf16.mxu1 %v6184_v1 }
 0x306   : > { %5666 = vmatpush3.bf16.msra.mxu1 %v7361_v55  ;;  %v6109_v55 = vld [vmem:[%s7736_s5 + $0x88] sm:$0xff]  }
 0x307   : > { %5667 = vmatprep.subr.bf16.mxu1 %v6184_v1 }
 0x30a   : > { %5668 = vmatpush3.bf16.msra.mxu1 %v7370_v25  ;;  %v6110_v25 = vld [vmem:[%s7736_s5 + $0x90] sm:$0xff]  }
 0x30b   : > { %5669 = vmatprep.subr.bf16.mxu1 %v6184_v1 }
 0x30e   : > { %5670 = vmatpush3.bf16.msra.mxu1 %v7379_v27  ;;  %v6111_v27 = vld [vmem:[%s7736_s5 + $0x98] sm:$0xff]  }
 0x30f   : > { %5671 = vmatprep.subr.bf16.mxu1 %v6184_v1 }
 0x312   : > { %5672 = vmatpush3.bf16.msra.mxu1 %v7388_v28 }
 0x313   : > { %5673 = vmatprep.subr.bf16.mxu1 %v6184_v1 }
 0x316   : > { %5674 = vmatpush3.bf16.msra.mxu1 %v7397_v29 }
 0x317   : > { %5675 = vmatprep.subr.bf16.mxu1 %v6184_v1 }
 0x31a   : > { %5676 = vmatpush3.bf16.msra.mxu1 %v7409_v31  ;;  %v6115_v31 = vld [vmem:[%s7738_s7 + $0x18] ss:$0 sps:$4 sm:$0x11]  }
 0x31b   : > { %5737 = vmatprep.subr.bf16.mxu1 %v6184_v1  ;;  %v4099_v32 = vsel %vm4097_vm8, %v6115_v31, 0 }
 0x31d   : > { %5678 = vmatmul.mubr.msk.bf16.vlgmr.msra.gmra.mrb[24].mxu1 %vm2304_vm5, %v7749_v17 }
 0x31e   : > { %5745 = vmatprep.mubr.msk.bf16.mxu1 %vm6185_vm1, %v6184_v1  ;;  %5738 = vmatpush3.bf16.msra.mxu1 %v6112_v54 }
 0x31f   : > { %5739 = vmatprep.subr.bf16.mxu1 %v6184_v1 }
 0x322   : > { %5740 = vmatpush3.bf16.msra.mxu1 %v6113_v60 }
 0x323   : > { %5741 = vmatprep.subr.bf16.mxu1 %v6184_v1 }
 0x326   : > { %5742 = vmatpush3.bf16.msra.mxu1 %v6114_v30 }
 0x327   : > { %5743 = vmatprep.subr.bf16.mxu1 %v6184_v1 }
 0x32a   : > { %5744 = vmatpush3.bf16.msra.mxu1 %v4099_v32 }
 0x350   : > { %v3281_v22 = vpop.f32.mrb[20].mxu1 }
 0x351   : > { %v3290_v23 = vmax.f32 %v7535_v14, %v3281_v22  ;;  %v5479_v24 = vpop.f32.mrb[21].mxu1 }
 0x352   : > { %v3284_v33 = vpop.f32.mrb[22].mxu1 }
 0x353   : > { %v5480_v35 = vpop.f32.mrb[23].mxu1 }
 0x391   : > { %v3488_v43 = vpop.f32.mrb[20].mxu0 }
 0x392   : > { %v5579_v44 = vpop.f32.mrb[21].mxu0 }
 0x393   : > { %v3491_v45 = vpop.f32.mrb[22].mxu0 }
 0x394   : > { %v5580_v46 = vpop.f32.mrb[23].mxu0 }
 0x3f0   : > { %v3691_v61 = vpop.f32.mrb[24].mxu1 }
 0x3f1   : > { %v3700_v62 = vmax.f32 %v3488_v43, %v3691_v61  ;;  %v5679_v63 = vpop.f32.mrb[25].mxu1 }
 0x3f2   : > { %v3694_v2 = vpop.f32.mrb[26].mxu1 }
 0x3f3   : > { %v3701_v3 = vmax.f32 %v3290_v23, %v3700_v62  ;;  %v5680_v4 = vpop.f32.mrb[27].mxu1 }
 0x3f5   : > { %v3709_v36 = vadd.f32 %v4568_v0, %v3701_v3 }
 0x3f7   : > { %v3710_v37 = vmax.f32 %v3709_v36, 0.0 }
 0x3f9   : > { %3712 = vst.msk [vmem:[#allocation4] sm:$0xf] %vm3711_vm6, %v3710_v37 }
 0x400   : > { %v3714_v9 = vld [vmem:[#allocation4] sm:$0x1]  ;;  %v3801_v40 = vld [vmem:[#allocation4 + $0x1] sm:$0x1]  ;;  %v3888_v51 = vld [vmem:[#allocation4 + $0x2] sm:$0x1] }
 0x401   : > { %v3715_v11 = vpack.c.bf16 %v3714_v9, %v3714_v9  ;;  %v3802_v47 = vpack.c.bf16 %v3801_v40, %v3801_v40  ;;  %v3889_v6 = vpack.c.bf16 %v3888_v51, %v3888_v51  ;;  %v3975_v28 = vld [vmem:[#allocation4 + $0x3] sm:$0x1] }
 0x402   : > { %v3976_v29 = vpack.c.bf16 %v3975_v28, %v3975_v28 }
 0x403   : > { %5692 = vmatmul.mubr.msk.bf16.vlgmr.msra.gmra.mrb[24].mxu0 %vm3756_vm7, %v3715_v11 }
 0x404   : > { %5696 = vmatpush3.bf16.msra.mxu0 %v6097_v56  ;;  %5705 = vmatprep.mubr.msk.bf16.mxu0 %vm6185_vm1, %v6184_v1 }
 0x405   : > { %5697 = vmatprep.subr.bf16.mxu0 %v6184_v1 }
 0x408   : > { %5698 = vmatpush3.bf16.msra.mxu0 %v6098_v57 }
 0x409   : > { %5699 = vmatprep.subr.bf16.mxu0 %v6184_v1 }
 0x40c   : > { %5700 = vmatpush3.bf16.msra.mxu0 %v6099_v58 }
 0x40d   : > { %5701 = vmatprep.subr.bf16.mxu0 %v6184_v1 }
 0x410   : > { %5702 = vmatpush3.bf16.msra.mxu0 %v6100_v59 }
 0x411   : > { %5703 = vmatprep.subr.bf16.mxu0 %v6184_v1 }
 0x414   : > { %5704 = vmatpush3.bf16.msra.mxu0 %v6101_v7 }
 0x415   : > { %5709 = vmatprep.subr.bf16.mxu0 %v6184_v1 }
 0x417   : > { %5706 = vmatmul.mubr.msk.bf16.vlgmr.msra.gmra.mrb[24].mxu0 %vm3756_vm7, %v3802_v47 }
 0x418   : > { %5710 = vmatpush3.bf16.msra.mxu0 %v6102_v8  ;;  %5719 = vmatprep.mubr.msk.bf16.mxu0 %vm6185_vm1, %v6184_v1 }
 0x419   : > { %5711 = vmatprep.subr.bf16.mxu0 %v6184_v1 }
 0x41c   : > { %5712 = vmatpush3.bf16.msra.mxu0 %v6103_v10 }
 0x41d   : > { %5713 = vmatprep.subr.bf16.mxu0 %v6184_v1 }
 0x420   : > { %5714 = vmatpush3.bf16.msra.mxu0 %v6104_v48 }
 0x421   : > { %5715 = vmatprep.subr.bf16.mxu0 %v6184_v1 }
 0x424   : > { %5716 = vmatpush3.bf16.msra.mxu0 %v6105_v49 }
 0x425   : > { %5717 = vmatprep.subr.bf16.mxu0 %v6184_v1 }
 0x428   : > { %5718 = vmatpush3.bf16.msra.mxu0 %v6106_v50 }
 0x429   : > { %5723 = vmatprep.subr.bf16.mxu0 %v6184_v1 }
 0x42b   : > { %5720 = vmatmul.mubr.msk.bf16.vlgmr.msra.gmra.mrb[24].mxu0 %vm3756_vm7, %v3889_v6 }
 0x42c   : > { %5724 = vmatpush3.bf16.msra.mxu0 %v6107_v52  ;;  %5733 = vmatprep.mubr.msk.bf16.mxu0 %vm6185_vm1, %v6184_v1 }
 0x42d   : > { %5725 = vmatprep.subr.bf16.mxu0 %v6184_v1 }
 0x430   : > { %5726 = vmatpush3.bf16.msra.mxu0 %v6108_v53 }
 0x431   : > { %5727 = vmatprep.subr.bf16.mxu0 %v6184_v1 }
 0x434   : > { %5728 = vmatpush3.bf16.msra.mxu0 %v6109_v55 }
 0x435   : > { %5729 = vmatprep.subr.bf16.mxu0 %v6184_v1 }
 0x438   : > { %5730 = vmatpush3.bf16.msra.mxu0 %v6110_v25 }
 0x439   : > { %5731 = vmatprep.subr.bf16.mxu0 %v6184_v1  ;;  %v4071_v1 = vld [vmem:[%s7739_s8] sm:$0x1] }
 0x43c   : > { %5732 = vmatpush3.bf16.msra.mxu0 %v6111_v27 }
 0x43f   : > { %5734 = vmatmul.mubr.msk.bf16.vlgmr.msra.gmra.mrb[24].mxu0 %vm3756_vm7, %v3976_v29 }
 0x512   : > { %v4055_v26 = vpop.f32.mrb[24].mxu0 }
 0x513   : > { %v5750_v5 = vadd.f32 %v4055_v26, %v3713_v34  ;;  %v5735_v12 = vpop.f32.mrb[25].mxu0 }
 0x514   : > { %v4058_v15 = vpop.f32.mrb[26].mxu0 }
 0x515   : > { %v4062_v16 = vmax.f32 %v5750_v5, 0.0  ;;  %v5736_v17 = vpop.f32.mrb[27].mxu0 }
 0x517   : > { %v4063_v13 = vpack.c.bf16 %v4062_v16, %v4062_v16 }
 0x519   : > { %5746 = vmatmul.mubr.msk.bf16.vlgmr.msra.gmra.mrb[28].mxu1 %vm4093_vm9, %v4063_v13 }
 0x5ec   : > { %v4135_v14 = vpop.f32.mrb[28].mxu1 }
 0x5ed   : > { %v4136_v18 = vadd.f32 %v4135_v14, %v4071_v1  ;;  %v5747_v19 = vpop.f32.mrb[29].mxu1 }
 0x5ee   : > { %v4138_v20 = vpop.f32.mrb[30].mxu1 }
 0x5ef   : > { %v5748_v21 = vpop.f32.mrb[31].mxu1  ;;  %v4142_v22 = vsel %vm4141_vm10, %v4136_v18, -inf }
 0x5f0   : > { %4143 = vmax.xlane.f32.xlu0 %v4142_v22 }
 0x67d   : > { %v4144_v23 = vpop.xlane.xlu0 %4143 }
 0x67e   : > { %v4145_v24 = vsub.f32 %v4136_v18, %v4144_v23 }
 0x680   : > { %v4146_v33 = vmul.f32 1.442695, %v4145_v24 }
 0x682   : > { %6116 = vpow2.f32 %v4146_v33 }
 0x68c   : > { %v6117_v35 = vpop.eup %6116 }
 0x68d   : > { %v4148_v38 = vsel %vm4141_vm10, %v6117_v35, 0.0 }
 0x68e   : > { %4149 = vadd.xlane.f32.xlu0 %v4148_v38 }
 0x71b   : > { %v4150_v39 = vpop.xlane.xlu0 %4149 }
 0x71c   : > { %6118 = vlog2.f32 %v4150_v39 }
 0x726   : > { %v6119_v41 = vpop.eup %6118 }
 0x727   : > { %v4152_v42 = vmul.f32 0.6931472, %v6119_v41 }
 0x729   : > { %v4153_v43 = vsub.f32 %v4145_v24, %v4152_v42 }
 0x72b   : > { %4154 = vst.msk [vmem:[%s324_s21] sm:$0x1] %vm4141_vm10, %v4153_v43 }
 0x72c   : > { %6133 = shalt.err (!%p6130_p3)
}
 0x72d   : > { %s6134_s16 = scalar_lea.hbm %s7688_s26, 16  ;;  %s6138_s21 = scalar_lea.hbm %s7740_s9, 32 }
 0x72e   : > { %p6135_p4 = scmp.ne.s32.totalorder %s7688_s26, %s6134_s16  ;;  %p6139_p9 = scmp.lt.u32.totalorder %s7688_s26, %s7740_s9 }
 0x72f   : > { %p6140_p10 = scmp.lt.u32.totalorder %s6138_s21, %s6134_s16  ;;  %p6142_p12 = scmp.lt.u32.totalorder %s6134_s16, %s7688_s26 }
 0x730   : > { %p6136_p7 = pnand %p6135_p4, %p6275_p5 }
 0x731   : > { %p6141_p11 = por %p6140_p10, %p6139_p9 }
 0x732   : > { %p6137_p8 = pneg %p6136_p7 }
 0x733   : > { %p6143_p13 = por %p6142_p12, %p6141_p11 }
 0x735   : > { %p6144_p0 = pnand %p6143_p13, %p6137_p8 }
 0x737   : > { %6147 = shalt.err (!%p6144_p0)
}
 0x738   : > { %5951 = dma.vmem_to_hbm [thread:$0]  (%p6275_p5), %s7690_s22, 16, %s7688_s26, %s4156_s27  }
 0x739 PF: > { %p5957_p1 = scmp.ge.s32.totalorder %s6182_s12, 2  ;;  %s4180_s28 = sand.u32 1, %s6170_s30  }
 0x73a   : > { %s4181_s13 = scalar_lea.sflag [#allocation6], %s4180_s28 }
 0x73b   : > { %p5954_p2 = pnand %p5957_p1, %p6279_p6 }
 0x73d   : > { %6165 = dma.done.wait (!%p5954_p2), %s4181_s13, 16  }
 0x73e   : > { %6167 = vsyncadd (!%p5954_p2), %s4181_s13, 4294967280  ;;  %p19_p3 = scmp.ge.s32.totalorder %s6262_s15, 4   ;;  %s7750_s30 = smov %s6174_s10 }
 0x73f   : > { %s7751_s10 = smov %s6178_s11  ;;  %s7752_s11 = smov %s6273_s18 }
 0x740   : > { %s7753_s12 = smov %s6262_s15  ;;  %21 = sbr.rel (!%p19_p3) target bundleno = 3 (0x3), region = 115 }
 0x747   :  { %4185 = vsyncpa [#allocation6], 1 }
 0x748   :  { %4187 = vsyncpa [#allocation6 + $0x1], 1 }

</bundles_post_ra>
